<compile_context>
chip_gen: v6e
topology: v6e:2x2x1
jax: 0.10.0
libtpu: 0.0.40
codegen_flags: <defaults>
</compile_context>

<pallas_src>
import functools

import jax
import jax.numpy as jnp
from jax.experimental import pallas as pl
from jax.experimental.pallas import tpu as pltpu


def _round_up(n, m):
    return ((n + m - 1) // m) * m


def _vmem_limit(est_bytes):
    # 4x slack over the estimated per-call working set, 8 MiB floor; always far
    # below the scoped defaults / physical VMEM on v5e, v6e and v7x.
    return int(max(8 << 20, 4 * est_bytes))


def _choose_tm(m, max_tm=1024):
    """Lane-tile width: multiple of 128, <= max_tm, >= 2 tiles when possible
    (so the 'parallel' grid axis can use both v7x TensorCores), minimal pad."""
    m128 = _round_up(m, 128)
    if m128 <= 128:
        return 128
    n_tiles = max(2, -(-m128 // max_tm))
    return _round_up(-(-m128 // n_tiles), 128)


def _choose_tb(bsz):
    """Batch-tile for the dense heads: multiple of 16 (bf16 sublane pack)."""
    bp = _round_up(bsz, 16)
    if bp <= 16:
        return bp
    if bp <= 512:
        return _round_up(-(-bp // 2), 16)     # >= 2 tiles for megacore
    return 256


# --------------------------------------------------------------------------
# Pallas kernels
# --------------------------------------------------------------------------
def _conv_gemm_kernel(w_ref, p_ref, b_ref, a_ref, o_ref):
    """o = bf16(PReLU(W @ P + b)); W:(Cout,K) bf16, P:(K,TM) bf16."""
    y = jnp.dot(w_ref[...], p_ref[...], preferred_element_type=jnp.float32)
    y = y + b_ref[...]                                # (Cout, 1) lane-broadcast
    y = jnp.where(y > 0.0, y, y * a_ref[...])         # per-channel PReLU (f32)
    o_ref[...] = y.astype(o_ref.dtype)                # bf16 store


def conv_gemm_prelu(wm, patches, b, alpha, tm):
    """wm:(Cout,K) bf16, patches:(K,Mp) bf16, b/alpha:(Cout,1) f32. Grid over M."""
    cout, kk = wm.shape
    mp = patches.shape[1]
    est = 2 * (kk * tm + cout * tm + cout * kk) * 2 + 32 * cout
    return pl.pallas_call(
        _conv_gemm_kernel,
        out_shape=jax.ShapeDtypeStruct((cout, mp), jnp.bfloat16),
        grid=(mp // tm,),
        in_specs=[
            pl.BlockSpec((cout, kk), lambda m: (0, 0)),   # weights: resident
            pl.BlockSpec((kk, tm), lambda m: (0, m)),     # patches: M-tiled
            pl.BlockSpec((cout, 1), lambda m: (0, 0)),    # bias column (f32)
            pl.BlockSpec((cout, 1), lambda m: (0, 0)),    # PReLU alpha (f32)
        ],
        out_specs=pl.BlockSpec((cout, tm), lambda m: (0, m)),
        compiler_params=pltpu.CompilerParams(
            dimension_semantics=("parallel",),
            vmem_limit_bytes=_vmem_limit(est)),
    )(wm, patches, b, alpha)


def _dense_heads_kernel(x_ref, w5_ref, b5_ref, a5_ref, w6_ref, b6_ref, o_ref):
    """dense5 + PReLU5 + fused (2|4|10) heads + softmax(first 2 cols)."""
    h = jnp.dot(x_ref[...], w5_ref[...], preferred_element_type=jnp.float32)
    h = h + b5_ref[...]
    h = jnp.where(h > 0.0, h, h * a5_ref[...])
    y = jnp.dot(h.astype(jnp.bfloat16), w6_ref[...],
                preferred_element_type=jnp.float32) + b6_ref[...]
    # softmax over columns 0:2 only (dense6_1); other columns pass through
    col = jax.lax.broadcasted_iota(jnp.int32, y.shape, 1)
    is_logit = col < 2
    masked = jnp.where(is_logit, y, -jnp.inf)
    mx = jnp.max(masked, axis=1, keepdims=True)
    e = jnp.exp(masked - mx)                          # exp(-inf) = 0 elsewhere
    probs = e / jnp.sum(e, axis=1, keepdims=True)
    o_ref[...] = jnp.where(is_logit, probs, y)


# --------------------------------------------------------------------------
# Layer wrappers (glue = patch/window extraction, padding, reshapes)
# --------------------------------------------------------------------------
def conv2d_prelu_cnhw(x, wm, b, alpha, kh, kw):
    """Valid conv (stride 1) + bias + PReLU in bf16 CNHW layout via im2col GEMM."""
    c, bsz, h, w = x.shape
    cout, kk = wm.shape
    oh, ow = h - kh + 1, w - kw + 1
    m = bsz * oh * ow
    # TODO(synk): fuse this patch extraction into the Pallas kernel (shifted
    # GEMM accumulations over a VMEM-resident activation tile).
    taps = [x[:, :, i:i + oh, j:j + ow] for i in range(kh) for j in range(kw)]
    p = jnp.stack(taps, axis=1).reshape(c * kh * kw, m)        # bf16 (Cin*kh*kw, M)
    tm = _choose_tm(m)
    mp = _round_up(m, tm)
    p = jnp.pad(p, ((0, kk - c * kh * kw), (0, mp - m)))       # K-pack + M-tile pad
    y = conv_gemm_prelu(wm, p, b, alpha, tm)                   # (Cout, Mp) bf16
    return y[:, :m].reshape(cout, bsz, oh, ow)                 # CNHW, no transpose


def maxpool2d_ceil_cnhw(x, k, s):
    """MaxPool2d(kernel=k, stride=s, ceil_mode=True) in CNHW layout.

    Fused jnp.maximum reduction over the k*k strided window slices (XLA fuses
    slice+max; nothing k*k-inflated is materialized, no extra kernel launch).
    """
    c, bsz, h, w = x.shape
    oh = -(-(h - k) // s) + 1
    ow = -(-(w - k) // s) + 1
    hp = (oh - 1) * s + k
    wp = (ow - 1) * s + k
    if hp > h or wp > w:
        x = jnp.pad(x, ((0, 0), (0, 0), (0, hp - h), (0, wp - w)),
                    constant_values=-jnp.inf)
    wins = [x[:, :, i:i + s * (oh - 1) + 1:s, j:j + s * (ow - 1) + 1:s]
            for i in range(k) for j in range(k)]
    return functools.reduce(jnp.maximum, wins)


def dense_heads(flat_bf16, p):
    """Returns (probs, bbox, lmk) from the flattened (B, 1152) bf16 features."""
    bsz = flat_bf16.shape[0]
    tb = _choose_tb(bsz)
    bp = _round_up(bsz, tb)
    xpad = jnp.pad(flat_bf16, ((0, bp - bsz), (0, 0)))
    est = (2 * (tb * 1152 + 1152 * 256 + 256 * 16) * 2   # bf16 operands, 2 bufs
           + 2 * tb * 16 * 4 + 2 * (256 + 16) * 4)       # f32 out + biases
    out = pl.pallas_call(
        _dense_heads_kernel,
        out_shape=jax.ShapeDtypeStruct((bp, 16), jnp.float32),
        grid=(bp // tb,),
        in_specs=[
            pl.BlockSpec((tb, 1152), lambda b: (b, 0)),   # activations: B-tiled
            pl.BlockSpec((1152, 256), lambda b: (0, 0)),  # w5 resident
            pl.BlockSpec((1, 256), lambda b: (0, 0)),     # b5
            pl.BlockSpec((1, 256), lambda b: (0, 0)),     # a5
            pl.BlockSpec((256, 16), lambda b: (0, 0)),    # fused head weights
            pl.BlockSpec((1, 16), lambda b: (0, 0)),      # fused head biases
        ],
        out_specs=pl.BlockSpec((tb, 16), lambda b: (b, 0)),
        compiler_params=pltpu.CompilerParams(
            dimension_semantics=("parallel",),
            vmem_limit_bytes=_vmem_limit(est)),
    )(xpad, p["w5"], p["b5"], p["a5"], p["w6"], p["b6"])
    out = out[:bsz]
    return out[:, 0:2], out[:, 2:6], out[:, 6:16]


# --------------------------------------------------------------------------
# Full ONet forward
# --------------------------------------------------------------------------
def onet_forward(p, x):
    # NCHW -> CNHW working layout, bf16 cast once; all glue carries bf16.
    x = x.transpose(1, 0, 2, 3).astype(jnp.bfloat16)
    x = conv2d_prelu_cnhw(x, p["wm1"], p["b1"], p["a1"], 3, 3)   # (32,B,46,46)
    x = maxpool2d_ceil_cnhw(x, 3, 2)                             # (32,B,23,23)
    x = conv2d_prelu_cnhw(x, p["wm2"], p["b2"], p["a2"], 3, 3)   # (64,B,21,21)
    x = maxpool2d_ceil_cnhw(x, 3, 2)                             # (64,B,10,10)
    x = conv2d_prelu_cnhw(x, p["wm3"], p["b3"], p["a3"], 3, 3)   # (64,B,8,8)
    x = maxpool2d_ceil_cnhw(x, 2, 2)                             # (64,B,4,4)
    x = conv2d_prelu_cnhw(x, p["wm4"], p["b4"], p["a4"], 2, 2)   # (128,B,3,3)

    # PyTorch: x.permute(0, 3, 2, 1).view(B, -1) from NCHW == (B, W, H, C) flat.
    bsz = x.shape[1]
    flat = x.transpose(1, 3, 2, 0).reshape(bsz, 1152)            # bf16

    probs, bbox, lmk = dense_heads(flat, p)
    return bbox, lmk, probs                                      # matches (b, c, a)


# --------------------------------------------------------------------------
# One-time parameter preparation (im2col-ordered / padded / fused, bf16)
# --------------------------------------------------------------------------
def prepare_params(raw):
    p = {}
    for i in (1, 2, 3, 4):
        w = raw[f"w{i}"]
        cout = w.shape[0]
        k = w.shape[1] * w.shape[2] * w.shape[3]
        kk = _round_up(k, 16)                     # bf16 sublane-pack aligned K
        wm = jnp.pad(w.reshape(cout, k), ((0, 0), (0, kk - k)))
        p[f"wm{i}"] = wm.astype(jnp.bfloat16)     # (Cout, Kpad)
        p[f"b{i}"] = raw[f"b{i}"].reshape(-1, 1).astype(jnp.float32)
        p[f"a{i}"] = raw[f"a{i}"].reshape(-1, 1).astype(jnp.float32)
    p["w5"] = raw["w5"].T.astype(jnp.bfloat16)                        # (1152, 256)
    p["b5"] = raw["b5"].reshape(1, -1).astype(jnp.float32)
    p["a5"] = raw["a5"].reshape(1, -1).astype(jnp.float32)
    p["w6"] = jnp.concatenate(
        [raw["w6_1"].T, raw["w6_2"].T, raw["w6_3"].T], axis=1).astype(jnp.bfloat16)
    p["b6"] = jnp.concatenate(
        [raw["b6_1"], raw["b6_2"], raw["b6_3"]]).reshape(1, -1).astype(jnp.float32)
    return p


# --------------------------------------------------------------------------
# Deterministic synthetic parameters (shapes from ONet.__init__)
# --------------------------------------------------------------------------
def init_params(key):
    ks = jax.random.split(key, 16)

    def rnd(k, shape, scale=0.05):
        return scale * jax.random.normal(k, shape, dtype=jnp.float32)

    p = {}
    p["w1"] = rnd(ks[0], (32, 3, 3, 3));    p["b1"] = rnd(ks[1], (32,))
    p["a1"] = jnp.full((32,), 0.25, jnp.float32)
    p["w2"] = rnd(ks[2], (64, 32, 3, 3));   p["b2"] = rnd(ks[3], (64,))
    p["a2"] = jnp.full((64,), 0.25, jnp.float32)
    p["w3"] = rnd(ks[4], (64, 64, 3, 3));   p["b3"] = rnd(ks[5], (64,))
    p["a3"] = jnp.full((64,), 0.25, jnp.float32)
    p["w4"] = rnd(ks[6], (128, 64, 2, 2));  p["b4"] = rnd(ks[7], (128,))
    p["a4"] = jnp.full((128,), 0.25, jnp.float32)
    p["w5"] = rnd(ks[8], (256, 1152), 0.02); p["b5"] = rnd(ks[9], (256,))
    p["a5"] = jnp.full((256,), 0.25, jnp.float32)
    p["w6_1"] = rnd(ks[10], (2, 256));  p["b6_1"] = rnd(ks[11], (2,))
    p["w6_2"] = rnd(ks[12], (4, 256));  p["b6_2"] = rnd(ks[13], (4,))
    p["w6_3"] = rnd(ks[14], (10, 256)); p["b6_3"] = rnd(ks[15], (10,))
    return p


if __name__ == "__main__":
    # ONet requires 48x48 inputs (dense5 expects 3*3*128 = 1152 features).
    x = jax.random.normal(jax.random.PRNGKey(0), (2, 3, 48, 48), dtype=jnp.float32)
    raw = init_params(jax.random.PRNGKey(1))
    params = prepare_params(raw)          # one-time GEMM-ready weight prep

    fwd = jax.jit(onet_forward)
    bbox, lmk, probs = fwd(params, x)
    jax.block_until_ready((bbox, lmk, probs))

    assert bbox.shape == (2, 4) and lmk.shape == (2, 10) and probs.shape == (2, 2)
    assert jnp.allclose(jnp.sum(probs, axis=1), 1.0, atol=1e-5)
    assert jnp.all(jnp.isfinite(bbox)) and jnp.all(jnp.isfinite(lmk))
    print("KERNEL_OK")
</pallas_src>

<mosaic_0001>
module attributes {stable_mosaic.version = 11 : i64} {
  func.func @_conv_gemm_kernel(%arg0: i32, %arg1: memref<32x32xbf16, #tpu.memory_space<vmem>>, %arg2: memref<32x896xbf16, #tpu.memory_space<vmem>>, %arg3: memref<32x1xf32, #tpu.memory_space<vmem>>, %arg4: memref<32x1xf32, #tpu.memory_space<vmem>>, %arg5: memref<32x896xbf16, #tpu.memory_space<vmem>>) attributes {dimension_semantics = [#tpu.dimension_semantics<parallel>], iteration_bounds = array<i64: 5>, scalar_prefetch = 0 : i64, scratch_operands = 0 : i64, tpu.core_type = #tpu.core_type<tc>, window_params = [{pipeline_mode = #tpu.pipeline_mode<synchronous>, transform_indices = @transform_0, window_bounds = array<i64: 32, 32>}, {transform_indices = @transform_1, window_bounds = array<i64: 32, 896>}, {pipeline_mode = #tpu.pipeline_mode<synchronous>, transform_indices = @transform_2, window_bounds = array<i64: 32, 1>}, {pipeline_mode = #tpu.pipeline_mode<synchronous>, transform_indices = @transform_3, window_bounds = array<i64: 32, 1>}, {transform_indices = @transform_4, window_bounds = array<i64: 32, 896>}]} {
    %c0 = arith.constant 0 : index
    %c0_0 = arith.constant 0 : index
    %0 = vector.load %arg1[%c0, %c0_0] : memref<32x32xbf16, #tpu.memory_space<vmem>>, vector<32x32xbf16>
    %c0_1 = arith.constant 0 : index
    %c0_2 = arith.constant 0 : index
    %1 = vector.load %arg2[%c0_1, %c0_2] : memref<32x896xbf16, #tpu.memory_space<vmem>>, vector<32x896xbf16>
    %cst = arith.constant dense<0.000000e+00> : vector<32x896xf32>
    %2 = tpu.matmul %0, %1, %cst {dimension_numbers = #tpu.dot_dimension_numbers<[1], [0], [0], [1], [0, 0, 1, 1], [], []>} : vector<32x32xbf16>, vector<32x896xbf16>, vector<32x896xf32> -> vector<32x896xf32>
    %c0_3 = arith.constant 0 : index
    %c0_4 = arith.constant 0 : index
    %3 = vector.load %arg3[%c0_3, %c0_4] : memref<32x1xf32, #tpu.memory_space<vmem>>, vector<32x1xf32>
    %4 = vector.broadcast %3 : vector<32x1xf32> to vector<32x896xf32>
    %5 = arith.addf %2, %4 : vector<32x896xf32>
    %cst_5 = arith.constant 0.000000e+00 : f32
    %6 = vector.broadcast %cst_5 : f32 to vector<32x896xf32>
    %7 = arith.cmpf ogt, %5, %6 : vector<32x896xf32>
    %c0_6 = arith.constant 0 : index
    %c0_7 = arith.constant 0 : index
    %8 = vector.load %arg4[%c0_6, %c0_7] : memref<32x1xf32, #tpu.memory_space<vmem>>, vector<32x1xf32>
    %9 = vector.broadcast %8 : vector<32x1xf32> to vector<32x896xf32>
    %10 = arith.mulf %5, %9 : vector<32x896xf32>
    %11 = arith.select %7, %5, %10 : vector<32x896xi1>, vector<32x896xf32>
    %12 = arith.truncf %11 : vector<32x896xf32> to vector<32x896xbf16>
    %c0_8 = arith.constant 0 : index
    %c0_9 = arith.constant 0 : index
    %13 = vector.load %arg5[%c0_8, %c0_9] : memref<32x896xbf16, #tpu.memory_space<vmem>>, vector<32x896xbf16>
    tpu.vector_store %arg5[%c0_8, %c0_9], %12 {strides = array<i32>} : memref<32x896xbf16, #tpu.memory_space<vmem>>, vector<32x896xbf16>,
    return
  }
  func.func @transform_0(%arg0: i32) -> (i32, i32) {
    %c0_i32 = arith.constant 0 : i32
    %c0_i32_0 = arith.constant 0 : i32
    %c0_i32_1 = arith.constant 0 : i32
    return %c0_i32, %c0_i32_0 : i32, i32
  }
  func.func @transform_1(%arg0: i32) -> (i32, i32) {
    %c0_i32 = arith.constant 0 : i32
    %c0_i32_0 = arith.constant 0 : i32
    return %c0_i32, %arg0 : i32, i32
  }
  func.func @transform_2(%arg0: i32) -> (i32, i32) {
    %c0_i32 = arith.constant 0 : i32
    %c0_i32_0 = arith.constant 0 : i32
    %c0_i32_1 = arith.constant 0 : i32
    return %c0_i32, %c0_i32_0 : i32, i32
  }
  func.func @transform_3(%arg0: i32) -> (i32, i32) {
    %c0_i32 = arith.constant 0 : i32
    %c0_i32_0 = arith.constant 0 : i32
    %c0_i32_1 = arith.constant 0 : i32
    return %c0_i32, %c0_i32_0 : i32, i32
  }
  func.func @transform_4(%arg0: i32) -> (i32, i32) {
    %c0_i32 = arith.constant 0 : i32
    %c0_i32_0 = arith.constant 0 : i32
    return %c0_i32, %arg0 : i32, i32
  }
}

module attributes {stable_mosaic.version = 11 : i64} {
  func.func @_conv_gemm_kernel(%arg0: i32, %arg1: memref<64x288xbf16, #tpu.memory_space<vmem>>, %arg2: memref<288x512xbf16, #tpu.memory_space<vmem>>, %arg3: memref<64x1xf32, #tpu.memory_space<vmem>>, %arg4: memref<64x1xf32, #tpu.memory_space<vmem>>, %arg5: memref<64x512xbf16, #tpu.memory_space<vmem>>) attributes {dimension_semantics = [#tpu.dimension_semantics<parallel>], iteration_bounds = array<i64: 2>, scalar_prefetch = 0 : i64, scratch_operands = 0 : i64, tpu.core_type = #tpu.core_type<tc>, window_params = [{pipeline_mode = #tpu.pipeline_mode<synchronous>, transform_indices = @transform_0, window_bounds = array<i64: 64, 288>}, {transform_indices = @transform_1, window_bounds = array<i64: 288, 512>}, {pipeline_mode = #tpu.pipeline_mode<synchronous>, transform_indices = @transform_2, window_bounds = array<i64: 64, 1>}, {pipeline_mode = #tpu.pipeline_mode<synchronous>, transform_indices = @transform_3, window_bounds = array<i64: 64, 1>}, {transform_indices = @transform_4, window_bounds = array<i64: 64, 512>}]} {
    %c0 = arith.constant 0 : index
    %c0_0 = arith.constant 0 : index
    %0 = vector.load %arg1[%c0, %c0_0] : memref<64x288xbf16, #tpu.memory_space<vmem>>, vector<64x288xbf16>
    %c0_1 = arith.constant 0 : index
    %c0_2 = arith.constant 0 : index
    %1 = vector.load %arg2[%c0_1, %c0_2] : memref<288x512xbf16, #tpu.memory_space<vmem>>, vector<288x512xbf16>
    %cst = arith.constant dense<0.000000e+00> : vector<64x512xf32>
    %2 = tpu.matmul %0, %1, %cst {dimension_numbers = #tpu.dot_dimension_numbers<[1], [0], [0], [1], [0, 0, 1, 1], [], []>} : vector<64x288xbf16>, vector<288x512xbf16>, vector<64x512xf32> -> vector<64x512xf32>
    %c0_3 = arith.constant 0 : index
    %c0_4 = arith.constant 0 : index
    %3 = vector.load %arg3[%c0_3, %c0_4] : memref<64x1xf32, #tpu.memory_space<vmem>>, vector<64x1xf32>
    %4 = vector.broadcast %3 : vector<64x1xf32> to vector<64x512xf32>
    %5 = arith.addf %2, %4 : vector<64x512xf32>
    %cst_5 = arith.constant 0.000000e+00 : f32
    %6 = vector.broadcast %cst_5 : f32 to vector<64x512xf32>
    %7 = arith.cmpf ogt, %5, %6 : vector<64x512xf32>
    %c0_6 = arith.constant 0 : index
    %c0_7 = arith.constant 0 : index
    %8 = vector.load %arg4[%c0_6, %c0_7] : memref<64x1xf32, #tpu.memory_space<vmem>>, vector<64x1xf32>
    %9 = vector.broadcast %8 : vector<64x1xf32> to vector<64x512xf32>
    %10 = arith.mulf %5, %9 : vector<64x512xf32>
    %11 = arith.select %7, %5, %10 : vector<64x512xi1>, vector<64x512xf32>
    %12 = arith.truncf %11 : vector<64x512xf32> to vector<64x512xbf16>
    %c0_8 = arith.constant 0 : index
    %c0_9 = arith.constant 0 : index
    %13 = vector.load %arg5[%c0_8, %c0_9] : memref<64x512xbf16, #tpu.memory_space<vmem>>, vector<64x512xbf16>
    tpu.vector_store %arg5[%c0_8, %c0_9], %12 {strides = array<i32>} : memref<64x512xbf16, #tpu.memory_space<vmem>>, vector<64x512xbf16>,
    return
  }
  func.func @transform_0(%arg0: i32) -> (i32, i32) {
    %c0_i32 = arith.constant 0 : i32
    %c0_i32_0 = arith.constant 0 : i32
    %c0_i32_1 = arith.constant 0 : i32
    return %c0_i32, %c0_i32_0 : i32, i32
  }
  func.func @transform_1(%arg0: i32) -> (i32, i32) {
    %c0_i32 = arith.constant 0 : i32
    %c0_i32_0 = arith.constant 0 : i32
    return %c0_i32, %arg0 : i32, i32
  }
  func.func @transform_2(%arg0: i32) -> (i32, i32) {
    %c0_i32 = arith.constant 0 : i32
    %c0_i32_0 = arith.constant 0 : i32
    %c0_i32_1 = arith.constant 0 : i32
    return %c0_i32, %c0_i32_0 : i32, i32
  }
  func.func @transform_3(%arg0: i32) -> (i32, i32) {
    %c0_i32 = arith.constant 0 : i32
    %c0_i32_0 = arith.constant 0 : i32
    %c0_i32_1 = arith.constant 0 : i32
    return %c0_i32, %c0_i32_0 : i32, i32
  }
  func.func @transform_4(%arg0: i32) -> (i32, i32) {
    %c0_i32 = arith.constant 0 : i32
    %c0_i32_0 = arith.constant 0 : i32
    return %c0_i32, %arg0 : i32, i32
  }
}

module attributes {stable_mosaic.version = 11 : i64} {
  func.func @_conv_gemm_kernel(%arg0: i32, %arg1: memref<64x576xbf16, #tpu.memory_space<vmem>>, %arg2: memref<576x128xbf16, #tpu.memory_space<vmem>>, %arg3: memref<64x1xf32, #tpu.memory_space<vmem>>, %arg4: memref<64x1xf32, #tpu.memory_space<vmem>>, %arg5: memref<64x128xbf16, #tpu.memory_space<vmem>>) attributes {dimension_semantics = [#tpu.dimension_semantics<parallel>], iteration_bounds = array<i64: 1>, scalar_prefetch = 0 : i64, scratch_operands = 0 : i64, tpu.core_type = #tpu.core_type<tc>, window_params = [{pipeline_mode = #tpu.pipeline_mode<synchronous>, transform_indices = @transform_0, window_bounds = array<i64: 64, 576>}, {transform_indices = @transform_1, window_bounds = array<i64: 576, 128>}, {pipeline_mode = #tpu.pipeline_mode<synchronous>, transform_indices = @transform_2, window_bounds = array<i64: 64, 1>}, {pipeline_mode = #tpu.pipeline_mode<synchronous>, transform_indices = @transform_3, window_bounds = array<i64: 64, 1>}, {transform_indices = @transform_4, window_bounds = array<i64: 64, 128>}]} {
    %c0 = arith.constant 0 : index
    %c0_0 = arith.constant 0 : index
    %0 = vector.load %arg1[%c0, %c0_0] : memref<64x576xbf16, #tpu.memory_space<vmem>>, vector<64x576xbf16>
    %c0_1 = arith.constant 0 : index
    %c0_2 = arith.constant 0 : index
    %1 = vector.load %arg2[%c0_1, %c0_2] : memref<576x128xbf16, #tpu.memory_space<vmem>>, vector<576x128xbf16>
    %cst = arith.constant dense<0.000000e+00> : vector<64x128xf32>
    %2 = tpu.matmul %0, %1, %cst {dimension_numbers = #tpu.dot_dimension_numbers<[1], [0], [0], [1], [0, 0, 1, 1], [], []>} : vector<64x576xbf16>, vector<576x128xbf16>, vector<64x128xf32> -> vector<64x128xf32>
    %c0_3 = arith.constant 0 : index
    %c0_4 = arith.constant 0 : index
    %3 = vector.load %arg3[%c0_3, %c0_4] : memref<64x1xf32, #tpu.memory_space<vmem>>, vector<64x1xf32>
    %4 = vector.broadcast %3 : vector<64x1xf32> to vector<64x128xf32>
    %5 = arith.addf %2, %4 : vector<64x128xf32>
    %cst_5 = arith.constant 0.000000e+00 : f32
    %6 = vector.broadcast %cst_5 : f32 to vector<64x128xf32>
    %7 = arith.cmpf ogt, %5, %6 : vector<64x128xf32>
    %c0_6 = arith.constant 0 : index
    %c0_7 = arith.constant 0 : index
    %8 = vector.load %arg4[%c0_6, %c0_7] : memref<64x1xf32, #tpu.memory_space<vmem>>, vector<64x1xf32>
    %9 = vector.broadcast %8 : vector<64x1xf32> to vector<64x128xf32>
    %10 = arith.mulf %5, %9 : vector<64x128xf32>
    %11 = arith.select %7, %5, %10 : vector<64x128xi1>, vector<64x128xf32>
    %12 = arith.truncf %11 : vector<64x128xf32> to vector<64x128xbf16>
    %c0_8 = arith.constant 0 : index
    %c0_9 = arith.constant 0 : index
    %13 = vector.load %arg5[%c0_8, %c0_9] : memref<64x128xbf16, #tpu.memory_space<vmem>>, vector<64x128xbf16>
    tpu.vector_store %arg5[%c0_8, %c0_9], %12 {strides = array<i32>} : memref<64x128xbf16, #tpu.memory_space<vmem>>, vector<64x128xbf16>,
    return
  }
  func.func @transform_0(%arg0: i32) -> (i32, i32) {
    %c0_i32 = arith.constant 0 : i32
    %c0_i32_0 = arith.constant 0 : i32
    %c0_i32_1 = arith.constant 0 : i32
    return %c0_i32, %c0_i32_0 : i32, i32
  }
  func.func @transform_1(%arg0: i32) -> (i32, i32) {
    %c0_i32 = arith.constant 0 : i32
    %c0_i32_0 = arith.constant 0 : i32
    return %c0_i32, %arg0 : i32, i32
  }
  func.func @transform_2(%arg0: i32) -> (i32, i32) {
    %c0_i32 = arith.constant 0 : i32
    %c0_i32_0 = arith.constant 0 : i32
    %c0_i32_1 = arith.constant 0 : i32
    return %c0_i32, %c0_i32_0 : i32, i32
  }
  func.func @transform_3(%arg0: i32) -> (i32, i32) {
    %c0_i32 = arith.constant 0 : i32
    %c0_i32_0 = arith.constant 0 : i32
    %c0_i32_1 = arith.constant 0 : i32
    return %c0_i32, %c0_i32_0 : i32, i32
  }
  func.func @transform_4(%arg0: i32) -> (i32, i32) {
    %c0_i32 = arith.constant 0 : i32
    %c0_i32_0 = arith.constant 0 : i32
    return %c0_i32, %arg0 : i32, i32
  }
}

module attributes {stable_mosaic.version = 11 : i64} {
  func.func @_conv_gemm_kernel(%arg0: i32, %arg1: memref<128x256xbf16, #tpu.memory_space<vmem>>, %arg2: memref<256x128xbf16, #tpu.memory_space<vmem>>, %arg3: memref<128x1xf32, #tpu.memory_space<vmem>>, %arg4: memref<128x1xf32, #tpu.memory_space<vmem>>, %arg5: memref<128x128xbf16, #tpu.memory_space<vmem>>) attributes {dimension_semantics = [#tpu.dimension_semantics<parallel>], iteration_bounds = array<i64: 1>, scalar_prefetch = 0 : i64, scratch_operands = 0 : i64, tpu.core_type = #tpu.core_type<tc>, window_params = [{pipeline_mode = #tpu.pipeline_mode<synchronous>, transform_indices = @transform_0, window_bounds = array<i64: 128, 256>}, {transform_indices = @transform_1, window_bounds = array<i64: 256, 128>}, {pipeline_mode = #tpu.pipeline_mode<synchronous>, transform_indices = @transform_2, window_bounds = array<i64: 128, 1>}, {pipeline_mode = #tpu.pipeline_mode<synchronous>, transform_indices = @transform_3, window_bounds = array<i64: 128, 1>}, {transform_indices = @transform_4, window_bounds = array<i64: 128, 128>}]} {
    %c0 = arith.constant 0 : index
    %c0_0 = arith.constant 0 : index
    %0 = vector.load %arg1[%c0, %c0_0] : memref<128x256xbf16, #tpu.memory_space<vmem>>, vector<128x256xbf16>
    %c0_1 = arith.constant 0 : index
    %c0_2 = arith.constant 0 : index
    %1 = vector.load %arg2[%c0_1, %c0_2] : memref<256x128xbf16, #tpu.memory_space<vmem>>, vector<256x128xbf16>
    %cst = arith.constant dense<0.000000e+00> : vector<128x128xf32>
    %2 = tpu.matmul %0, %1, %cst {dimension_numbers = #tpu.dot_dimension_numbers<[1], [0], [0], [1], [0, 0, 1, 1], [], []>} : vector<128x256xbf16>, vector<256x128xbf16>, vector<128x128xf32> -> vector<128x128xf32>
    %c0_3 = arith.constant 0 : index
    %c0_4 = arith.constant 0 : index
    %3 = vector.load %arg3[%c0_3, %c0_4] : memref<128x1xf32, #tpu.memory_space<vmem>>, vector<128x1xf32>
    %4 = vector.broadcast %3 : vector<128x1xf32> to vector<128x128xf32>
    %5 = arith.addf %2, %4 : vector<128x128xf32>
    %cst_5 = arith.constant 0.000000e+00 : f32
    %6 = vector.broadcast %cst_5 : f32 to vector<128x128xf32>
    %7 = arith.cmpf ogt, %5, %6 : vector<128x128xf32>
    %c0_6 = arith.constant 0 : index
    %c0_7 = arith.constant 0 : index
    %8 = vector.load %arg4[%c0_6, %c0_7] : memref<128x1xf32, #tpu.memory_space<vmem>>, vector<128x1xf32>
    %9 = vector.broadcast %8 : vector<128x1xf32> to vector<128x128xf32>
    %10 = arith.mulf %5, %9 : vector<128x128xf32>
    %11 = arith.select %7, %5, %10 : vector<128x128xi1>, vector<128x128xf32>
    %12 = arith.truncf %11 : vector<128x128xf32> to vector<128x128xbf16>
    %c0_8 = arith.constant 0 : index
    %c0_9 = arith.constant 0 : index
    %13 = vector.load %arg5[%c0_8, %c0_9] : memref<128x128xbf16, #tpu.memory_space<vmem>>, vector<128x128xbf16>
    tpu.vector_store %arg5[%c0_8, %c0_9], %12 {strides = array<i32>} : memref<128x128xbf16, #tpu.memory_space<vmem>>, vector<128x128xbf16>,
    return
  }
  func.func @transform_0(%arg0: i32) -> (i32, i32) {
    %c0_i32 = arith.constant 0 : i32
    %c0_i32_0 = arith.constant 0 : i32
    %c0_i32_1 = arith.constant 0 : i32
    return %c0_i32, %c0_i32_0 : i32, i32
  }
  func.func @transform_1(%arg0: i32) -> (i32, i32) {
    %c0_i32 = arith.constant 0 : i32
    %c0_i32_0 = arith.constant 0 : i32
    return %c0_i32, %arg0 : i32, i32
  }
  func.func @transform_2(%arg0: i32) -> (i32, i32) {
    %c0_i32 = arith.constant 0 : i32
    %c0_i32_0 = arith.constant 0 : i32
    %c0_i32_1 = arith.constant 0 : i32
    return %c0_i32, %c0_i32_0 : i32, i32
  }
  func.func @transform_3(%arg0: i32) -> (i32, i32) {
    %c0_i32 = arith.constant 0 : i32
    %c0_i32_0 = arith.constant 0 : i32
    %c0_i32_1 = arith.constant 0 : i32
    return %c0_i32, %c0_i32_0 : i32, i32
  }
  func.func @transform_4(%arg0: i32) -> (i32, i32) {
    %c0_i32 = arith.constant 0 : i32
    %c0_i32_0 = arith.constant 0 : i32
    return %c0_i32, %arg0 : i32, i32
  }
}

module attributes {stable_mosaic.version = 11 : i64} {
  func.func @_dense_heads_kernel(%arg0: i32, %arg1: memref<16x1152xbf16, #tpu.memory_space<vmem>>, %arg2: memref<1152x256xbf16, #tpu.memory_space<vmem>>, %arg3: memref<1x256xf32, #tpu.memory_space<vmem>>, %arg4: memref<1x256xf32, #tpu.memory_space<vmem>>, %arg5: memref<256x16xbf16, #tpu.memory_space<vmem>>, %arg6: memref<1x16xf32, #tpu.memory_space<vmem>>, %arg7: memref<16x16xf32, #tpu.memory_space<vmem>>) attributes {dimension_semantics = [#tpu.dimension_semantics<parallel>], iteration_bounds = array<i64: 1>, scalar_prefetch = 0 : i64, scratch_operands = 0 : i64, tpu.core_type = #tpu.core_type<tc>, window_params = [{transform_indices = @transform_0, window_bounds = array<i64: 16, 1152>}, {pipeline_mode = #tpu.pipeline_mode<synchronous>, transform_indices = @transform_1, window_bounds = array<i64: 1152, 256>}, {pipeline_mode = #tpu.pipeline_mode<synchronous>, transform_indices = @transform_2, window_bounds = array<i64: 1, 256>}, {pipeline_mode = #tpu.pipeline_mode<synchronous>, transform_indices = @transform_3, window_bounds = array<i64: 1, 256>}, {pipeline_mode = #tpu.pipeline_mode<synchronous>, transform_indices = @transform_4, window_bounds = array<i64: 256, 16>}, {pipeline_mode = #tpu.pipeline_mode<synchronous>, transform_indices = @transform_5, window_bounds = array<i64: 1, 16>}, {transform_indices = @transform_6, window_bounds = array<i64: 16, 16>}]} {
    %c0 = arith.constant 0 : index
    %c0_0 = arith.constant 0 : index
    %0 = vector.load %arg1[%c0, %c0_0] : memref<16x1152xbf16, #tpu.memory_space<vmem>>, vector<16x1152xbf16>
    %c0_1 = arith.constant 0 : index
    %c0_2 = arith.constant 0 : index
    %1 = vector.load %arg2[%c0_1, %c0_2] : memref<1152x256xbf16, #tpu.memory_space<vmem>>, vector<1152x256xbf16>
    %cst = arith.constant dense<0.000000e+00> : vector<16x256xf32>
    %2 = tpu.matmul %0, %1, %cst {dimension_numbers = #tpu.dot_dimension_numbers<[1], [0], [0], [1], [0, 0, 1, 1], [], []>} : vector<16x1152xbf16>, vector<1152x256xbf16>, vector<16x256xf32> -> vector<16x256xf32>
    %c0_3 = arith.constant 0 : index
    %c0_4 = arith.constant 0 : index
    %3 = vector.load %arg3[%c0_3, %c0_4] : memref<1x256xf32, #tpu.memory_space<vmem>>, vector<1x256xf32>
    %4 = vector.broadcast %3 : vector<1x256xf32> to vector<16x256xf32>
    %5 = arith.addf %2, %4 : vector<16x256xf32>
    %cst_5 = arith.constant 0.000000e+00 : f32
    %6 = vector.broadcast %cst_5 : f32 to vector<16x256xf32>
    %7 = arith.cmpf ogt, %5, %6 : vector<16x256xf32>
    %c0_6 = arith.constant 0 : index
    %c0_7 = arith.constant 0 : index
    %8 = vector.load %arg4[%c0_6, %c0_7] : memref<1x256xf32, #tpu.memory_space<vmem>>, vector<1x256xf32>
    %9 = vector.broadcast %8 : vector<1x256xf32> to vector<16x256xf32>
    %10 = arith.mulf %5, %9 : vector<16x256xf32>
    %11 = arith.select %7, %5, %10 : vector<16x256xi1>, vector<16x256xf32>
    %12 = arith.truncf %11 : vector<16x256xf32> to vector<16x256xbf16>
    %c0_8 = arith.constant 0 : index
    %c0_9 = arith.constant 0 : index
    %13 = vector.load %arg5[%c0_8, %c0_9] : memref<256x16xbf16, #tpu.memory_space<vmem>>, vector<256x16xbf16>
    %cst_10 = arith.constant dense<0.000000e+00> : vector<16x16xf32>
    %14 = tpu.matmul %12, %13, %cst_10 {dimension_numbers = #tpu.dot_dimension_numbers<[1], [0], [0], [1], [0, 0, 1, 1], [], []>} : vector<16x256xbf16>, vector<256x16xbf16>, vector<16x16xf32> -> vector<16x16xf32>
    %c0_11 = arith.constant 0 : index
    %c0_12 = arith.constant 0 : index
    %15 = vector.load %arg6[%c0_11, %c0_12] : memref<1x16xf32, #tpu.memory_space<vmem>>, vector<1x16xf32>
    %16 = vector.broadcast %15 : vector<1x16xf32> to vector<16x16xf32>
    %17 = arith.addf %14, %16 : vector<16x16xf32>
    %18 = tpu.iota {dimensions = array<i32: 1>} : vector<16x16xi32>
    %c2_i32 = arith.constant 2 : i32
    %19 = vector.broadcast %c2_i32 : i32 to vector<16x16xi32>
    %20 = arith.cmpi slt, %18, %19 : vector<16x16xi32>
    %cst_13 = arith.constant 0xFF800000 : f32
    %21 = vector.broadcast %cst_13 : f32 to vector<16x16xf32>
    %22 = arith.select %20, %17, %21 : vector<16x16xi1>, vector<16x16xf32>
    %cst_14 = arith.constant dense<0xFF800000> : vector<16xf32>
    %23 = vector.multi_reduction <maximumf>, %22, %cst_14 [1] : vector<16x16xf32> to vector<16xf32>
    %24 = vector.shape_cast %23 : vector<16xf32> to vector<16x1xf32>
    %25 = vector.broadcast %24 : vector<16x1xf32> to vector<16x16xf32>
    %26 = arith.subf %22, %25 : vector<16x16xf32>
    %27 = math.exp %26 : vector<16x16xf32>
    %cst_15 = arith.constant dense<0.000000e+00> : vector<16xf32>
    %28 = vector.multi_reduction <add>, %27, %cst_15 [1] : vector<16x16xf32> to vector<16xf32>
    %29 = vector.shape_cast %28 : vector<16xf32> to vector<16x1xf32>
    %30 = vector.broadcast %29 : vector<16x1xf32> to vector<16x16xf32>
    %31 = arith.divf %27, %30 : vector<16x16xf32>
    %32 = arith.select %20, %31, %17 : vector<16x16xi1>, vector<16x16xf32>
    %c0_16 = arith.constant 0 : index
    %c0_17 = arith.constant 0 : index
    %33 = vector.load %arg7[%c0_16, %c0_17] : memref<16x16xf32, #tpu.memory_space<vmem>>, vector<16x16xf32>
    tpu.vector_store %arg7[%c0_16, %c0_17], %32 {strides = array<i32>} : memref<16x16xf32, #tpu.memory_space<vmem>>, vector<16x16xf32>,
    return
  }
  func.func @transform_0(%arg0: i32) -> (i32, i32) {
    %c0_i32 = arith.constant 0 : i32
    %c0_i32_0 = arith.constant 0 : i32
    return %arg0, %c0_i32 : i32, i32
  }
  func.func @transform_1(%arg0: i32) -> (i32, i32) {
    %c0_i32 = arith.constant 0 : i32
    %c0_i32_0 = arith.constant 0 : i32
    %c0_i32_1 = arith.constant 0 : i32
    return %c0_i32, %c0_i32_0 : i32, i32
  }
  func.func @transform_2(%arg0: i32) -> (i32, i32) {
    %c0_i32 = arith.constant 0 : i32
    %c0_i32_0 = arith.constant 0 : i32
    %c0_i32_1 = arith.constant 0 : i32
    return %c0_i32, %c0_i32_0 : i32, i32
  }
  func.func @transform_3(%arg0: i32) -> (i32, i32) {
    %c0_i32 = arith.constant 0 : i32
    %c0_i32_0 = arith.constant 0 : i32
    %c0_i32_1 = arith.constant 0 : i32
    return %c0_i32, %c0_i32_0 : i32, i32
  }
  func.func @transform_4(%arg0: i32) -> (i32, i32) {
    %c0_i32 = arith.constant 0 : i32
    %c0_i32_0 = arith.constant 0 : i32
    %c0_i32_1 = arith.constant 0 : i32
    return %c0_i32, %c0_i32_0 : i32, i32
  }
  func.func @transform_5(%arg0: i32) -> (i32, i32) {
    %c0_i32 = arith.constant 0 : i32
    %c0_i32_0 = arith.constant 0 : i32
    %c0_i32_1 = arith.constant 0 : i32
    return %c0_i32, %c0_i32_0 : i32, i32
  }
  func.func @transform_6(%arg0: i32) -> (i32, i32) {
    %c0_i32 = arith.constant 0 : i32
    %c0_i32_0 = arith.constant 0 : i32
    return %arg0, %c0_i32 : i32, i32
  }
}

</mosaic_0001>

<bundles_post_ra>
// kernel: onet_forward.5
= control target key start
LH: loop header
LB: loop body
LE: loop exit
PB: predicated region body
PF: predicated region fallthrough
CT: control target
= control target key end

     0   :  { %s1135_s15 = smov 0   ;;  %s1137_s16 = smov 0   ;;  %s1389_s0 = inlined_call_operand.vmem [shape: bf16[32,32], index: 0, kind: input, shape index: {}]   ;;  %s1390_s1 = inlined_call_operand.vmem [shape: bf16[32,4480], index: 1, kind: input, shape index: {}]   ;;  %s1391_s2 = inlined_call_operand.vmem [shape: f32[32,1], index: 2, kind: input, shape index: {}]   ;;  %s1392_s3 = inlined_call_operand.vmem [shape: f32[32,1], index: 3, kind: input, shape index: {}]   ;;  %s1393_s4 = inlined_call_operand.vmem [shape: bf16[32,4480], index: 4, kind: output, shape index: {}]  }
   0x1   :  { %s1139_s17 = smov 0  }
   0x2 LB: > { %s939_s18 = sadd.s32 4294967295, %s1107_s17   ;;  %s1152_s19 = sadd.s32 1, %s1107_s17   ;;  %s1107_s17 = sphi %s1139_s17, %s1397_s17   ;;  %s1103_s16 = sphi %s1137_s16, %s1396_s16   ;;  %s1099_s15 = sphi %s1135_s15, %s1395_s15  }
   0x3   : > { %s39_s20 = ssub.s32 %s1107_s17, %s1152_s19  ;;  %s42_s21 = sadd.s32 1, %s1103_s16 }
   0x4   : > { %p40_p0 = scmp.eq.s32.totalorder %s39_s20, 0  ;;  %p49_p1 = scmp.ne.s32.totalorder %s1103_s16, %s1099_s15 }
   0x5   : > { %p50_p2 = scmp.eq.s32.totalorder %s1107_s17, 0  ;;  %p121_p3 = scmp.eq.s32.totalorder %s939_s18, 4 }
   0x6   : > { %s1163_s22 = scalar_select %p40_p0, %s1103_s16, %s42_s21  }
   0x7   : > { %p51_p4 = por %p50_p2, %p49_p1  ;;  %p1165_p5 = por %p121_p3, %p49_p1 }
   0x8   : > { %p942_p6 = scmp.ge.s32.totalorder %s1107_s17, 5 }
   0xa   : > { %152 = sbr.rel (%p942_p6) target bundleno = 28 (0x1c), region = 28 }
   0xf   : > { %155 = sbr.rel (!%p51_p4) target bundleno = 28 (0x1c), region = 32  ;;  %s157_s24 = sand.u32 (%p51_p4), 1, %s1103_s16  }
  0x10   : > { %s1004_s25 = smul.u32 (%p51_p4), 28, %s1107_s17 }
  0x11   : > { %s1034_s26 = smul.u32 (%p51_p4), 112, %s157_s24 }
  0x12   : > { %s1175_s29 = scalar_lea.vmem (%p51_p4), %s1390_s1, %s1004_s25 }
  0x13   : > { %v177_v0 = vld [vmem:[%s1175_s29] sm:$0xff] (%p51_p4)  ;;  %v179_v1 = vld [vmem:[%s1175_s29 + $0x8] sm:$0xff] (%p51_p4)  ;;  %v181_v2 = vld [vmem:[%s1175_s29 + $0x10] sm:$0xff] (%p51_p4)  ;;  %s159_s30 = scalar_lea.vmem (%p51_p4), [#allocation2], %s1034_s26 }
  0x14   : > { %178 = vst [vmem:[%s159_s30] sm:$0xff] %v177_v0  ;;  %180 = vst [vmem:[%s159_s30 + $0x8] sm:$0xff] %v179_v1  ;;  %v183_v3 = vld [vmem:[%s1175_s29 + $0x8c] sm:$0xff]  ;;  %v185_v4 = vld [vmem:[%s1175_s29 + $0x94] sm:$0xff] }
  0x15   : > { %182 = vst [vmem:[%s159_s30 + $0x10] sm:$0xff] %v181_v2  ;;  %v187_v5 = vld [vmem:[%s1175_s29 + $0x9c] sm:$0xff]  ;;  %184 = vst [vmem:[%s159_s30 + $0x1c] sm:$0xff] %v183_v3  ;;  %v193_v8 = vld [vmem:[%s1175_s29 + $0x128] sm:$0xff] }
  0x16   : > { %186 = vst [vmem:[%s159_s30 + $0x24] sm:$0xff] %v185_v4  ;;  %188 = vst [vmem:[%s159_s30 + $0x2c] sm:$0xff] %v187_v5  ;;  %v189_v6 = vld [vmem:[%s1175_s29 + $0x118] sm:$0xff]  ;;  %v191_v7 = vld [vmem:[%s1175_s29 + $0x120] sm:$0xff] }
  0x17   : > { %190 = vst [vmem:[%s159_s30 + $0x38] sm:$0xff] %v189_v6  ;;  %192 = vst [vmem:[%s159_s30 + $0x40] sm:$0xff] %v191_v7  ;;  %v195_v9 = vld [vmem:[%s1175_s29 + $0x1a4] sm:$0xff]  ;;  %v197_v10 = vld [vmem:[%s1175_s29 + $0x1ac] sm:$0xff] }
  0x18   : > { %194 = vst [vmem:[%s159_s30 + $0x48] sm:$0xff] %v193_v8  ;;  %v199_v11 = vld [vmem:[%s1175_s29 + $0x1b4] sm:$0xff]  ;;  %196 = vst [vmem:[%s159_s30 + $0x54] sm:$0xff] %v195_v9  ;;  %v946_v13 = vld [vmem:[%s1175_s29 + $0xa4] sm:$0xf] }
  0x19   : > { %198 = vst [vmem:[%s159_s30 + $0x5c] sm:$0xff] %v197_v10  ;;  %200 = vst [vmem:[%s159_s30 + $0x64] sm:$0xff] %v199_v11  ;;  %v944_v12 = vld [vmem:[%s1175_s29 + $0x18] sm:$0xf]  ;;  %v948_v14 = vld [vmem:[%s1175_s29 + $0x130] sm:$0xf] }
  0x1a   : > { %945 = vst [vmem:[%s159_s30 + $0x18] sm:$0xf] %v944_v12  ;;  %947 = vst [vmem:[%s159_s30 + $0x34] sm:$0xf] %v946_v13  ;;  %v950_v15 = vld [vmem:[%s1175_s29 + $0x1bc] sm:$0xf] }
  0x1b   : > { %949 = vst [vmem:[%s159_s30 + $0x50] sm:$0xf] %v948_v14  ;;  %951 = vst [vmem:[%s159_s30 + $0x6c] sm:$0xf] %v950_v15 }
  0x1c PF: > { %p952_p7 = scmp.ge.s32.totalorder %s1107_s17, 1  ;;  %p221_p8 = scmp.lt.s32.totalorder %s1107_s17, 6 }
  0x1e   : > { %p222_p9 = pnand %p952_p7, %p221_p8 }
  0x1f   : > { %s228_s5 = sand.u32 (!%p222_p9), 1, %s1099_s15  }
  0x20   : > { %225 = sbr.rel (%p222_p9) target bundleno = 289 (0x121), region = 58 }
  0x21   : > { %s1196_s6 = smul.u32 (!%p222_p9), 112, %s228_s5 }
  0x23   : > { %s1212_s13 = scalar_lea.vmem (!%p222_p9), [#allocation2], %s1196_s6  ;;  %s1290_s9 = scalar_lea.vmem (!%p222_p9), [#allocation3], %s1196_s6 }
  0x25   : > { %v1109_v16 = vmov 0   ;;  %v275_v17 = vld [vmem:[%s1391_s2] sm:$0xff]  ;;  %v277_v18 = vld [vmem:[%s1391_s2 + $0x10] sm:$0xff]  ;;  %v276_v19 = vld [vmem:[%s1391_s2 + $0x8] sm:$0xff]  ;;  %vm381_vm0 = vcmask 261120   ;;  %s1021_s6 = smul.u32 (%p1165_p5), 28, %s939_s18 }
  0x26   : > { %420 = vmatprep.mubr.bf16.mxu0 %v1109_v16  ;;  %473 = vmatprep.mubr.bf16.mxu1 %v1109_v16  ;;  %v1063_v20 = vld [vmem:[%s1212_s13 + $0x3c] ss:$28 sps:$4 sm:$0xff]   ;;  %v1065_v22 = vld [vmem:[%s1212_s13 + $0x44] ss:$28 sps:$4 sm:$0xff]   ;;  %v1071_v27 = vld [vmem:[%s1212_s13 + $0xc] ss:$28 sps:$4 sm:$0xff]  }
  0x27   : > { %1061 = vset.pattern.permute.xlu0 %v1109_v16  ;;  %1062 = vset.pattern.permute.xlu1 %v1109_v16  ;;  %v278_v21 = vld [vmem:[%s1391_s2 + $0x18] sm:$0xff]  ;;  %v624_v25 = vld [vmem:[%s1392_s3] sm:$0xff]  ;;  %v625_v36 = vld [vmem:[%s1392_s3 + $0x8] sm:$0xff]  ;;  %s817_s10 = scalar_lea.vmem (%p1165_p5), %s1393_s4, %s1021_s6 }
  0x28   : > { %281 = vperm.xlu0 %1061, %v275_v17   ;;  %291 = vperm.xlu1 %1062, %v277_v18   ;;  %v1067_v23 = vld [vmem:[%s1212_s13 + $0x38] ss:$28 sps:$4 sm:$0xff]   ;;  %v1068_v24 = vld [vmem:[%s1212_s13 + $0x40] ss:$28 sps:$4 sm:$0xff]   ;;  %v1074_v29 = vld [vmem:[%s1212_s13 + $0x8] ss:$28 sps:$4 sm:$0xff]  }
  0x29   : > { %400 = vmatprep.subr.bf16.mxu0 %v1063_v20  ;;  %453 = vmatprep.subr.bf16.mxu1 %v1065_v22  ;;  %v1069_v26 = vld [vmem:[%s1212_s13 + $0x4] ss:$28 sps:$4 sm:$0xff]   ;;  %v1078_v30 = vld [vmem:[%s1212_s13 + $0x4c] ss:$28 sps:$4 sm:$0xff]   ;;  %v1082_v34 = vld [vmem:[%s1212_s13 + $0x14] ss:$28 sps:$4 sm:$0xff]  }
  0x2a   : > { %401 = vmatpush1.bf16.msra.mxu0 %v1067_v23  ;;  %454 = vmatpush1.bf16.msra.mxu1 %v1068_v24  ;;  %v1073_v28 = vld [vmem:[%s1212_s13] ss:$28 sps:$4 sm:$0xff]   ;;  %v1076_v32 = vld [vmem:[%s1212_s13 + $0x48] ss:$28 sps:$4 sm:$0xff]   ;;  %v1083_v33 = vld [vmem:[%s1212_s13 + $0x50] ss:$28 sps:$4 sm:$0xff]  }
  0x2b   : > { %402 = vmatprep.subr.bf16.mxu0 %v1069_v26  ;;  %455 = vmatprep.subr.bf16.mxu1 %v1071_v27  ;;  %v1075_v31 = vld [vmem:[%s1389_s0] sm:$0xff]   ;;  %v626_v38 = vld [vmem:[%s1392_s3 + $0x10] sm:$0xff]  ;;  %v1079_v39 = vld [vmem:[%s1389_s0 + $0x8] sm:$0xff]  }
  0x2c   : > { %286 = vperm.xlu0 %1061, %v276_v19   ;;  %296 = vperm.xlu1 %1062, %v278_v21   ;;  %v1084_v35 = vld [vmem:[%s1212_s13 + $0x18] ss:$28 sps:$4 sm:$0xff]   ;;  %v1080_v37 = vld [vmem:[%s1212_s13 + $0x10] ss:$28 sps:$4 sm:$0xff]  }
  0x2d   : > { %v627_v40 = vld [vmem:[%s1392_s3 + $0x18] sm:$0xff] }
  0x2e   : > { %403 = vmatpush1.bf16.msra.mxu0 %v1073_v28  ;;  %456 = vmatpush1.bf16.msra.mxu1 %v1074_v29 }
  0x2f   : > { %506 = vmatprep.subr.bf16.mxu0 %v1078_v30  ;;  %1026 = vmatprep.subr.bf16.mxu1 %v1083_v33 }
  0x30   : > { %630 = vperm.xlu0 %1061, %v624_v25   ;;  %635 = vperm.xlu1 %1062, %v625_v36  }
  0x31   : > { %969 = vmatmul.mubr.msk.bf16.vlgmr.msra.gmra.mxu0 %vm381_vm0, %v1075_v31  ;;  %971 = vmatmul.mubr.msk.bf16.vlgmr.msra.gmra.mxu1 %vm381_vm0, %v1075_v31 }
  0x32   : > { %507 = vmatpush1.bf16.msra.mxu0 %v1076_v32  ;;  %430 = vmatprep.mubr.bf16.mxu0 %v1109_v16 }
  0x33   : > { %483 = vmatprep.mubr.bf16.mxu1 %v1109_v16  ;;  %508 = vmatprep.subr.bf16.mxu0 %v1082_v34 }
  0x34   : > { %1027 = vmatpush3.bf16.msra.mxu1 %v1083_v33  ;;  %640 = vperm.xlu0 %1061, %v626_v38  }
  0x35   : > { %1028 = vmatprep.subr.bf16.mxu1 %v1084_v35  ;;  %645 = vperm.xlu1 %1062, %v627_v40  }
  0x36   : > { %509 = vmatpush1.bf16.msra.mxu0 %v1080_v37 }
  0x38   : > { %1029 = vmatpush3.bf16.msra.mxu1 %v1084_v35 }
  0x39   : > { %970 = vmatmul.mubr.msk.bf16.gmra.mxu0 %vm381_vm0, %v1079_v39  ;;  %972 = vmatmul.mubr.msk.bf16.gmra.mxu1 %vm381_vm0, %v1079_v39 }
  0x3a   : > { %526 = vmatprep.mubr.bf16.mxu0 %v1109_v16  ;;  %1030 = vmatprep.mubr.msk.bf16.mxu1 %vm381_vm0, %v1075_v31 }
  0x41   : > { %973 = vmatmul.mubr.msk.bf16.vlgmr.msra.gmra.mxu0 %vm381_vm0, %v1075_v31  ;;  %1031 = vmatmul.mubr.msk.bf16.vlgmr.msra.gmra.mxu1 %vm381_vm0, %v1079_v39 }
  0x42   : > { %536 = vmatprep.mubr.bf16.mxu0 %v1109_v16 }
  0x49   : > { %974 = vmatmul.mubr.msk.bf16.gmra.mxu0 %vm381_vm0, %v1079_v39 }
  0xa3   : > { %v1261_v41 = vpop.permute.xlu0 %281  ;;  %v1263_v42 = vpop.permute.xlu1 %291 }
  0xa7   : > { %v1265_v43 = vpop.permute.xlu0 %286  ;;  %v1267_v44 = vpop.permute.xlu1 %296 }
  0xab   : > { %v1269_v45 = vpop.permute.xlu0 %630  ;;  %v1275_v54 = vpop.permute.xlu1 %635 }
  0xaf   : > { %v1287_v14 = vpop.permute.xlu0 %640 }
  0xb0   : > { %v1309_v39 = vpop.permute.xlu1 %645 }
  0xf1   : > { %v422_v46 = vpop.f32.mrf.mxu0  ;;  %v475_v47 = vpop.f32.mrf.mxu1 }
  0xf2   : > { %v423_v48 = vadd.f32 %v422_v46, %v1261_v41  ;;  %v476_v49 = vadd.f32 %v475_v47, %v1261_v41 }
  0xf3   : > { %v424_v50 = vpop.f32.mrf.mxu0  ;;  %v477_v51 = vpop.f32.mrf.mxu1 }
  0xf4   : > { %vm596_vm1 = vcmp.gt.f32.partialorder %v423_v48, 0.0  ;;  %vm598_vm2 = vcmp.gt.f32.partialorder %v476_v49, 0.0  ;;  %v425_v52 = vadd.f32 %v424_v50, %v1261_v41  ;;  %v648_v53 = vmul.f32 %v1269_v45, %v423_v48 }
  0xf5   : > { %v478_v55 = vadd.f32 %v477_v51, %v1261_v41  ;;  %v650_v56 = vmul.f32 %v1269_v45, %v476_v49  ;;  %v426_v57 = vpop.f32.mrf.mxu0  ;;  %v479_v58 = vpop.f32.mrf.mxu1 }
  0xf6   : > { %vm597_vm3 = vcmp.gt.f32.partialorder %v425_v52, 0.0  ;;  %v649_v59 = vmul.f32 %v1269_v45, %v425_v52  ;;  %v676_v60 = vsel %vm596_vm1, %v423_v48, %v648_v53  ;;  %v427_v61 = vadd.f32 %v426_v57, %v1265_v43 }
  0xf7   : > { %vm599_vm4 = vcmp.gt.f32.partialorder %v478_v55, 0.0  ;;  %v651_v62 = vmul.f32 %v1269_v45, %v478_v55  ;;  %v678_v63 = vsel %vm598_vm2, %v476_v49, %v650_v56  ;;  %v480_v0 = vadd.f32 %v479_v58, %v1265_v43  ;;  %v428_v1 = vpop.f32.mrf.mxu0  ;;  %v481_v2 = vpop.f32.mrf.mxu1 }
  0xf8   : > { %v677_v3 = vsel %vm597_vm3, %v425_v52, %v649_v59  ;;  %vm603_vm5 = vcmp.gt.f32.partialorder %v427_v61, 0.0  ;;  %v429_v4 = vadd.f32 %v428_v1, %v1265_v43  ;;  %v655_v5 = vmul.f32 %v1275_v54, %v427_v61 }
  0xf9   : > { %v1005_v6 = vpack.c.bf16 %v677_v3, %v676_v60  ;;  %v679_v7 = vsel %vm599_vm4, %v478_v55, %v651_v62  ;;  %vm605_vm6 = vcmp.gt.f32.partialorder %v480_v0, 0.0  ;;  %v482_v8 = vadd.f32 %v481_v2, %v1265_v43  ;;  %v432_v9 = vpop.f32.mrf.mxu0  ;;  %v485_v10 = vpop.f32.mrf.mxu1 }
  0xfa   : > { %v1006_v11 = vpack.c.bf16 %v679_v7, %v678_v63  ;;  %vm604_vm7 = vcmp.gt.f32.partialorder %v429_v4, 0.0  ;;  %v656_v12 = vmul.f32 %v1275_v54, %v429_v4  ;;  %v683_v13 = vsel %vm603_vm5, %v427_v61, %v655_v5 }
  0xfb   : > { %792 = vst [vmem:[%s1290_s9] sm:$0xff] %v1005_v6  ;;  %vm606_vm8 = vcmp.gt.f32.partialorder %v482_v8, 0.0  ;;  %v657_v15 = vmul.f32 %v1275_v54, %v480_v0  ;;  %v658_v16 = vmul.f32 %v1275_v54, %v482_v8  ;;  %v433_v17 = vadd.f32 %v432_v9, %v1263_v42  ;;  %v434_v18 = vpop.f32.mrf.mxu0  ;;  %v487_v19 = vpop.f32.mrf.mxu1 }
  0xfc   : > { %793 = vst [vmem:[%s1290_s9 + $0x8] sm:$0xff] %v1006_v11  ;;  %v684_v20 = vsel %vm604_vm7, %v429_v4, %v656_v12  ;;  %v486_v21 = vadd.f32 %v485_v10, %v1263_v42  ;;  %v435_v22 = vadd.f32 %v434_v18, %v1263_v42  ;;  %v488_v23 = vadd.f32 %v487_v19, %v1263_v42 }
  0xfd   : > { %v1009_v24 = vpack.c.bf16 %v684_v20, %v683_v13  ;;  %v685_v25 = vsel %vm605_vm6, %v480_v0, %v657_v15  ;;  %v686_v26 = vsel %vm606_vm8, %v482_v8, %v658_v16  ;;  %vm610_vm9 = vcmp.gt.f32.partialorder %v433_v17, 0.0  ;;  %v436_v27 = vpop.f32.mrf.mxu0  ;;  %v489_v28 = vpop.f32.mrf.mxu1 }
  0xfe   : > { %v1010_v29 = vpack.c.bf16 %v686_v26, %v685_v25  ;;  %vm612_vm10 = vcmp.gt.f32.partialorder %v486_v21, 0.0  ;;  %vm611_vm11 = vcmp.gt.f32.partialorder %v435_v22, 0.0  ;;  %v662_v30 = vmul.f32 %v1287_v14, %v433_v17 }
  0xff   : > { %796 = vst [vmem:[%s1290_s9 + $0x1c] sm:$0xff] %v1009_v24  ;;  %v663_v31 = vmul.f32 %v1287_v14, %v435_v22  ;;  %vm613_vm12 = vcmp.gt.f32.partialorder %v488_v23, 0.0  ;;  %v664_v32 = vmul.f32 %v1287_v14, %v486_v21  ;;  %v665_v33 = vmul.f32 %v1287_v14, %v488_v23  ;;  %v438_v34 = vpop.f32.mrf.mxu0  ;;  %v491_v35 = vpop.f32.mrf.mxu1 }
 0x100   : > { %797 = vst [vmem:[%s1290_s9 + $0x24] sm:$0xff] %v1010_v29  ;;  %v690_v36 = vsel %vm610_vm9, %v433_v17, %v662_v30  ;;  %v437_v37 = vadd.f32 %v436_v27, %v1267_v44  ;;  %v490_v38 = vadd.f32 %v489_v28, %v1267_v44  ;;  %v439_v40 = vadd.f32 %v438_v34, %v1267_v44 }
 0x101   : > { %v691_v46 = vsel %vm611_vm11, %v435_v22, %v663_v31  ;;  %v692_v47 = vsel %vm612_vm10, %v486_v21, %v664_v32  ;;  %v693_v48 = vsel %vm613_vm12, %v488_v23, %v665_v33  ;;  %v492_v49 = vadd.f32 %v491_v35, %v1267_v44  ;;  %v528_v50 = vpop.f32.mrf.mxu0  ;;  %v1032_v51 = vpop.f32.mrf.mxu1 }
 0x102   : > { %v1013_v52 = vpack.c.bf16 %v691_v46, %v690_v36  ;;  %v1014_v53 = vpack.c.bf16 %v693_v48, %v692_v47  ;;  %vm617_vm13 = vcmp.gt.f32.partialorder %v437_v37, 0.0  ;;  %vm619_vm14 = vcmp.gt.f32.partialorder %v490_v38, 0.0 }
 0x103   : > { %vm618_vm15 = vcmp.gt.f32.partialorder %v439_v40, 0.0  ;;  %v669_v55 = vmul.f32 %v1309_v39, %v437_v37  ;;  %v670_v56 = vmul.f32 %v1309_v39, %v439_v40  ;;  %vm620_vm0 = vcmp.gt.f32.partialorder %v492_v49, 0.0  ;;  %v530_v57 = vpop.f32.mrf.mxu0  ;;  %v581_v58 = vpop.f32.mrf.mxu1 }
 0x104   : > { %800 = vst [vmem:[%s1290_s9 + $0x38] sm:$0xff] %v1013_v52  ;;  %801 = vst [vmem:[%s1290_s9 + $0x40] sm:$0xff] %v1014_v53  ;;  %v671_v59 = vmul.f32 %v1309_v39, %v490_v38  ;;  %v672_v60 = vmul.f32 %v1309_v39, %v492_v49  ;;  %v529_v61 = vadd.f32 %v528_v50, %v1261_v41 }
 0x105   : > { %v590_v62 = vadd.f32 %v1032_v51, %v1263_v42  ;;  %v697_v63 = vsel %vm617_vm13, %v437_v37, %v669_v55  ;;  %v698_v0 = vsel %vm618_vm15, %v439_v40, %v670_v56  ;;  %v531_v1 = vadd.f32 %v530_v57, %v1261_v41  ;;  %v532_v3 = vpop.f32.mrf.mxu0  ;;  %v1033_v7 = vpop.f32.mrf.mxu1 }
 0x106   : > { %v582_v2 = vadd.f32 %v581_v58, %v1261_v41  ;;  %v1017_v4 = vpack.c.bf16 %v698_v0, %v697_v63  ;;  %v699_v5 = vsel %vm619_vm14, %v490_v38, %v671_v59  ;;  %v700_v6 = vsel %vm620_vm0, %v492_v49, %v672_v60  ;;  %v838_v58 = vld [vmem:[%s1290_s9 + $0x1c] sm:$0xff] (%p1165_p5) }
 0x107   : > { %vm600_vm1 = vcmp.gt.f32.partialorder %v529_v61, 0.0  ;;  %v1018_v8 = vpack.c.bf16 %v700_v6, %v699_v5  ;;  %v652_v9 = vmul.f32 %v1269_v45, %v529_v61  ;;  %vm616_vm2 = vcmp.gt.f32.partialorder %v590_v62, 0.0  ;;  %v534_v11 = vpop.f32.mrf.mxu0  ;;  %v584_v23 = vpop.f32.mrf.mxu1  ;;  %v840_v59 = vld [vmem:[%s1290_s9 + $0x24] sm:$0xff] (%p1165_p5)  ;;  %839 = vst [vmem:[%s817_s10 + $0x8c] sm:$0xff] (%p1165_p5), %v838_v58 }
 0x108   : > { %v668_v10 = vmul.f32 %v1287_v14, %v590_v62  ;;  %804 = vst [vmem:[%s1290_s9 + $0x54] sm:$0xff] %v1017_v4  ;;  %vm601_vm3 = vcmp.gt.f32.partialorder %v531_v1, 0.0  ;;  %v653_v41 = vmul.f32 %v1269_v45, %v531_v1  ;;  %vm602_vm4 = vcmp.gt.f32.partialorder %v582_v2, 0.0  ;;  %841 = vst [vmem:[%s817_s10 + $0x94] sm:$0xff] (%p1165_p5), %v840_v59 }
 0x109   : > { %v654_v12 = vmul.f32 %v1269_v45, %v582_v2  ;;  %805 = vst [vmem:[%s1290_s9 + $0x5c] sm:$0xff] %v1018_v8  ;;  %v680_v13 = vsel %vm600_vm1, %v529_v61, %v652_v9  ;;  %v533_v16 = vadd.f32 %v532_v3, %v1265_v43  ;;  %v593_v17 = vadd.f32 %v1033_v7, %v1267_v44  ;;  %v538_v18 = vpop.f32.mrf.mxu0 }
 0x10a   : > { %v696_v15 = vsel %vm616_vm2, %v590_v62, %v668_v10  ;;  %v681_v20 = vsel %vm601_vm3, %v531_v1, %v653_v41  ;;  %v535_v22 = vadd.f32 %v534_v11, %v1265_v43  ;;  %v585_v29 = vadd.f32 %v584_v23, %v1265_v43 }
 0x10b   : > { %v1016_v19 = vpack.c.bf16 %v696_v15, %v696_v15  ;;  %v682_v21 = vsel %vm602_vm4, %v582_v2, %v654_v12  ;;  %v1007_v24 = vpack.c.bf16 %v681_v20, %v680_v13  ;;  %vm607_vm5 = vcmp.gt.f32.partialorder %v533_v16, 0.0  ;;  %v540_v26 = vpop.f32.mrf.mxu0  ;;  %v844_v61 = vld [vmem:[%s1290_s9 + $0x38] sm:$0xff] (%p1165_p5)  ;;  %v846_v62 = vld [vmem:[%s1290_s9 + $0x40] sm:$0xff] (%p1165_p5) }
 0x10c   : > { %v1008_v25 = vpack.c.bf16 %v682_v21, %v682_v21  ;;  %v659_v45 = vmul.f32 %v1275_v54, %v533_v16  ;;  %vm623_vm6 = vcmp.gt.f32.partialorder %v593_v17, 0.0  ;;  %v675_v27 = vmul.f32 %v1309_v39, %v593_v17  ;;  %845 = vst [vmem:[%s817_s10 + $0x118] sm:$0xff] (%p1165_p5), %v844_v61  ;;  %847 = vst [vmem:[%s817_s10 + $0x120] sm:$0xff] (%p1165_p5), %v846_v62 }
 0x10d   : > { %803 = vst [vmem:[%s1290_s9 + $0x50] sm:$0xf] %v1016_v19  ;;  %vm608_vm7 = vcmp.gt.f32.partialorder %v535_v22, 0.0  ;;  %v660_v28 = vmul.f32 %v1275_v54, %v535_v22  ;;  %794 = vst [vmem:[%s1290_s9 + $0x10] sm:$0xff] %v1007_v24  ;;  %v539_v30 = vadd.f32 %v538_v18, %v1263_v42  ;;  %v541_v31 = vadd.f32 %v540_v26, %v1263_v42  ;;  %v542_v32 = vpop.f32.mrf.mxu0 }
 0x10e   : > { %795 = vst [vmem:[%s1290_s9 + $0x18] sm:$0xf] %v1008_v25  ;;  %v687_v33 = vsel %vm607_vm5, %v533_v16, %v659_v45  ;;  %v703_v34 = vsel %vm623_vm6, %v593_v17, %v675_v27  ;;  %v543_v36 = vadd.f32 %v542_v32, %v1267_v44  ;;  %vm609_vm8 = vcmp.gt.f32.partialorder %v585_v29, 0.0 }
 0x10f   : > { %v688_v35 = vsel %vm608_vm7, %v535_v22, %v660_v28  ;;  %v1020_v37 = vpack.c.bf16 %v703_v34, %v703_v34  ;;  %v661_v40 = vmul.f32 %v1275_v54, %v585_v29  ;;  %v544_v46 = vpop.f32.mrf.mxu0  ;;  %vm614_vm9 = vcmp.gt.f32.partialorder %v539_v30, 0.0  ;;  %v850_v0 = vld [vmem:[%s1290_s9 + $0x54] sm:$0xff] (%p1165_p5) }
 0x110   : > { %v1011_v38 = vpack.c.bf16 %v688_v35, %v687_v33  ;;  %v666_v43 = vmul.f32 %v1287_v14, %v539_v30  ;;  %vm615_vm10 = vcmp.gt.f32.partialorder %v541_v31, 0.0  ;;  %v667_v42 = vmul.f32 %v1287_v14, %v541_v31  ;;  %v852_v1 = vld [vmem:[%s1290_s9 + $0x5c] sm:$0xff] (%p1165_p5)  ;;  %851 = vst [vmem:[%s817_s10 + $0x1a4] sm:$0xff] (%p1165_p5), %v850_v0 }
 0x111   : > { %807 = vst [vmem:[%s1290_s9 + $0x6c] sm:$0xf] %v1020_v37  ;;  %v689_v47 = vsel %vm609_vm8, %v585_v29, %v661_v40  ;;  %v673_v48 = vmul.f32 %v1309_v39, %v543_v36  ;;  %v545_v49 = vadd.f32 %v544_v46, %v1267_v44  ;;  %vm621_vm11 = vcmp.gt.f32.partialorder %v543_v36, 0.0  ;;  %v832_v44 = vld [vmem:[%s1290_s9] sm:$0xff] (%p1165_p5)  ;;  %853 = vst [vmem:[%s817_s10 + $0x1ac] sm:$0xff] (%p1165_p5), %v852_v1 }
 0x112   : > { %798 = vst [vmem:[%s1290_s9 + $0x2c] sm:$0xff] %v1011_v38  ;;  %v1012_v50 = vpack.c.bf16 %v689_v47, %v689_v47  ;;  %v694_v51 = vsel %vm614_vm9, %v539_v30, %v666_v43  ;;  %v695_v54 = vsel %vm615_vm10, %v541_v31, %v667_v42  ;;  %833 = vst [vmem:[%s817_s10] sm:$0xff] (%p1165_p5), %v832_v44 }
 0x113   : > { %v1015_v52 = vpack.c.bf16 %v695_v54, %v694_v51  ;;  %vm622_vm12 = vcmp.gt.f32.partialorder %v545_v49, 0.0  ;;  %v674_v53 = vmul.f32 %v1309_v39, %v545_v49  ;;  %v701_v55 = vsel %vm621_vm11, %v543_v36, %v673_v48  ;;  %v834_v39 = vld [vmem:[%s1290_s9 + $0x8] sm:$0xff] (%p1165_p5) }
 0x114   : > { %799 = vst [vmem:[%s1290_s9 + $0x34] sm:$0xf] %v1012_v50  ;;  %814 = sbr.rel (!%p1165_p5) target bundleno = 289 (0x121), region = 66  ;;  %v836_v57 = vld [vmem:[%s1290_s9 + $0x10] sm:$0xff] (%p1165_p5)  ;;  %835 = vst [vmem:[%s817_s10 + $0x8] sm:$0xff] (%p1165_p5), %v834_v39 }
 0x115   : > { %802 = vst [vmem:[%s1290_s9 + $0x48] sm:$0xff] %v1015_v52  ;;  %v702_v14 = vsel %vm622_vm12, %v545_v49, %v674_v53  ;;  %837 = vst [vmem:[%s817_s10 + $0x10] sm:$0xff] (%p1165_p5), %v836_v57  ;;  %v994_v3 = vld [vmem:[%s1290_s9 + $0x18] sm:$0xf] (%p1165_p5)  ;;  %v998_v5 = vld [vmem:[%s1290_s9 + $0x50] sm:$0xf] (%p1165_p5) }
 0x116   : > { %v1019_v56 = vpack.c.bf16 %v702_v14, %v701_v55  ;;  %995 = vst [vmem:[%s817_s10 + $0x18] sm:$0xf] (%p1165_p5), %v994_v3  ;;  %999 = vst [vmem:[%s817_s10 + $0x130] sm:$0xf] (%p1165_p5), %v998_v5 }
 0x118   : > { %806 = vst [vmem:[%s1290_s9 + $0x64] sm:$0xff] %v1019_v56  ;;  %v1000_v6 = vld [vmem:[%s1290_s9 + $0x6c] sm:$0xf] (%p1165_p5) }
 0x119   : > { %v842_v60 = vld [vmem:[%s1290_s9 + $0x2c] sm:$0xff]  ;;  %1001 = vst [vmem:[%s817_s10 + $0x1bc] sm:$0xf] %v1000_v6 }
 0x11a   : > { %843 = vst [vmem:[%s817_s10 + $0x9c] sm:$0xff] %v842_v60 }
 0x11b   : > { %v996_v4 = vld [vmem:[%s1290_s9 + $0x34] sm:$0xf] }
 0x11c   : > { %v848_v63 = vld [vmem:[%s1290_s9 + $0x48] sm:$0xff]  ;;  %997 = vst [vmem:[%s817_s10 + $0xa4] sm:$0xf] %v996_v4 }
 0x11d   : > { %849 = vst [vmem:[%s817_s10 + $0x128] sm:$0xff] %v848_v63 }
 0x11f   : > { %v854_v2 = vld [vmem:[%s1290_s9 + $0x64] sm:$0xff] }
 0x120   : > { %855 = vst [vmem:[%s817_s10 + $0x1b4] sm:$0xff] %v854_v2 }
 0x121 PF: > { %p11_p10 = scmp.ge.s32.totalorder %s1152_s19, 7   ;;  %s1395_s15 = smov %s1103_s16 }
 0x122   : > { %s1396_s16 = smov %s1163_s22  ;;  %s1397_s17 = smov %s1152_s19 }
 0x123   :  { %13 = sbr.rel (!%p11_p10) target bundleno = 2 (0x2), region = 135 }

// kernel: onet_forward.6
= control target key start
LH: loop header
LB: loop body
LE: loop exit
PB: predicated region body
PF: predicated region fallthrough
CT: control target
= control target key end

     0   :  { %s1933_s15 = smov 0   ;;  %s1935_s16 = smov 0   ;;  %s2535_s0 = inlined_call_operand.vmem [shape: bf16[64,288], index: 0, kind: input, shape index: {}]   ;;  %s2536_s1 = inlined_call_operand.vmem [shape: bf16[288,1024], index: 1, kind: input, shape index: {}]   ;;  %s2537_s2 = inlined_call_operand.vmem [shape: f32[64,1], index: 2, kind: input, shape index: {}]   ;;  %s2538_s3 = inlined_call_operand.vmem [shape: f32[64,1], index: 3, kind: input, shape index: {}]   ;;  %s2539_s4 = inlined_call_operand.vmem [shape: bf16[64,1024], index: 4, kind: output, shape index: {}]  }
   0x1   :  { %s1937_s17 = smov 0  }
   0x2 LB: > { %s1587_s18 = sadd.s32 4294967295, %s1905_s17   ;;  %s1950_s19 = sadd.s32 1, %s1905_s17   ;;  %s1905_s17 = sphi %s1937_s17, %s2543_s17   ;;  %s1901_s16 = sphi %s1935_s16, %s2542_s16   ;;  %s1897_s15 = sphi %s1933_s15, %s2541_s15  }
   0x3   : > { %s39_s20 = ssub.s32 %s1905_s17, %s1950_s19  ;;  %s42_s21 = sadd.s32 1, %s1901_s16 }
   0x4   : > { %p40_p0 = scmp.eq.s32.totalorder %s39_s20, 0  ;;  %p49_p1 = scmp.ne.s32.totalorder %s1901_s16, %s1897_s15 }
   0x5   : > { %p50_p2 = scmp.eq.s32.totalorder %s1905_s17, 0  ;;  %p121_p3 = scmp.eq.s32.totalorder %s1587_s18, 1 }
   0x6   : > { %s1961_s22 = scalar_select %p40_p0, %s1901_s16, %s42_s21  }
   0x7   : > { %p51_p4 = por %p50_p2, %p49_p1  ;;  %p1963_p5 = por %p121_p3, %p49_p1 }
   0x8   : > { %p1590_p6 = scmp.ge.s32.totalorder %s1905_s17, 2 }
   0xa   : > { %152 = sbr.rel (%p1590_p6) target bundleno = 55 (0x37), region = 28 }
   0xf   : > { %155 = sbr.rel (!%p51_p4) target bundleno = 55 (0x37), region = 32  ;;  %s157_s24 = sand.u32 (%p51_p4), 1, %s1901_s16  }
  0x10   : > { %s1708_s25 = sshll.u32 (%p51_p4), %s1905_s17, 4  ;;  %s1730_s26 = smul.u32 (%p51_p4), 576, %s157_s24 }
  0x11   : > { %s1973_s29 = scalar_lea.vmem (%p51_p4), %s2536_s1, %s1708_s25 }
  0x12   : > { %v175_v0 = vld [vmem:[%s1973_s29] sm:$0xff] (%p51_p4)  ;;  %v177_v1 = vld [vmem:[%s1973_s29 + $0x8] sm:$0xff] (%p51_p4)  ;;  %s1981_s30 = scalar_lea.vmem (%p51_p4), [#allocation2], %s1730_s26 }
  0x13   : > { %v179_v2 = vld [vmem:[%s1973_s29 + $0x20] sm:$0xff] (%p51_p4)  ;;  %v181_v3 = vld [vmem:[%s1973_s29 + $0x28] sm:$0xff] (%p51_p4)  ;;  %176 = vst [vmem:[%s1981_s30] sm:$0xff] (%p51_p4), %v175_v0  ;;  %178 = vst [vmem:[%s1981_s30 + $0x8] sm:$0xff] (%p51_p4), %v177_v1 }
  0x14   : > { %v183_v4 = vld [vmem:[%s1973_s29 + $0x40] sm:$0xff]  ;;  %v185_v5 = vld [vmem:[%s1973_s29 + $0x48] sm:$0xff]  ;;  %180 = vst [vmem:[%s1981_s30 + $0x10] sm:$0xff] %v179_v2  ;;  %182 = vst [vmem:[%s1981_s30 + $0x18] sm:$0xff] %v181_v3 }
  0x15   : > { %184 = vst [vmem:[%s1981_s30 + $0x20] sm:$0xff] %v183_v4  ;;  %186 = vst [vmem:[%s1981_s30 + $0x28] sm:$0xff] %v185_v5  ;;  %v187_v6 = vld [vmem:[%s1973_s29 + $0x60] sm:$0xff]  ;;  %v189_v7 = vld [vmem:[%s1973_s29 + $0x68] sm:$0xff] }
  0x16   : > { %v191_v8 = vld [vmem:[%s1973_s29 + $0x80] sm:$0xff]  ;;  %188 = vst [vmem:[%s1981_s30 + $0x30] sm:$0xff] %v187_v6  ;;  %190 = vst [vmem:[%s1981_s30 + $0x38] sm:$0xff] %v189_v7  ;;  %v193_v9 = vld [vmem:[%s1973_s29 + $0x88] sm:$0xff] }
  0x17   : > { %192 = vst [vmem:[%s1981_s30 + $0x40] sm:$0xff] %v191_v8  ;;  %v195_v10 = vld [vmem:[%s1973_s29 + $0xa0] sm:$0xff]  ;;  %v197_v11 = vld [vmem:[%s1973_s29 + $0xa8] sm:$0xff]  ;;  %194 = vst [vmem:[%s1981_s30 + $0x48] sm:$0xff] %v193_v9 }
  0x18   : > { %196 = vst [vmem:[%s1981_s30 + $0x50] sm:$0xff] %v195_v10  ;;  %198 = vst [vmem:[%s1981_s30 + $0x58] sm:$0xff] %v197_v11  ;;  %v199_v12 = vld [vmem:[%s1973_s29 + $0xc0] sm:$0xff]  ;;  %v201_v13 = vld [vmem:[%s1973_s29 + $0xc8] sm:$0xff] }
  0x19   : > { %v203_v14 = vld [vmem:[%s1973_s29 + $0xe0] sm:$0xff]  ;;  %200 = vst [vmem:[%s1981_s30 + $0x60] sm:$0xff] %v199_v12  ;;  %202 = vst [vmem:[%s1981_s30 + $0x68] sm:$0xff] %v201_v13  ;;  %v205_v15 = vld [vmem:[%s1973_s29 + $0xe8] sm:$0xff] }
  0x1a   : > { %204 = vst [vmem:[%s1981_s30 + $0x70] sm:$0xff] %v203_v14  ;;  %v207_v16 = vld [vmem:[%s1973_s29 + $0x100] sm:$0xff]  ;;  %v209_v17 = vld [vmem:[%s1973_s29 + $0x108] sm:$0xff]  ;;  %206 = vst [vmem:[%s1981_s30 + $0x78] sm:$0xff] %v205_v15 }
  0x1b   : > { %208 = vst [vmem:[%s1981_s30 + $0x80] sm:$0xff] %v207_v16  ;;  %210 = vst [vmem:[%s1981_s30 + $0x88] sm:$0xff] %v209_v17  ;;  %v211_v18 = vld [vmem:[%s1973_s29 + $0x120] sm:$0xff]  ;;  %v213_v19 = vld [vmem:[%s1973_s29 + $0x128] sm:$0xff] }
  0x1c   : > { %v215_v20 = vld [vmem:[%s1973_s29 + $0x140] sm:$0xff]  ;;  %212 = vst [vmem:[%s1981_s30 + $0x90] sm:$0xff] %v211_v18  ;;  %214 = vst [vmem:[%s1981_s30 + $0x98] sm:$0xff] %v213_v19  ;;  %v217_v21 = vld [vmem:[%s1973_s29 + $0x148] sm:$0xff] }
  0x1d   : > { %216 = vst [vmem:[%s1981_s30 + $0xa0] sm:$0xff] %v215_v20  ;;  %v219_v22 = vld [vmem:[%s1973_s29 + $0x160] sm:$0xff]  ;;  %v221_v23 = vld [vmem:[%s1973_s29 + $0x168] sm:$0xff]  ;;  %218 = vst [vmem:[%s1981_s30 + $0xa8] sm:$0xff] %v217_v21 }
  0x1e   : > { %220 = vst [vmem:[%s1981_s30 + $0xb0] sm:$0xff] %v219_v22  ;;  %222 = vst [vmem:[%s1981_s30 + $0xb8] sm:$0xff] %v221_v23  ;;  %v223_v24 = vld [vmem:[%s1973_s29 + $0x180] sm:$0xff]  ;;  %v225_v25 = vld [vmem:[%s1973_s29 + $0x188] sm:$0xff] }
  0x1f   : > { %v227_v26 = vld [vmem:[%s1973_s29 + $0x1a0] sm:$0xff]  ;;  %224 = vst [vmem:[%s1981_s30 + $0xc0] sm:$0xff] %v223_v24  ;;  %226 = vst [vmem:[%s1981_s30 + $0xc8] sm:$0xff] %v225_v25  ;;  %v229_v27 = vld [vmem:[%s1973_s29 + $0x1a8] sm:$0xff] }
  0x20   : > { %228 = vst [vmem:[%s1981_s30 + $0xd0] sm:$0xff] %v227_v26  ;;  %v231_v28 = vld [vmem:[%s1973_s29 + $0x1c0] sm:$0xff]  ;;  %v233_v29 = vld [vmem:[%s1973_s29 + $0x1c8] sm:$0xff]  ;;  %230 = vst [vmem:[%s1981_s30 + $0xd8] sm:$0xff] %v229_v27 }
  0x21   : > { %232 = vst [vmem:[%s1981_s30 + $0xe0] sm:$0xff] %v231_v28  ;;  %234 = vst [vmem:[%s1981_s30 + $0xe8] sm:$0xff] %v233_v29  ;;  %v235_v30 = vld [vmem:[%s1973_s29 + $0x1e0] sm:$0xff]  ;;  %v237_v31 = vld [vmem:[%s1973_s29 + $0x1e8] sm:$0xff] }
  0x22   : > { %v239_v32 = vld [vmem:[%s1973_s29 + $0x200] sm:$0xff]  ;;  %236 = vst [vmem:[%s1981_s30 + $0xf0] sm:$0xff] %v235_v30  ;;  %238 = vst [vmem:[%s1981_s30 + $0xf8] sm:$0xff] %v237_v31  ;;  %v241_v33 = vld [vmem:[%s1973_s29 + $0x208] sm:$0xff] }
  0x23   : > { %240 = vst [vmem:[%s1981_s30 + $0x100] sm:$0xff] %v239_v32  ;;  %v243_v34 = vld [vmem:[%s1973_s29 + $0x220] sm:$0xff]  ;;  %v245_v35 = vld [vmem:[%s1973_s29 + $0x228] sm:$0xff]  ;;  %242 = vst [vmem:[%s1981_s30 + $0x108] sm:$0xff] %v241_v33 }
  0x24   : > { %244 = vst [vmem:[%s1981_s30 + $0x110] sm:$0xff] %v243_v34  ;;  %246 = vst [vmem:[%s1981_s30 + $0x118] sm:$0xff] %v245_v35  ;;  %v247_v36 = vld [vmem:[%s1973_s29 + $0x240] sm:$0xff]  ;;  %v249_v37 = vld [vmem:[%s1973_s29 + $0x248] sm:$0xff] }
  0x25   : > { %v251_v38 = vld [vmem:[%s1973_s29 + $0x260] sm:$0xff]  ;;  %248 = vst [vmem:[%s1981_s30 + $0x120] sm:$0xff] %v247_v36  ;;  %250 = vst [vmem:[%s1981_s30 + $0x128] sm:$0xff] %v249_v37  ;;  %v253_v39 = vld [vmem:[%s1973_s29 + $0x268] sm:$0xff] }
  0x26   : > { %252 = vst [vmem:[%s1981_s30 + $0x130] sm:$0xff] %v251_v38  ;;  %v255_v40 = vld [vmem:[%s1973_s29 + $0x280] sm:$0xff]  ;;  %v257_v41 = vld [vmem:[%s1973_s29 + $0x288] sm:$0xff]  ;;  %254 = vst [vmem:[%s1981_s30 + $0x138] sm:$0xff] %v253_v39 }
  0x27   : > { %256 = vst [vmem:[%s1981_s30 + $0x140] sm:$0xff] %v255_v40  ;;  %258 = vst [vmem:[%s1981_s30 + $0x148] sm:$0xff] %v257_v41  ;;  %v259_v42 = vld [vmem:[%s1973_s29 + $0x2a0] sm:$0xff]  ;;  %v261_v43 = vld [vmem:[%s1973_s29 + $0x2a8] sm:$0xff] }
  0x28   : > { %v263_v44 = vld [vmem:[%s1973_s29 + $0x2c0] sm:$0xff]  ;;  %260 = vst [vmem:[%s1981_s30 + $0x150] sm:$0xff] %v259_v42  ;;  %262 = vst [vmem:[%s1981_s30 + $0x158] sm:$0xff] %v261_v43  ;;  %v265_v45 = vld [vmem:[%s1973_s29 + $0x2c8] sm:$0xff] }
  0x29   : > { %264 = vst [vmem:[%s1981_s30 + $0x160] sm:$0xff] %v263_v44  ;;  %v267_v46 = vld [vmem:[%s1973_s29 + $0x2e0] sm:$0xff]  ;;  %v269_v47 = vld [vmem:[%s1973_s29 + $0x2e8] sm:$0xff]  ;;  %266 = vst [vmem:[%s1981_s30 + $0x168] sm:$0xff] %v265_v45 }
  0x2a   : > { %268 = vst [vmem:[%s1981_s30 + $0x170] sm:$0xff] %v267_v46  ;;  %270 = vst [vmem:[%s1981_s30 + $0x178] sm:$0xff] %v269_v47  ;;  %v271_v48 = vld [vmem:[%s1973_s29 + $0x300] sm:$0xff]  ;;  %v273_v49 = vld [vmem:[%s1973_s29 + $0x308] sm:$0xff] }
  0x2b   : > { %v275_v50 = vld [vmem:[%s1973_s29 + $0x320] sm:$0xff]  ;;  %272 = vst [vmem:[%s1981_s30 + $0x180] sm:$0xff] %v271_v48  ;;  %274 = vst [vmem:[%s1981_s30 + $0x188] sm:$0xff] %v273_v49  ;;  %v277_v51 = vld [vmem:[%s1973_s29 + $0x328] sm:$0xff] }
  0x2c   : > { %276 = vst [vmem:[%s1981_s30 + $0x190] sm:$0xff] %v275_v50  ;;  %v279_v52 = vld [vmem:[%s1973_s29 + $0x340] sm:$0xff]  ;;  %v281_v53 = vld [vmem:[%s1973_s29 + $0x348] sm:$0xff]  ;;  %278 = vst [vmem:[%s1981_s30 + $0x198] sm:$0xff] %v277_v51 }
  0x2d   : > { %280 = vst [vmem:[%s1981_s30 + $0x1a0] sm:$0xff] %v279_v52  ;;  %282 = vst [vmem:[%s1981_s30 + $0x1a8] sm:$0xff] %v281_v53  ;;  %v283_v54 = vld [vmem:[%s1973_s29 + $0x360] sm:$0xff]  ;;  %v285_v55 = vld [vmem:[%s1973_s29 + $0x368] sm:$0xff] }
  0x2e   : > { %v287_v56 = vld [vmem:[%s1973_s29 + $0x380] sm:$0xff]  ;;  %284 = vst [vmem:[%s1981_s30 + $0x1b0] sm:$0xff] %v283_v54  ;;  %286 = vst [vmem:[%s1981_s30 + $0x1b8] sm:$0xff] %v285_v55  ;;  %v289_v57 = vld [vmem:[%s1973_s29 + $0x388] sm:$0xff] }
  0x2f   : > { %288 = vst [vmem:[%s1981_s30 + $0x1c0] sm:$0xff] %v287_v56  ;;  %v291_v58 = vld [vmem:[%s1973_s29 + $0x3a0] sm:$0xff]  ;;  %v293_v59 = vld [vmem:[%s1973_s29 + $0x3a8] sm:$0xff]  ;;  %290 = vst [vmem:[%s1981_s30 + $0x1c8] sm:$0xff] %v289_v57 }
  0x30   : > { %292 = vst [vmem:[%s1981_s30 + $0x1d0] sm:$0xff] %v291_v58  ;;  %294 = vst [vmem:[%s1981_s30 + $0x1d8] sm:$0xff] %v293_v59  ;;  %v295_v60 = vld [vmem:[%s1973_s29 + $0x3c0] sm:$0xff]  ;;  %v297_v61 = vld [vmem:[%s1973_s29 + $0x3c8] sm:$0xff] }
  0x31   : > { %v299_v62 = vld [vmem:[%s1973_s29 + $0x3e0] sm:$0xff]  ;;  %296 = vst [vmem:[%s1981_s30 + $0x1e0] sm:$0xff] %v295_v60  ;;  %298 = vst [vmem:[%s1981_s30 + $0x1e8] sm:$0xff] %v297_v61  ;;  %v301_v63 = vld [vmem:[%s1973_s29 + $0x3e8] sm:$0xff] }
  0x32   : > { %300 = vst [vmem:[%s1981_s30 + $0x1f0] sm:$0xff] %v299_v62  ;;  %v303_v0 = vld [vmem:[%s1973_s29 + $0x400] sm:$0xff]  ;;  %v305_v1 = vld [vmem:[%s1973_s29 + $0x408] sm:$0xff]  ;;  %302 = vst [vmem:[%s1981_s30 + $0x1f8] sm:$0xff] %v301_v63 }
  0x33   : > { %304 = vst [vmem:[%s1981_s30 + $0x200] sm:$0xff] %v303_v0  ;;  %306 = vst [vmem:[%s1981_s30 + $0x208] sm:$0xff] %v305_v1  ;;  %v307_v2 = vld [vmem:[%s1973_s29 + $0x420] sm:$0xff]  ;;  %v309_v3 = vld [vmem:[%s1973_s29 + $0x428] sm:$0xff] }
  0x34   : > { %v311_v4 = vld [vmem:[%s1973_s29 + $0x440] sm:$0xff]  ;;  %308 = vst [vmem:[%s1981_s30 + $0x210] sm:$0xff] %v307_v2  ;;  %310 = vst [vmem:[%s1981_s30 + $0x218] sm:$0xff] %v309_v3  ;;  %v313_v5 = vld [vmem:[%s1973_s29 + $0x448] sm:$0xff] }
  0x35   : > { %312 = vst [vmem:[%s1981_s30 + $0x220] sm:$0xff] %v311_v4  ;;  %v315_v6 = vld [vmem:[%s1973_s29 + $0x460] sm:$0xff]  ;;  %v317_v7 = vld [vmem:[%s1973_s29 + $0x468] sm:$0xff]  ;;  %314 = vst [vmem:[%s1981_s30 + $0x228] sm:$0xff] %v313_v5 }
  0x36   : > { %316 = vst [vmem:[%s1981_s30 + $0x230] sm:$0xff] %v315_v6  ;;  %318 = vst [vmem:[%s1981_s30 + $0x238] sm:$0xff] %v317_v7 }
  0x37 PF: > { %p1593_p7 = scmp.ge.s32.totalorder %s1905_s17, 1  ;;  %p323_p8 = scmp.lt.s32.totalorder %s1905_s17, 3 }
  0x39   : > { %p324_p9 = pnand %p1593_p7, %p323_p8 }
  0x3a   : > { %s330_s5 = sand.u32 (!%p324_p9), 1, %s1897_s15  }
  0x3b   : > { %327 = sbr.rel (%p324_p9) target bundleno = 393 (0x189), region = 55  ;;  %s1594_s11 = sshll.u32 (!%p324_p9), %s330_s5, 7 }
  0x3c   : > { %s1731_s6 = smul.u32 (!%p324_p9), 576, %s330_s5  ;;  %s2375_s15 = scalar_lea.vmem (!%p324_p9), [#allocation3], %s1594_s11 }
  0x3e   : > { %s2129_s7 = scalar_lea.vmem (!%p324_p9), [#allocation2], %s1731_s6 }
  0x40   : > { %v1907_v8 = vmov 0   ;;  %v1759_v9 = vld [vmem:[%s2129_s7 + $0xe4] ss:$16 sps:$4 sm:$0xff]   ;;  %v1763_v11 = vld [vmem:[%s2129_s7 + $0xe0] ss:$16 sps:$4 sm:$0xff]   ;;  %vm913_vm0 = vcmask 261120  }
  0x41   : > { %1031 = vmatprep.mubr.bf16.mxu1 %v1907_v8  ;;  %1757 = vset.pattern.permute.xlu0 %v1907_v8  ;;  %v1761_v10 = vld [vmem:[%s2129_s7 + $0x224] ss:$16 sps:$4 sm:$0xff]   ;;  %v1764_v12 = vld [vmem:[%s2129_s7 + $0x220] ss:$16 sps:$4 sm:$0xff]   ;;  %v1773_v18 = vld [vmem:[%s2129_s7 + $0xe8] ss:$16 sps:$4 sm:$0xff]  }
  0x42   : > { %1758 = vset.pattern.permute.xlu1 %v1907_v8  ;;  %926 = vmatprep.subr.bf16.mxu0 %v1759_v9  ;;  %v1765_v13 = vld [vmem:[%s2129_s7 + $0xc4] ss:$16 sps:$4 sm:$0xff]   ;;  %v1769_v15 = vld [vmem:[%s2129_s7 + $0xc0] ss:$16 sps:$4 sm:$0xff]   ;;  %v1775_v19 = vld [vmem:[%s2129_s7 + $0xec] ss:$16 sps:$4 sm:$0xff]  }
  0x43   : > { %1011 = vmatprep.subr.bf16.mxu1 %v1761_v10  ;;  %927 = vmatpush1.bf16.msra.mxu0 %v1763_v11  ;;  %v1767_v14 = vld [vmem:[%s2129_s7 + $0x204] ss:$16 sps:$4 sm:$0xff]   ;;  %v1770_v16 = vld [vmem:[%s2129_s7 + $0x200] ss:$16 sps:$4 sm:$0xff]   ;;  %v1782_v23 = vld [vmem:[%s2129_s7 + $0xcc] ss:$16 sps:$4 sm:$0xff]  }
  0x44   : > { %1012 = vmatpush1.bf16.msra.mxu1 %v1764_v12  ;;  %928 = vmatprep.subr.bf16.mxu0 %v1765_v13  ;;  %v1771_v17 = vld [vmem:[%s2129_s7 + $0xa4] ss:$16 sps:$4 sm:$0xff]   ;;  %v1776_v21 = vld [vmem:[%s2129_s7 + $0xa0] ss:$16 sps:$4 sm:$0xff]   ;;  %v1780_v24 = vld [vmem:[%s2129_s7 + $0xc8] ss:$16 sps:$4 sm:$0xff]  }
  0x45   : > { %1013 = vmatprep.subr.bf16.mxu1 %v1767_v14  ;;  %v2145_v20 = vld [vmem:[%s2535_s0 + $0x8] ss:$12 sps:$4 sm:$0xff]   ;;  %v1783_v25 = vld [vmem:[%s2129_s7 + $0x80] ss:$16 sps:$4 sm:$0xff]   ;;  %v1788_v27 = vld [vmem:[%s2129_s7 + $0xac] ss:$16 sps:$4 sm:$0xff]  }
  0x46   : > { %v1778_v22 = vld [vmem:[%s2129_s7 + $0x84] ss:$16 sps:$4 sm:$0xff]   ;;  %v1786_v28 = vld [vmem:[%s2129_s7 + $0xa8] ss:$16 sps:$4 sm:$0xff]   ;;  %v1789_v29 = vld [vmem:[%s2129_s7 + $0x60] ss:$16 sps:$4 sm:$0xff]  }
  0x47   : > { %929 = vmatpush1.bf16.msra.mxu0 %v1769_v15  ;;  %v1784_v26 = vld [vmem:[%s2129_s7 + $0x64] ss:$16 sps:$4 sm:$0xff]   ;;  %v2162_v30 = vld [vmem:[%s2535_s0 + $0x20] ss:$12 sps:$4 sm:$0xff]   ;;  %v1792_v33 = vld [vmem:[%s2129_s7 + $0x88] ss:$16 sps:$4 sm:$0xff]  }
  0x48   : > { %1014 = vmatpush1.bf16.msra.mxu1 %v1770_v16  ;;  %930 = vmatprep.subr.bf16.mxu0 %v1771_v17  ;;  %v1790_v31 = vld [vmem:[%s2129_s7 + $0x44] ss:$16 sps:$4 sm:$0xff]   ;;  %v1794_v32 = vld [vmem:[%s2129_s7 + $0x8c] ss:$16 sps:$4 sm:$0xff]   ;;  %v1795_v34 = vld [vmem:[%s2129_s7 + $0x40] ss:$16 sps:$4 sm:$0xff]  }
  0x49   : > { %1072 = vmatprep.subr.bf16.mxu1 %v1775_v19  ;;  %v1796_v35 = vld [vmem:[%s2129_s7 + $0x24] ss:$16 sps:$4 sm:$0xff]   ;;  %v1800_v36 = vld [vmem:[%s2129_s7 + $0x6c] ss:$16 sps:$4 sm:$0xff]   ;;  %v1798_v37 = vld [vmem:[%s2129_s7 + $0x68] ss:$16 sps:$4 sm:$0xff]  }
  0x4a   : > { %v1801_v38 = vld [vmem:[%s2129_s7 + $0x20] ss:$16 sps:$4 sm:$0xff]   ;;  %v2178_v39 = vld [vmem:[%s2535_s0 + $0x38] ss:$12 sps:$4 sm:$0xff]   ;;  %v1806_v41 = vld [vmem:[%s2129_s7 + $0x4c] ss:$16 sps:$4 sm:$0xff]  }
  0x4b   : > { %1679 = vmatmul.mubr.msk.bf16.vlgmr.msra.gmra.mxu1 %vm913_vm0, %v2145_v20  ;;  %931 = vmatpush1.bf16.msra.mxu0 %v1776_v21  ;;  %v1802_v40 = vld [vmem:[%s2129_s7 + $0x4] ss:$16 sps:$4 sm:$0xff]   ;;  %v1804_v42 = vld [vmem:[%s2129_s7 + $0x48] ss:$16 sps:$4 sm:$0xff]   ;;  %v1807_v43 = vld [vmem:[%s2129_s7] ss:$16 sps:$4 sm:$0xff]  }
  0x4c   : > { %1073 = vmatpush1.bf16.msra.mxu1 %v1773_v18  ;;  %932 = vmatprep.subr.bf16.mxu0 %v1778_v22  ;;  %v1808_v44 = vld [vmem:[%s2129_s7 + $0x1e4] ss:$16 sps:$4 sm:$0xff]   ;;  %v1812_v45 = vld [vmem:[%s2129_s7 + $0x2c] ss:$16 sps:$4 sm:$0xff]   ;;  %v1810_v46 = vld [vmem:[%s2129_s7 + $0x28] ss:$16 sps:$4 sm:$0xff]  }
  0x4d   : > { %1074 = vmatprep.subr.bf16.mxu1 %v1782_v23  ;;  %1041 = vmatprep.mubr.bf16.mxu1 %v1907_v8  ;;  %v1813_v47 = vld [vmem:[%s2129_s7 + $0x1e0] ss:$16 sps:$4 sm:$0xff]   ;;  %v1814_v48 = vld [vmem:[%s2129_s7 + $0x1c4] ss:$16 sps:$4 sm:$0xff]   ;;  %v1818_v49 = vld [vmem:[%s2129_s7 + $0xc] ss:$16 sps:$4 sm:$0xff]  }
  0x4e   : > { %v1816_v50 = vld [vmem:[%s2129_s7 + $0x8] ss:$16 sps:$4 sm:$0xff]   ;;  %v1819_v51 = vld [vmem:[%s2129_s7 + $0x1c0] ss:$16 sps:$4 sm:$0xff]   ;;  %v1820_v52 = vld [vmem:[%s2129_s7 + $0x1a4] ss:$16 sps:$4 sm:$0xff]  }
  0x4f   : > { %933 = vmatpush1.bf16.msra.mxu0 %v1783_v25  ;;  %v1824_v53 = vld [vmem:[%s2129_s7 + $0x1ec] ss:$16 sps:$4 sm:$0xff]   ;;  %v1822_v54 = vld [vmem:[%s2129_s7 + $0x1e8] ss:$16 sps:$4 sm:$0xff]   ;;  %v1825_v55 = vld [vmem:[%s2129_s7 + $0x1a0] ss:$16 sps:$4 sm:$0xff]  }
  0x50   : > { %1075 = vmatpush1.bf16.msra.mxu1 %v1780_v24  ;;  %934 = vmatprep.subr.bf16.mxu0 %v1784_v26  ;;  %v1826_v56 = vld [vmem:[%s2129_s7 + $0x184] ss:$16 sps:$4 sm:$0xff]   ;;  %v1830_v57 = vld [vmem:[%s2129_s7 + $0x1cc] ss:$16 sps:$4 sm:$0xff]   ;;  %v1828_v58 = vld [vmem:[%s2129_s7 + $0x1c8] ss:$16 sps:$4 sm:$0xff]  }
  0x51   : > { %1076 = vmatprep.subr.bf16.mxu1 %v1788_v27  ;;  %v1831_v59 = vld [vmem:[%s2129_s7 + $0x180] ss:$16 sps:$4 sm:$0xff]   ;;  %v1832_v62 = vld [vmem:[%s2129_s7 + $0x164] ss:$16 sps:$4 sm:$0xff]   ;;  %v1837_v63 = vld [vmem:[%s2129_s7 + $0x1ac] ss:$16 sps:$4 sm:$0xff]  }
  0x52   : > { %v1860_v60 = vld [vmem:[%s2535_s0 + $0x4] ss:$12 sps:$4 sm:$0xff]   ;;  %v1835_v0 = vld [vmem:[%s2129_s7 + $0x1a8] ss:$16 sps:$4 sm:$0xff]   ;;  %v1843_v3 = vld [vmem:[%s2129_s7 + $0x18c] ss:$16 sps:$4 sm:$0xff]  }
  0x53   : > { %1680 = vmatmul.mubr.msk.bf16.gmra.mxu1 %vm913_vm0, %v2162_v30  ;;  %935 = vmatpush1.bf16.msra.mxu0 %v1789_v29  ;;  %v2209_v61 = vld [vmem:[%s2535_s0 + $0x50] ss:$12 sps:$4 sm:$0xff]   ;;  %v1839_v2 = vld [vmem:[%s2129_s7 + $0x144] ss:$16 sps:$4 sm:$0xff]   ;;  %v1841_v4 = vld [vmem:[%s2129_s7 + $0x188] ss:$16 sps:$4 sm:$0xff]  }
  0x54   : > { %1077 = vmatpush1.bf16.msra.mxu1 %v1786_v28  ;;  %936 = vmatprep.subr.bf16.mxu0 %v1790_v31  ;;  %v1838_v1 = vld [vmem:[%s2129_s7 + $0x160] ss:$16 sps:$4 sm:$0xff]   ;;  %v1845_v6 = vld [vmem:[%s2129_s7 + $0x124] ss:$16 sps:$4 sm:$0xff]   ;;  %v1850_v7 = vld [vmem:[%s2129_s7 + $0x16c] ss:$16 sps:$4 sm:$0xff]  }
  0x55   : > { %1078 = vmatprep.subr.bf16.mxu1 %v1794_v32  ;;  %1051 = vmatprep.mubr.bf16.mxu1 %v1907_v8  ;;  %v1844_v5 = vld [vmem:[%s2129_s7 + $0x140] ss:$16 sps:$4 sm:$0xff]   ;;  %v1848_v11 = vld [vmem:[%s2129_s7 + $0x168] ss:$16 sps:$4 sm:$0xff]   ;;  %v1852_v15 = vld [vmem:[%s2129_s7 + $0x104] ss:$16 sps:$4 sm:$0xff]  }
  0x56   : > { %958 = vmatprep.mubr.bf16.mxu0 %v1860_v60  ;;  %v445_v9 = vld [vmem:[%s2537_s2] sm:$0xff]  ;;  %v447_v10 = vld [vmem:[%s2537_s2 + $0x10] sm:$0xff]  ;;  %v446_v13 = vld [vmem:[%s2537_s2 + $0x8] sm:$0xff]  ;;  %s1725_s5 = sshll.u32 (%p1963_p5), %s1587_s18, 4 }
  0x57   : > { %937 = vmatpush1.bf16.msra.mxu0 %v1795_v34  ;;  %455 = vperm.xlu0 %1757, %v445_v9   ;;  %v1851_v12 = vld [vmem:[%s2129_s7 + $0x120] ss:$16 sps:$4 sm:$0xff]   ;;  %v448_v14 = vld [vmem:[%s2537_s2 + $0x18] sm:$0xff]  ;;  %v450_v21 = vld [vmem:[%s2537_s2 + $0x28] sm:$0xff]  ;;  %s1483_s23 = scalar_lea.vmem (%p1963_p5), %s2539_s4, %s1725_s5 }
  0x58   : > { %1079 = vmatpush1.bf16.msra.mxu1 %v1792_v33  ;;  %938 = vmatprep.subr.bf16.mxu0 %v1796_v35  ;;  %v1856_v16 = vld [vmem:[%s2129_s7 + $0x14c] ss:$16 sps:$4 sm:$0xff]   ;;  %v1854_v17 = vld [vmem:[%s2129_s7 + $0x148] ss:$16 sps:$4 sm:$0xff]   ;;  %v1857_v18 = vld [vmem:[%s2129_s7 + $0x100] ss:$16 sps:$4 sm:$0xff]  }
  0x59   : > { %1080 = vmatprep.subr.bf16.mxu1 %v1800_v36  ;;  %465 = vperm.xlu1 %1758, %v447_v10   ;;  %v449_v19 = vld [vmem:[%s2537_s2 + $0x20] sm:$0xff]  ;;  %v1864_v22 = vld [vmem:[%s2129_s7 + $0x12c] ss:$16 sps:$4 sm:$0xff]   ;;  %v1862_v25 = vld [vmem:[%s2129_s7 + $0x128] ss:$16 sps:$4 sm:$0xff]  }
  0x5a   : > { %v1867_v23 = vld [vmem:[%s2129_s7 + $0x22c] ss:$16 sps:$4 sm:$0xff]   ;;  %v1865_v26 = vld [vmem:[%s2129_s7 + $0x228] ss:$16 sps:$4 sm:$0xff]   ;;  %v451_v27 = vld [vmem:[%s2537_s2 + $0x30] sm:$0xff] }
  0x5b   : > { %1681 = vmatmul.mubr.msk.bf16.gmra.mxu1 %vm913_vm0, %v2178_v39  ;;  %939 = vmatpush1.bf16.msra.mxu0 %v1801_v38  ;;  %v1858_v24 = vld [vmem:[%s2535_s0] ss:$12 sps:$4 sm:$0xff]   ;;  %v1871_v29 = vld [vmem:[%s2535_s0 + $0x1c] ss:$12 sps:$4 sm:$0xff]   ;;  %v1873_v36 = vld [vmem:[%s2535_s0 + $0x18] ss:$12 sps:$4 sm:$0xff]  }
  0x5c   : > { %1081 = vmatpush1.bf16.msra.mxu1 %v1798_v37  ;;  %940 = vmatprep.subr.bf16.mxu0 %v1802_v40  ;;  %v1870_v28 = vld [vmem:[%s2129_s7 + $0x10c] ss:$16 sps:$4 sm:$0xff]   ;;  %v1868_v33 = vld [vmem:[%s2129_s7 + $0x108] ss:$16 sps:$4 sm:$0xff]   ;;  %v1250_v35 = vld [vmem:[%s2538_s3] sm:$0xff] }
  0x5d   : > { %1082 = vmatprep.subr.bf16.mxu1 %v1806_v41  ;;  %1061 = vmatprep.mubr.bf16.mxu1 %v1907_v8  ;;  %v1879_v31 = vld [vmem:[%s2129_s7 + $0x20c] ss:$16 sps:$4 sm:$0xff]   ;;  %v1877_v34 = vld [vmem:[%s2129_s7 + $0x208] ss:$16 sps:$4 sm:$0xff]   ;;  %v1874_v38 = vld [vmem:[%s2535_s0 + $0x34] ss:$12 sps:$4 sm:$0xff]  }
  0x5e   : > { %460 = vperm.xlu0 %1757, %v446_v13   ;;  %470 = vperm.xlu1 %1758, %v448_v14   ;;  %v452_v32 = vld [vmem:[%s2537_s2 + $0x38] sm:$0xff]  ;;  %v1251_v37 = vld [vmem:[%s2538_s3 + $0x8] sm:$0xff]  ;;  %v1252_v40 = vld [vmem:[%s2538_s3 + $0x10] sm:$0xff] }
  0x5f   : > { %941 = vmatpush1.bf16.msra.mxu0 %v1807_v43  ;;  %v1253_v41 = vld [vmem:[%s2538_s3 + $0x18] sm:$0xff] }
  0x60   : > { %1083 = vmatpush1.bf16.msra.mxu1 %v1804_v42  ;;  %942 = vmatprep.subr.bf16.mxu0 %v1808_v44  ;;  %v1254_v42 = vld [vmem:[%s2538_s3 + $0x20] sm:$0xff]  ;;  %v1876_v43 = vld [vmem:[%s2535_s0 + $0x30] ss:$12 sps:$4 sm:$0xff]   ;;  %v1255_v44 = vld [vmem:[%s2538_s3 + $0x28] sm:$0xff] }
  0x61   : > { %1084 = vmatprep.subr.bf16.mxu1 %v1812_v45  ;;  %v1880_v45 = vld [vmem:[%s2535_s0 + $0x4c] ss:$12 sps:$4 sm:$0xff]  }
  0x62   : > { %475 = vperm.xlu0 %1757, %v449_v19   ;;  %480 = vperm.xlu1 %1758, %v450_v21  }
  0x63   : > { %943 = vmatpush2.bf16.msra.mxu0 %v1813_v47  ;;  %1682 = vmatmul.mubr.msk.bf16.gmra.mxu1 %vm913_vm0, %v2209_v61  ;;  %v1257_v47 = vld [vmem:[%s2538_s3 + $0x38] sm:$0xff] }
  0x64   : > { %1085 = vmatpush1.bf16.msra.mxu1 %v1810_v46  ;;  %944 = vmatprep.subr.bf16.mxu0 %v1814_v48  ;;  %v1256_v46 = vld [vmem:[%s2538_s3 + $0x30] sm:$0xff] }
  0x65   : > { %1086 = vmatprep.subr.bf16.mxu1 %v1818_v49  ;;  %1104 = vmatprep.mubr.bf16.mxu1 %v1860_v60  ;;  %v1882_v48 = vld [vmem:[%s2535_s0 + $0x48] ss:$12 sps:$4 sm:$0xff]  }
  0x66   : > { %485 = vperm.xlu0 %1757, %v451_v27   ;;  %490 = vperm.xlu1 %1758, %v452_v32  }
  0x67   : > { %945 = vmatpush2.bf16.msra.mxu0 %v1819_v51 }
  0x68   : > { %1087 = vmatpush1.bf16.msra.mxu1 %v1816_v50  ;;  %946 = vmatprep.subr.bf16.mxu0 %v1820_v52 }
  0x69   : > { %1088 = vmatprep.subr.bf16.mxu1 %v1824_v53 }
  0x6a   : > { %1260 = vperm.xlu0 %1757, %v1250_v35   ;;  %1265 = vperm.xlu1 %1758, %v1251_v37  }
  0x6b   : > { %947 = vmatpush2.bf16.msra.mxu0 %v1825_v55 }
  0x6c   : > { %1089 = vmatpush2.bf16.msra.mxu1 %v1822_v54  ;;  %948 = vmatprep.subr.bf16.mxu0 %v1826_v56 }
  0x6d   : > { %1090 = vmatprep.subr.bf16.mxu1 %v1830_v57 }
  0x6e   : > { %1270 = vperm.xlu0 %1757, %v1252_v40   ;;  %1275 = vperm.xlu1 %1758, %v1253_v41  }
  0x6f   : > { %949 = vmatpush2.bf16.msra.mxu0 %v1831_v59 }
  0x70   : > { %1091 = vmatpush2.bf16.msra.mxu1 %v1828_v58  ;;  %950 = vmatprep.subr.bf16.mxu0 %v1832_v62 }
  0x71   : > { %1092 = vmatprep.subr.bf16.mxu1 %v1837_v63 }
  0x72   : > { %1280 = vperm.xlu0 %1757, %v1254_v42   ;;  %1285 = vperm.xlu1 %1758, %v1255_v44  }
  0x73   : > { %951 = vmatpush2.bf16.msra.mxu0 %v1838_v1 }
  0x74   : > { %1093 = vmatpush2.bf16.msra.mxu1 %v1835_v0  ;;  %952 = vmatprep.subr.bf16.mxu0 %v1839_v2 }
  0x75   : > { %1094 = vmatprep.subr.bf16.mxu1 %v1843_v3 }
  0x76   : > { %1290 = vperm.xlu0 %1757, %v1256_v46   ;;  %1295 = vperm.xlu1 %1758, %v1257_v47  }
  0x77   : > { %953 = vmatpush2.bf16.msra.mxu0 %v1844_v5 }
  0x78   : > { %1095 = vmatpush2.bf16.msra.mxu1 %v1841_v4  ;;  %954 = vmatprep.subr.bf16.mxu0 %v1845_v6 }
  0x79   : > { %1096 = vmatprep.subr.bf16.mxu1 %v1850_v7 }
  0x7b   : > { %955 = vmatpush2.bf16.msra.mxu0 %v1851_v12 }
  0x7c   : > { %1097 = vmatpush2.bf16.msra.mxu1 %v1848_v11  ;;  %956 = vmatprep.subr.bf16.mxu0 %v1852_v15 }
  0x7d   : > { %1098 = vmatprep.subr.bf16.mxu1 %v1856_v16 }
  0x7f   : > { %957 = vmatpush2.bf16.msra.mxu0 %v1857_v18 }
  0x80   : > { %1099 = vmatpush2.bf16.msra.mxu1 %v1854_v17  ;;  %1157 = vmatprep.subr.bf16.mxu0 %v1867_v23 }
  0x81   : > { %1100 = vmatprep.subr.bf16.mxu1 %v1864_v22 }
  0x82   : > { %959 = vmatmul.mubr.bf16.vlgmr.msra.gmra.mxu0 %v1858_v24 }
  0x83   : > { %1158 = vmatpush1.bf16.msra.mxu0 %v1865_v26  ;;  %968 = vmatprep.mubr.bf16.mxu0 %v1871_v29 }
  0x84   : > { %1101 = vmatpush2.bf16.msra.mxu1 %v1862_v25  ;;  %1159 = vmatprep.subr.bf16.mxu0 %v1879_v31 }
  0x85   : > { %1102 = vmatprep.subr.bf16.mxu1 %v1870_v28 }
  0x87   : > { %1160 = vmatpush1.bf16.msra.mxu0 %v1877_v34 }
  0x88   : > { %1103 = vmatpush2.bf16.msra.mxu1 %v1868_v33 }
  0x89   : > { %1726 = vmatprep.subr.bf16.mxu1 %v1867_v23 }
  0x8a   : > { %969 = vmatmul.mubr.bf16.gmra.mxu0 %v1873_v36 }
  0x8b   : > { %1105 = vmatmul.mubr.bf16.vlgmr.msra.gmra.mxu1 %v1858_v24  ;;  %978 = vmatprep.mubr.bf16.mxu0 %v1874_v38 }
  0x8c   : > { %1114 = vmatprep.mubr.bf16.mxu1 %v1871_v29  ;;  %1728 = vmatpush1.bf16.msra.mxu1 %v1865_v26 }
  0x8d   : > { %1727 = vmatprep.subr.bf16.mxu1 %v1879_v31 }
  0x90   : > { %1729 = vmatpush1.bf16.msra.mxu1 %v1877_v34 }
  0x92   : > { %979 = vmatmul.mubr.bf16.gmra.mxu0 %v1876_v43 }
  0x93   : > { %1115 = vmatmul.mubr.bf16.gmra.mxu1 %v1873_v36  ;;  %988 = vmatprep.mubr.bf16.mxu0 %v1880_v45 }
  0x94   : > { %1124 = vmatprep.mubr.bf16.mxu1 %v1874_v38 }
  0x9a   : > { %989 = vmatmul.mubr.bf16.gmra.mxu0 %v1882_v48 }
  0x9b   : > { %1125 = vmatmul.mubr.bf16.gmra.mxu1 %v1876_v43  ;;  %1177 = vmatprep.mubr.bf16.mxu0 %v1907_v8 }
  0x9c   : > { %1134 = vmatprep.mubr.bf16.mxu1 %v1880_v45 }
  0xa2   : > { %1683 = vmatmul.mubr.msk.bf16.vlgmr.msra.gmra.mxu0 %vm913_vm0, %v2145_v20 }
  0xa3   : > { %1135 = vmatmul.mubr.bf16.gmra.mxu1 %v1882_v48  ;;  %1187 = vmatprep.mubr.bf16.mxu0 %v1907_v8 }
  0xa4   : > { %1207 = vmatprep.mubr.bf16.mxu1 %v1907_v8 }
  0xaa   : > { %1684 = vmatmul.mubr.msk.bf16.gmra.mxu0 %vm913_vm0, %v2162_v30 }
  0xab   : > { %1686 = vmatmul.mubr.msk.bf16.vlgmr.msra.gmra.mxu1 %vm913_vm0, %v2209_v61  ;;  %1197 = vmatprep.mubr.bf16.mxu0 %v1907_v8 }
  0xb2   : > { %1685 = vmatmul.mubr.msk.bf16.gmra.mxu0 %vm913_vm0, %v2178_v39 }
  0xd2   : > { %v2324_v30 = vpop.permute.xlu0 %455 }
  0xd4   : > { %v2328_v8 = vpop.permute.xlu1 %465 }
  0xd9   : > { %v2330_v58 = vpop.permute.xlu0 %460  ;;  %v2336_v60 = vpop.permute.xlu1 %470 }
  0xdd   : > { %v2338_v61 = vpop.permute.xlu0 %475  ;;  %v2342_v63 = vpop.permute.xlu1 %480 }
  0xe1   : > { %v2344_v0 = vpop.permute.xlu0 %485  ;;  %v2351_v5 = vpop.permute.xlu1 %490 }
  0xe5   : > { %v2353_v7 = vpop.permute.xlu0 %1260  ;;  %v2363_v19 = vpop.permute.xlu1 %1265 }
  0xe9   : > { %v2369_v27 = vpop.permute.xlu0 %1270 }
 0x10b   : > { %v1033_v49 = vpop.f32.mrf.mxu1 }
 0x10d   : > { %v1035_v50 = vpop.f32.mrf.mxu1 }
 0x10f   : > { %v1037_v51 = vpop.f32.mrf.mxu1 }
 0x111   : > { %v1039_v52 = vpop.f32.mrf.mxu1 }
 0x113   : > { %v1043_v20 = vpop.f32.mrf.mxu1 }
 0x115   : > { %v1045_v53 = vpop.f32.mrf.mxu1 }
 0x117   : > { %v2318_v54 = vpop.f32.mrf.mxu1 }
 0x119   : > { %v2320_v55 = vpop.f32.mrf.mxu1 }
 0x11b   : > { %v2322_v56 = vpop.f32.mrf.mxu1 }
 0x11d   : > { %v2326_v57 = vpop.f32.mrf.mxu1 }
 0x11f   : > { %v2332_v39 = vpop.f32.mrf.mxu1 }
 0x121   : > { %v2334_v59 = vpop.f32.mrf.mxu1 }
 0x123   : > { %v2340_v62 = vpop.f32.mrf.mxu1 }
 0x125   : > { %v2346_v1 = vpop.f32.mrf.mxu1 }
 0x127   : > { %v2348_v3 = vpop.f32.mrf.mxu1 }
 0x129   : > { %v2356_v12 = vpop.f32.mrf.mxu1 }
 0x142   : > { %v960_v2 = vpop.f32.mrf.mxu0 }
 0x143   : > { %v961_v4 = vadd.f32 %v960_v2, %v2324_v30 }
 0x144   : > { %v962_v6 = vpop.f32.mrf.mxu0 }
 0x145   : > { %v1034_v9 = vadd.f32 %v1033_v49, %v961_v4  ;;  %v963_v10 = vadd.f32 %v962_v6, %v2324_v30  ;;  %v2386_v49 = vpop.permute.xlu1 %1275  ;;  %v2394_v6 = vpop.permute.xlu0 %1280 }
 0x146   : > { %v964_v11 = vpop.f32.mrf.mxu0 }
 0x147   : > { %v1036_v13 = vadd.f32 %v1035_v50, %v963_v10  ;;  %v1298_v14 = vmul.f32 %v2353_v7, %v1034_v9  ;;  %v965_v15 = vadd.f32 %v964_v11, %v2330_v58  ;;  %vm1218_vm1 = vcmp.gt.f32.partialorder %v1034_v9, 0.0 }
 0x148   : > { %v966_v16 = vpop.f32.mrf.mxu0 }
 0x149   : > { %vm1219_vm2 = vcmp.gt.f32.partialorder %v1036_v13, 0.0  ;;  %v1299_v17 = vmul.f32 %v2353_v7, %v1036_v13  ;;  %v1038_v18 = vadd.f32 %v1037_v51, %v965_v15  ;;  %v967_v21 = vadd.f32 %v966_v16, %v2330_v58 }
 0x14a   : > { %v970_v22 = vpop.f32.mrf.mxu0  ;;  %v1330_v24 = vsel %vm1218_vm1, %v1034_v9, %v1298_v14 }
 0x14b   : > { %v2366_v23 = vpop.f32.mrf.mxu1  ;;  %v1331_v25 = vsel %vm1219_vm2, %v1036_v13, %v1299_v17  ;;  %v971_v26 = vadd.f32 %v970_v22, %v2328_v8  ;;  %v1040_v29 = vadd.f32 %v1039_v52, %v967_v21  ;;  %v1302_v31 = vmul.f32 %v2363_v19, %v1038_v18 }
 0x14c   : > { %v1709_v28 = vpack.c.bf16 %v1331_v25, %v1330_v24  ;;  %v972_v32 = vpop.f32.mrf.mxu0  ;;  %vm1222_vm3 = vcmp.gt.f32.partialorder %v1038_v18, 0.0 }
 0x14d   : > { %v2372_v33 = vpop.f32.mrf.mxu1  ;;  %v1044_v34 = vadd.f32 %v1043_v20, %v971_v26  ;;  %v973_v35 = vadd.f32 %v972_v32, %v2328_v8  ;;  %vm1223_vm4 = vcmp.gt.f32.partialorder %v1040_v29, 0.0  ;;  %v1303_v36 = vmul.f32 %v2363_v19, %v1040_v29 }
 0x14e   : > { %1458 = vst [vmem:[%s2375_s15] sm:$0xff] %v1709_v28  ;;  %v974_v37 = vpop.f32.mrf.mxu0  ;;  %v1334_v43 = vsel %vm1222_vm3, %v1038_v18, %v1302_v31  ;;  %v2412_v31 = vpop.permute.xlu1 %1285 }
 0x14f   : > { %v2379_v38 = vpop.f32.mrf.mxu1  ;;  %v1046_v40 = vadd.f32 %v1045_v53, %v973_v35  ;;  %v1306_v41 = vmul.f32 %v2369_v27, %v1044_v34  ;;  %v975_v42 = vadd.f32 %v974_v37, %v2336_v60  ;;  %v1335_v44 = vsel %vm1223_vm4, %v1040_v29, %v1303_v36 }
 0x150   : > { %vm1226_vm5 = vcmp.gt.f32.partialorder %v1044_v34, 0.0  ;;  %v976_v45 = vpop.f32.mrf.mxu0  ;;  %v1711_v47 = vpack.c.bf16 %v1335_v44, %v1334_v43 }
 0x151   : > { %v2383_v46 = vpop.f32.mrf.mxu1  ;;  %vm1227_vm6 = vcmp.gt.f32.partialorder %v1046_v40, 0.0  ;;  %v1307_v48 = vmul.f32 %v2369_v27, %v1046_v40  ;;  %v1048_v50 = vadd.f32 %v2318_v54, %v975_v42  ;;  %v977_v51 = vadd.f32 %v976_v45, %v2336_v60 }
 0x152   : > { %v980_v52 = vpop.f32.mrf.mxu0  ;;  %1460 = vst [vmem:[%s2375_s15 + $0x10] sm:$0xff] %v1711_v47  ;;  %v1338_v53 = vsel %vm1226_vm5, %v1044_v34, %v1306_v41  ;;  %v2420_v41 = vpop.permute.xlu0 %1290 }
 0x153   : > { %v2390_v20 = vpop.f32.mrf.mxu1  ;;  %v1339_v2 = vsel %vm1227_vm6, %v1046_v40, %v1307_v48  ;;  %v981_v4 = vadd.f32 %v980_v52, %v2338_v61  ;;  %v1050_v10 = vadd.f32 %v2320_v55, %v977_v51  ;;  %v1310_v11 = vmul.f32 %v2386_v49, %v1048_v50 }
 0x154   : > { %v1713_v9 = vpack.c.bf16 %v1339_v2, %v1338_v53  ;;  %v982_v13 = vpop.f32.mrf.mxu0  ;;  %vm1230_vm7 = vcmp.gt.f32.partialorder %v1048_v50, 0.0 }
 0x155   : > { %v2398_v54 = vpop.f32.mrf.mxu1  ;;  %v1054_v14 = vadd.f32 %v2322_v56, %v981_v4  ;;  %v983_v15 = vadd.f32 %v982_v13, %v2338_v61  ;;  %vm1231_vm8 = vcmp.gt.f32.partialorder %v1050_v10, 0.0  ;;  %v1311_v16 = vmul.f32 %v2386_v49, %v1050_v10 }
 0x156   : > { %1462 = vst [vmem:[%s2375_s15 + $0x20] sm:$0xff] %v1713_v9  ;;  %v984_v17 = vpop.f32.mrf.mxu0  ;;  %v1342_v24 = vsel %vm1230_vm7, %v1048_v50, %v1310_v11  ;;  %v1107_v11 = vadd.f32 %v2366_v23, %v2324_v30 }
 0x157   : > { %v2404_v18 = vpop.f32.mrf.mxu1  ;;  %v1056_v21 = vadd.f32 %v2326_v57, %v983_v15  ;;  %v1314_v55 = vmul.f32 %v2394_v6, %v1054_v14  ;;  %v985_v22 = vadd.f32 %v984_v17, %v2342_v63  ;;  %v1343_v25 = vsel %vm1231_vm8, %v1050_v10, %v1311_v16 }
 0x158   : > { %vm1234_vm9 = vcmp.gt.f32.partialorder %v1054_v14, 0.0  ;;  %v986_v56 = vpop.f32.mrf.mxu0  ;;  %v1715_v28 = vpack.c.bf16 %v1343_v25, %v1342_v24  ;;  %v2445_v24 = vpop.permute.xlu1 %1295  ;;  %v1111_v25 = vadd.f32 %v2379_v38, %v2330_v58 }
 0x159   : > { %v2409_v26 = vpop.f32.mrf.mxu1  ;;  %vm1235_vm10 = vcmp.gt.f32.partialorder %v1056_v21, 0.0  ;;  %v1315_v29 = vmul.f32 %v2394_v6, %v1056_v21  ;;  %v1058_v32 = vadd.f32 %v2332_v39, %v985_v22  ;;  %v987_v57 = vadd.f32 %v986_v56, %v2342_v63 }
 0x15a   : > { %v990_v34 = vpop.f32.mrf.mxu0  ;;  %1464 = vst [vmem:[%s2375_s15 + $0x30] sm:$0xff] %v1715_v28  ;;  %v1346_v36 = vsel %vm1234_vm9, %v1054_v14, %v1314_v55 }
 0x15b   : > { %v2416_v35 = vpop.f32.mrf.mxu1  ;;  %v1347_v37 = vsel %vm1235_vm10, %v1056_v21, %v1315_v29  ;;  %v991_v40 = vadd.f32 %v990_v34, %v2344_v0  ;;  %v1060_v43 = vadd.f32 %v2334_v59, %v987_v57  ;;  %v1318_v44 = vmul.f32 %v2412_v31, %v1058_v32 }
 0x15c   : > { %v1717_v42 = vpack.c.bf16 %v1347_v37, %v1346_v36  ;;  %v992_v45 = vpop.f32.mrf.mxu0  ;;  %vm1238_vm11 = vcmp.gt.f32.partialorder %v1058_v32, 0.0  ;;  %v1109_v21 = vadd.f32 %v2372_v33, %v2324_v30  ;;  %v1113_v30 = vadd.f32 %v2383_v46, %v2330_v58 }
 0x15d   : > { %v2424_v39 = vpop.f32.mrf.mxu1  ;;  %v1064_v47 = vadd.f32 %v2340_v62, %v991_v40  ;;  %v993_v48 = vadd.f32 %v992_v45, %v2344_v0  ;;  %vm1239_vm12 = vcmp.gt.f32.partialorder %v1060_v43, 0.0  ;;  %v1319_v50 = vmul.f32 %v2412_v31, %v1060_v43 }
 0x15e   : > { %1466 = vst [vmem:[%s2375_s15 + $0x40] sm:$0xff] %v1717_v42  ;;  %v994_v51 = vpop.f32.mrf.mxu0  ;;  %v1350_v4 = vsel %vm1238_vm11, %v1058_v32, %v1318_v44  ;;  %v1117_v34 = vadd.f32 %v2390_v20, %v2328_v8  ;;  %v1121_v58 = vadd.f32 %v2404_v18, %v2336_v60 }
 0x15f   : > { %v2430_v52 = vpop.f32.mrf.mxu1  ;;  %v1066_v53 = vadd.f32 %v2346_v1, %v993_v48  ;;  %v1322_v59 = vmul.f32 %v2420_v41, %v1064_v47  ;;  %v995_v2 = vadd.f32 %v994_v51, %v2351_v5  ;;  %v1351_v9 = vsel %vm1239_vm12, %v1060_v43, %v1319_v50 }
 0x160   : > { %vm1242_vm13 = vcmp.gt.f32.partialorder %v1064_v47, 0.0  ;;  %v996_v62 = vpop.f32.mrf.mxu0  ;;  %v1719_v13 = vpack.c.bf16 %v1351_v9, %v1350_v4  ;;  %v1127_v9 = vadd.f32 %v2416_v35, %v2338_v61 }
 0x161   : > { %v2435_v10 = vpop.f32.mrf.mxu1  ;;  %vm1243_vm14 = vcmp.gt.f32.partialorder %v1066_v53, 0.0  ;;  %v1323_v14 = vmul.f32 %v2420_v41, %v1066_v53  ;;  %v1068_v1 = vadd.f32 %v2348_v3, %v995_v2  ;;  %v997_v15 = vadd.f32 %v996_v62, %v2351_v5 }
 0x162   : > { %v1179_v17 = vpop.f32.mrf.mxu0  ;;  %1468 = vst [vmem:[%s2375_s15 + $0x50] sm:$0xff] %v1719_v13  ;;  %v1354_v55 = vsel %vm1242_vm13, %v1064_v47, %v1322_v59 }
 0x163   : > { %v1136_v16 = vpop.f32.mrf.mxu1  ;;  %v1355_v22 = vsel %vm1243_vm14, %v1066_v53, %v1323_v14  ;;  %v1180_v23 = vadd.f32 %v1179_v17, %v1107_v11  ;;  %v1326_v3 = vmul.f32 %v2445_v24, %v1068_v1  ;;  %v1070_v28 = vadd.f32 %v2356_v12, %v997_v15 }
 0x164   : > { %v1721_v56 = vpack.c.bf16 %v1355_v22, %v1354_v55  ;;  %v1181_v32 = vpop.f32.mrf.mxu0  ;;  %vm1246_vm15 = vcmp.gt.f32.partialorder %v1068_v1, 0.0  ;;  %v1119_v12 = vadd.f32 %v2398_v54, %v2328_v8  ;;  %v1137_v20 = vadd.f32 %v1136_v16, %v2344_v0 }
 0x165   : > { %v1138_v29 = vpop.f32.mrf.mxu1  ;;  %v1300_v33 = vmul.f32 %v2353_v7, %v1180_v23  ;;  %v1182_v57 = vadd.f32 %v1181_v32, %v1109_v21  ;;  %vm1247_vm0 = vcmp.gt.f32.partialorder %v1070_v28, 0.0  ;;  %v1327_v38 = vmul.f32 %v2445_v24, %v1070_v28 }
 0x166   : > { %1470 = vst [vmem:[%s2375_s15 + $0x60] sm:$0xff] %v1721_v56  ;;  %vm1220_vm1 = vcmp.gt.f32.partialorder %v1180_v23, 0.0  ;;  %v1183_v37 = vpop.f32.mrf.mxu0  ;;  %v1358_v40 = vsel %vm1246_vm15, %v1068_v1, %v1326_v3  ;;  %v1123_v8 = vadd.f32 %v2409_v26, %v2336_v60  ;;  %v1139_v62 = vadd.f32 %v1138_v29, %v2344_v0 }
 0x167   : > { %v1140_v36 = vpop.f32.mrf.mxu1  ;;  %vm1221_vm2 = vcmp.gt.f32.partialorder %v1182_v57, 0.0  ;;  %v1301_v46 = vmul.f32 %v2353_v7, %v1182_v57  ;;  %v1359_v42 = vsel %vm1247_vm0, %v1070_v28, %v1327_v38  ;;  %v1184_v43 = vadd.f32 %v1183_v37, %v1111_v25 }
 0x168   : > { %v1185_v45 = vpop.f32.mrf.mxu0  ;;  %v1723_v47 = vpack.c.bf16 %v1359_v42, %v1358_v40  ;;  %v1332_v48 = vsel %vm1220_vm1, %v1180_v23, %v1300_v33  ;;  %v1141_v60 = vadd.f32 %v1140_v36, %v2351_v5  ;;  %v1129_v0 = vadd.f32 %v2424_v39, %v2338_v61 }
 0x169   : > { %v1142_v44 = vpop.f32.mrf.mxu1  ;;  %v1333_v50 = vsel %vm1221_vm2, %v1182_v57, %v1301_v46  ;;  %v1186_v51 = vadd.f32 %v1185_v45, %v1113_v30  ;;  %vm1224_vm3 = vcmp.gt.f32.partialorder %v1184_v43, 0.0  ;;  %v1304_v7 = vmul.f32 %v2363_v19, %v1184_v43 }
 0x16a   : > { %v1710_v54 = vpack.c.bf16 %v1333_v50, %v1332_v48  ;;  %v1189_v18 = vpop.f32.mrf.mxu0  ;;  %1472 = vst [vmem:[%s2375_s15 + $0x70] sm:$0xff] %v1723_v47  ;;  %v1143_v55 = vadd.f32 %v1142_v44, %v2351_v5  ;;  %v1131_v36 = vadd.f32 %v2430_v52, %v2342_v63 }
 0x16b   : > { %v1209_v53 = vpop.f32.mrf.mxu1  ;;  %vm1225_vm4 = vcmp.gt.f32.partialorder %v1186_v51, 0.0  ;;  %v1305_v59 = vmul.f32 %v2363_v19, %v1186_v51  ;;  %v1190_v2 = vadd.f32 %v1189_v18, %v1117_v34  ;;  %v1336_v26 = vsel %vm1224_vm3, %v1184_v43, %v1304_v7 }
 0x16c   : > { %v1210_v4 = vadd.f32 %v1209_v53, %v1137_v20  ;;  %1459 = vst [vmem:[%s2375_s15 + $0x8] sm:$0xff] %v1710_v54  ;;  %v1191_v11 = vpop.f32.mrf.mxu0 }
 0x16d   : > { %v1211_v13 = vpop.f32.mrf.mxu1  ;;  %v1337_v14 = vsel %vm1225_vm4, %v1186_v51, %v1305_v59  ;;  %vm1228_vm5 = vcmp.gt.f32.partialorder %v1190_v2, 0.0  ;;  %v1308_v1 = vmul.f32 %v2369_v27, %v1190_v2  ;;  %v1192_v16 = vadd.f32 %v1191_v11, %v1119_v12  ;;  %v1512_v11 = vld [vmem:[%s2375_s15 + $0x40] sm:$0xff] (%p1963_p5) }
 0x16e   : > { %vm1244_vm6 = vcmp.gt.f32.partialorder %v1210_v4, 0.0  ;;  %v1712_v19 = vpack.c.bf16 %v1337_v14, %v1336_v26  ;;  %v1324_v15 = vmul.f32 %v2420_v41, %v1210_v4  ;;  %v1212_v17 = vadd.f32 %v1211_v13, %v1139_v62  ;;  %v1193_v35 = vpop.f32.mrf.mxu0  ;;  %1513 = vst [vmem:[%s1483_s23 + $0x80] sm:$0xff] (%p1963_p5), %v1512_v11  ;;  %v1516_v14 = vld [vmem:[%s2375_s15 + $0x50] sm:$0xff] (%p1963_p5) }
 0x16f   : > { %v1213_v21 = vpop.f32.mrf.mxu1  ;;  %v1194_v22 = vadd.f32 %v1193_v35, %v1121_v58  ;;  %v1340_v25 = vsel %vm1228_vm5, %v1190_v2, %v1308_v1  ;;  %vm1229_vm7 = vcmp.gt.f32.partialorder %v1192_v16, 0.0  ;;  %v1309_v56 = vmul.f32 %v2369_v27, %v1192_v16  ;;  %v1500_v2 = vld [vmem:[%s2375_s15 + $0x10] sm:$0xff] (%p1963_p5)  ;;  %1517 = vst [vmem:[%s1483_s23 + $0xa0] sm:$0xff] (%p1963_p5), %v1516_v14 }
 0x170   : > { %v1214_v23 = vadd.f32 %v1213_v21, %v1141_v60  ;;  %1461 = vst [vmem:[%s2375_s15 + $0x18] sm:$0xff] %v1712_v19  ;;  %vm1245_vm8 = vcmp.gt.f32.partialorder %v1212_v17, 0.0  ;;  %v1195_v3 = vpop.f32.mrf.mxu0  ;;  %v1356_v29 = vsel %vm1244_vm6, %v1210_v4, %v1324_v15  ;;  %v1325_v32 = vmul.f32 %v2420_v41, %v1212_v17  ;;  %1501 = vst [vmem:[%s1483_s23 + $0x20] sm:$0xff] (%p1963_p5), %v1500_v2  ;;  %v1508_v60 = vld [vmem:[%s2375_s15 + $0x30] sm:$0xff] (%p1963_p5)  ;;  %v1520_v19 = vld [vmem:[%s2375_s15 + $0x60] sm:$0xff] (%p1963_p5) }
 0x171   : > { %v1215_v28 = vpop.f32.mrf.mxu1  ;;  %vm1232_vm9 = vcmp.gt.f32.partialorder %v1194_v22, 0.0  ;;  %v1312_v30 = vmul.f32 %v2386_v49, %v1194_v22  ;;  %v1341_v61 = vsel %vm1229_vm7, %v1192_v16, %v1309_v56  ;;  %v1196_v39 = vadd.f32 %v1195_v3, %v1123_v8  ;;  %1509 = vst [vmem:[%s1483_s23 + $0x60] sm:$0xff] (%p1963_p5), %v1508_v60  ;;  %v1524_v16 = vld [vmem:[%s2375_s15 + $0x70] sm:$0xff] (%p1963_p5)  ;;  %1521 = vst [vmem:[%s1483_s23 + $0xc0] sm:$0xff] (%p1963_p5), %v1520_v19 }
 0x172   : > { %v1328_v5 = vmul.f32 %v2445_v24, %v1214_v23  ;;  %v1216_v33 = vadd.f32 %v1215_v28, %v1143_v55  ;;  %v1199_v57 = vpop.f32.mrf.mxu0  ;;  %v1714_v34 = vpack.c.bf16 %v1341_v61, %v1340_v25  ;;  %v1357_v27 = vsel %vm1245_vm8, %v1212_v17, %v1325_v32  ;;  %1525 = vst [vmem:[%s1483_s23 + $0xe0] sm:$0xff] (%p1963_p5), %v1524_v16 }
 0x173   : > { %vm1248_vm10 = vcmp.gt.f32.partialorder %v1214_v23, 0.0  ;;  %v1200_v38 = vadd.f32 %v1199_v57, %v1127_v9  ;;  %v1722_v37 = vpack.c.bf16 %v1357_v27, %v1356_v29  ;;  %vm1233_vm11 = vcmp.gt.f32.partialorder %v1196_v39, 0.0  ;;  %v1504_v9 = vld [vmem:[%s2375_s15 + $0x20] sm:$0xff] (%p1963_p5) }
 0x174   : > { %v1313_v41 = vmul.f32 %v2386_v49, %v1196_v39  ;;  %v1201_v12 = vpop.f32.mrf.mxu0  ;;  %v1133_v58 = vadd.f32 %v2435_v10, %v2342_v63  ;;  %1463 = vst [vmem:[%s2375_s15 + $0x28] sm:$0xff] %v1714_v34  ;;  %v1344_v46 = vsel %vm1232_vm9, %v1194_v22, %v1312_v30  ;;  %vm1249_vm12 = vcmp.gt.f32.partialorder %v1216_v33, 0.0  ;;  %1505 = vst [vmem:[%s1483_s23 + $0x40] sm:$0xff] (%p1963_p5), %v1504_v9 }
 0x175   : > { %v1329_v40 = vmul.f32 %v2445_v24, %v1216_v33  ;;  %1471 = vst [vmem:[%s2375_s15 + $0x68] sm:$0xff] %v1722_v37  ;;  %v1360_v42 = vsel %vm1248_vm10, %v1214_v23, %v1328_v5  ;;  %v1316_v52 = vmul.f32 %v2394_v6, %v1200_v38  ;;  %v1202_v43 = vadd.f32 %v1201_v12, %v1129_v0 }
 0x176   : > { %v1345_v20 = vsel %vm1233_vm11, %v1196_v39, %v1313_v41  ;;  %v1203_v44 = vpop.f32.mrf.mxu0  ;;  %vm1236_vm13 = vcmp.gt.f32.partialorder %v1200_v38, 0.0 }
 0x177   : > { %v1716_v49 = vpack.c.bf16 %v1345_v20, %v1344_v46  ;;  %v1361_v45 = vsel %vm1249_vm12, %v1216_v33, %v1329_v40  ;;  %v1204_v63 = vadd.f32 %v1203_v44, %v1131_v36  ;;  %vm1237_vm14 = vcmp.gt.f32.partialorder %v1202_v43, 0.0  ;;  %v1502_v4 = vld [vmem:[%s2375_s15 + $0x18] sm:$0xff] (%p1963_p5) }
 0x178   : > { %v1724_v10 = vpack.c.bf16 %v1361_v45, %v1360_v42  ;;  %v1317_v47 = vmul.f32 %v2394_v6, %v1202_v43  ;;  %v1205_v48 = vpop.f32.mrf.mxu0  ;;  %v1348_v51 = vsel %vm1236_vm13, %v1200_v38, %v1316_v52  ;;  %v1496_v6 = vld [vmem:[%s2375_s15] sm:$0xff] (%p1963_p5)  ;;  %1503 = vst [vmem:[%s1483_s23 + $0x28] sm:$0xff] (%p1963_p5), %v1502_v4 }
 0x179   : > { %1465 = vst [vmem:[%s2375_s15 + $0x38] sm:$0xff] %v1716_v49  ;;  %v1320_v24 = vmul.f32 %v2412_v31, %v1204_v63  ;;  %v1206_v50 = vadd.f32 %v1205_v48, %v1133_v58  ;;  %vm1240_vm15 = vcmp.gt.f32.partialorder %v1204_v63, 0.0  ;;  %1497 = vst [vmem:[%s1483_s23] sm:$0xff] (%p1963_p5), %v1496_v6 }
 0x17a   : > { %1473 = vst [vmem:[%s2375_s15 + $0x78] sm:$0xff] %v1724_v10  ;;  %v1349_v8 = vsel %vm1237_vm14, %v1202_v43, %v1317_v47 }
 0x17b   : > { %v1718_v54 = vpack.c.bf16 %v1349_v8, %v1348_v51  ;;  %vm1241_vm0 = vcmp.gt.f32.partialorder %v1206_v50, 0.0  ;;  %v1321_v7 = vmul.f32 %v2412_v31, %v1206_v50  ;;  %v1352_v18 = vsel %vm1240_vm15, %v1204_v63, %v1320_v24  ;;  %v1498_v31 = vld [vmem:[%s2375_s15 + $0x8] sm:$0xff] (%p1963_p5) }
 0x17c   : > { %1480 = sbr.rel (!%p1963_p5) target bundleno = 393 (0x189), region = 63  ;;  %v1506_v62 = vld [vmem:[%s2375_s15 + $0x28] sm:$0xff] (%p1963_p5)  ;;  %1499 = vst [vmem:[%s1483_s23 + $0x8] sm:$0xff] (%p1963_p5), %v1498_v31 }
 0x17d   : > { %1467 = vst [vmem:[%s2375_s15 + $0x48] sm:$0xff] %v1718_v54  ;;  %v1353_v53 = vsel %vm1241_vm0, %v1206_v50, %v1321_v7  ;;  %1507 = vst [vmem:[%s1483_s23 + $0x48] sm:$0xff] (%p1963_p5), %v1506_v62  ;;  %v1522_v15 = vld [vmem:[%s2375_s15 + $0x68] sm:$0xff] (%p1963_p5) }
 0x17e   : > { %v1720_v59 = vpack.c.bf16 %v1353_v53, %v1352_v18  ;;  %1523 = vst [vmem:[%s1483_s23 + $0xc8] sm:$0xff] (%p1963_p5), %v1522_v15 }
 0x180   : > { %1469 = vst [vmem:[%s2375_s15 + $0x58] sm:$0xff] %v1720_v59  ;;  %v1510_v26 = vld [vmem:[%s2375_s15 + $0x38] sm:$0xff] (%p1963_p5) }
 0x181   : > { %1511 = vst [vmem:[%s1483_s23 + $0x68] sm:$0xff] %v1510_v26  ;;  %v1526_v17 = vld [vmem:[%s2375_s15 + $0x78] sm:$0xff] }
 0x182   : > { %1527 = vst [vmem:[%s1483_s23 + $0xe8] sm:$0xff] %v1526_v17 }
 0x184   : > { %v1514_v13 = vld [vmem:[%s2375_s15 + $0x48] sm:$0xff] }
 0x185   : > { %1515 = vst [vmem:[%s1483_s23 + $0x88] sm:$0xff] %v1514_v13 }
 0x187   : > { %v1518_v1 = vld [vmem:[%s2375_s15 + $0x58] sm:$0xff] }
 0x188   : > { %1519 = vst [vmem:[%s1483_s23 + $0xa8] sm:$0xff] %v1518_v1 }
 0x189 PF: > { %p11_p10 = scmp.ge.s32.totalorder %s1950_s19, 4   ;;  %s2541_s15 = smov %s1901_s16 }
 0x18a   : > { %s2542_s16 = smov %s1961_s22  ;;  %s2543_s17 = smov %s1950_s19 }
 0x18b   :  { %13 = sbr.rel (!%p11_p10) target bundleno = 2 (0x2), region = 117 }

// kernel: onet_forward.7
= control target key start
LH: loop header
LB: loop body
LE: loop exit
PB: predicated region body
PF: predicated region fallthrough
CT: control target
= control target key end

     0   :  { %v1080_v1 = vmov 0   ;;  %vm478_vm0 = vcmask 523264   ;;  %s1345_s1 = inlined_call_operand.vmem [shape: bf16[576,128], index: 1, kind: input, shape index: {}]   ;;  %s1346_s0 = inlined_call_operand.vmem [shape: bf16[64,576], index: 0, kind: input, shape index: {}]   ;;  %s1347_s2 = inlined_call_operand.vmem [shape: f32[64,1], index: 2, kind: input, shape index: {}]   ;;  %s1348_s3 = inlined_call_operand.vmem [shape: f32[64,1], index: 3, kind: input, shape index: {}]   ;;  %s1349_s4 = inlined_call_operand.vmem [shape: bf16[64,128], index: 4, kind: output, shape index: {}]  }
   0x1   :  { %v1016_v0 = vld [vmem:[%s1345_s1 + $0x78] sm:$0xff]   ;;  %1015 = vset.pattern.permute.xlu1 %v1080_v1  ;;  %1014 = vset.pattern.permute.xlu0 %v1080_v1  ;;  %v1020_v5 = vld [vmem:[%s1345_s1 + $0x70] sm:$0xff]   ;;  %v1024_v9 = vld [vmem:[%s1345_s1 + $0x68] sm:$0xff]  }
   0x2   :  { %v1017_v2 = vld [vmem:[%s1345_s1 + $0xf8] sm:$0xff]   ;;  %901 = vmatprep.subr.bf16.mxu0 %v1016_v0  ;;  %v1021_v6 = vld [vmem:[%s1345_s1 + $0xf0] sm:$0xff]   ;;  %v1025_v10 = vld [vmem:[%s1345_s1 + $0xe8] sm:$0xff]  }
   0x3   :  { %v1018_v3 = vld [vmem:[%s1345_s1 + $0x38] sm:$0xff]   ;;  %941 = vmatprep.subr.bf16.mxu1 %v1017_v2  ;;  %v1022_v7 = vld [vmem:[%s1345_s1 + $0x30] sm:$0xff]   ;;  %v1026_v11 = vld [vmem:[%s1345_s1 + $0x28] sm:$0xff]  }
   0x4   :  { %v1019_v4 = vld [vmem:[%s1345_s1 + $0xb8] sm:$0xff]   ;;  %902 = vmatpush3.bf16.msra.mxu0 %v1018_v3  ;;  %v1023_v8 = vld [vmem:[%s1345_s1 + $0xb0] sm:$0xff]   ;;  %v1027_v12 = vld [vmem:[%s1345_s1 + $0xa8] sm:$0xff]  }
   0x5   :  { %942 = vmatpush3.bf16.msra.mxu1 %v1019_v4  ;;  %903 = vmatprep.subr.bf16.mxu0 %v1020_v5  ;;  %v1028_v13 = vld [vmem:[%s1345_s1 + $0x60] sm:$0xff]   ;;  %v1032_v17 = vld [vmem:[%s1345_s1 + $0x58] sm:$0xff]   ;;  %v1036_v21 = vld [vmem:[%s1345_s1 + $0x50] sm:$0xff]  }
   0x6   :  { %943 = vmatprep.subr.bf16.mxu1 %v1021_v6  ;;  %v1029_v14 = vld [vmem:[%s1345_s1 + $0xe0] sm:$0xff]   ;;  %v1033_v18 = vld [vmem:[%s1345_s1 + $0xd8] sm:$0xff]   ;;  %v1037_v22 = vld [vmem:[%s1345_s1 + $0xd0] sm:$0xff]  }
   0x7   :  { %v1030_v15 = vld [vmem:[%s1345_s1 + $0x20] sm:$0xff]   ;;  %v1034_v19 = vld [vmem:[%s1345_s1 + $0x18] sm:$0xff]   ;;  %v1038_v23 = vld [vmem:[%s1345_s1 + $0x10] sm:$0xff]  }
   0x8   :  { %904 = vmatpush3.bf16.msra.mxu0 %v1022_v7  ;;  %v1031_v16 = vld [vmem:[%s1345_s1 + $0xa0] sm:$0xff]   ;;  %v1035_v20 = vld [vmem:[%s1345_s1 + $0x98] sm:$0xff]   ;;  %v1039_v24 = vld [vmem:[%s1345_s1 + $0x90] sm:$0xff]  }
   0x9   :  { %944 = vmatpush3.bf16.msra.mxu1 %v1023_v8  ;;  %905 = vmatprep.subr.bf16.mxu0 %v1024_v9  ;;  %v1040_v25 = vld [vmem:[%s1345_s1 + $0x48] sm:$0xff]   ;;  %v1044_v29 = vld [vmem:[%s1345_s1 + $0x40] sm:$0xff]   ;;  %v1054_v37 = vld [vmem:[%s1345_s1 + $0x118] sm:$0xff]  }
   0xa   :  { %945 = vmatprep.subr.bf16.mxu1 %v1025_v10  ;;  %v1041_v26 = vld [vmem:[%s1345_s1 + $0xc8] sm:$0xff]   ;;  %v1045_v30 = vld [vmem:[%s1345_s1 + $0xc0] sm:$0xff]   ;;  %v1061_v40 = vld [vmem:[%s1345_s1 + $0x110] sm:$0xff]  }
   0xb   :  { %v1042_v27 = vld [vmem:[%s1345_s1 + $0x8] sm:$0xff]   ;;  %v1046_v31 = vld [vmem:[%s1345_s1] sm:$0xff]   ;;  %v1064_v44 = vld [vmem:[%s1346_s0 + $0x5c] ss:$20 sps:$4 sm:$0xff]  }
   0xc   :  { %906 = vmatpush3.bf16.msra.mxu0 %v1026_v11  ;;  %v1043_v28 = vld [vmem:[%s1345_s1 + $0x88] sm:$0xff]   ;;  %v1047_v32 = vld [vmem:[%s1345_s1 + $0x80] sm:$0xff]   ;;  %v1069_v49 = vld [vmem:[%s1346_s0 + $0x7c] ss:$20 sps:$4 sm:$0xff]  }
   0xd   :  { %946 = vmatpush3.bf16.msra.mxu1 %v1027_v12  ;;  %907 = vmatprep.subr.bf16.mxu0 %v1028_v13  ;;  %v1048_v33 = vld [vmem:[%s1346_s0] ss:$20 sps:$4 sm:$0xff]   ;;  %v1050_v34 = vld [vmem:[%s1346_s0 + $0x4] ss:$20 sps:$4 sm:$0xff]   ;;  %v1051_v35 = vld [vmem:[%s1346_s0 + $0x8] ss:$20 sps:$4 sm:$0xff]  }
   0xe   :  { %947 = vmatprep.subr.bf16.mxu1 %v1029_v14  ;;  %v1053_v36 = vld [vmem:[%s1346_s0 + $0xc] ss:$20 sps:$4 sm:$0xff]   ;;  %523 = vmatprep.mubr.bf16.mxu0 %v1050_v34  ;;  %v1057_v39 = vld [vmem:[%s1346_s0 + $0x34] ss:$20 sps:$4 sm:$0xff]   ;;  %v1060_v42 = vld [vmem:[%s1346_s0 + $0x30] ss:$20 sps:$4 sm:$0xff]  }
   0xf   :  { %588 = vmatprep.mubr.bf16.mxu1 %v1053_v36  ;;  %v1055_v38 = vld [vmem:[%s1346_s0 + $0x2c] ss:$20 sps:$4 sm:$0xff]   ;;  %v1059_v41 = vld [vmem:[%s1346_s0 + $0x28] ss:$20 sps:$4 sm:$0xff]   ;;  %v1066_v47 = vld [vmem:[%s1346_s0 + $0x50] ss:$20 sps:$4 sm:$0xff]  }
  0x10   :  { %908 = vmatpush3.bf16.msra.mxu0 %v1030_v15  ;;  %v1062_v43 = vld [vmem:[%s1346_s0 + $0x54] ss:$20 sps:$4 sm:$0xff]   ;;  %v1075_v46 = vld [vmem:[%s1345_s1 + $0x100] sm:$0xff]   ;;  %v1067_v48 = vld [vmem:[%s1346_s0 + $0x58] ss:$20 sps:$4 sm:$0xff]  }
  0x11   :  { %948 = vmatpush3.bf16.msra.mxu1 %v1031_v16  ;;  %909 = vmatprep.subr.bf16.mxu0 %v1032_v17  ;;  %v1068_v45 = vld [vmem:[%s1345_s1 + $0x108] sm:$0xff]   ;;  %v1071_v50 = vld [vmem:[%s1346_s0 + $0x84] ss:$20 sps:$4 sm:$0xff]   ;;  %v116_v51 = vld [vmem:[%s1347_s2 + $0x10] sm:$0xff] }
  0x12   :  { %949 = vmatprep.subr.bf16.mxu1 %v1033_v18  ;;  %v114_v52 = vld [vmem:[%s1347_s2] sm:$0xff]  ;;  %134 = vperm.xlu1 %1015, %v116_v51   ;;  %v117_v53 = vld [vmem:[%s1347_s2 + $0x18] sm:$0xff]  ;;  %v115_v54 = vld [vmem:[%s1347_s2 + $0x8] sm:$0xff] }
  0x13   :  { %124 = vperm.xlu0 %1014, %v114_v52   ;;  %v1073_v55 = vld [vmem:[%s1346_s0 + $0x78] ss:$20 sps:$4 sm:$0xff]   ;;  %v1074_v56 = vld [vmem:[%s1346_s0 + $0x80] ss:$20 sps:$4 sm:$0xff]   ;;  %v1076_v57 = vld [vmem:[%s1346_s0 + $0x10] ss:$20 sps:$4 sm:$0xff]  }
  0x14   :  { %910 = vmatpush3.bf16.msra.mxu0 %v1034_v19  ;;  %v119_v58 = vld [vmem:[%s1347_s2 + $0x28] sm:$0xff]  ;;  %v1077_v59 = vld [vmem:[%s1346_s0 + $0x60] ss:$20 sps:$4 sm:$0xff]   ;;  %v121_v61 = vld [vmem:[%s1347_s2 + $0x38] sm:$0xff] }
  0x15   :  { %950 = vmatpush3.bf16.msra.mxu1 %v1035_v20  ;;  %911 = vmatprep.subr.bf16.mxu0 %v1036_v21  ;;  %v118_v60 = vld [vmem:[%s1347_s2 + $0x20] sm:$0xff]  ;;  %v120_v62 = vld [vmem:[%s1347_s2 + $0x30] sm:$0xff]  ;;  %v1078_v63 = vld [vmem:[%s1346_s0 + $0x38] ss:$20 sps:$4 sm:$0xff]  }
  0x16   :  { %951 = vmatprep.subr.bf16.mxu1 %v1037_v22  ;;  %139 = vperm.xlu1 %1015, %v117_v53   ;;  %v1079_v0 = vld [vmem:[%s1346_s0 + $0x88] ss:$20 sps:$4 sm:$0xff]   ;;  %v694_v2 = vld [vmem:[%s1348_s3] sm:$0xff]  ;;  %v696_v4 = vld [vmem:[%s1348_s3 + $0x10] sm:$0xff] }
  0x17   :  { %129 = vperm.xlu0 %1014, %v115_v54   ;;  %v695_v1 = vld [vmem:[%s1348_s3 + $0x8] sm:$0xff]  ;;  %v697_v3 = vld [vmem:[%s1348_s3 + $0x18] sm:$0xff]  ;;  %v698_v6 = vld [vmem:[%s1348_s3 + $0x20] sm:$0xff] }
  0x18   :  { %912 = vmatpush3.bf16.msra.mxu0 %v1038_v23  ;;  %v699_v5 = vld [vmem:[%s1348_s3 + $0x28] sm:$0xff]  ;;  %v701_v7 = vld [vmem:[%s1348_s3 + $0x38] sm:$0xff]  ;;  %v700_v8 = vld [vmem:[%s1348_s3 + $0x30] sm:$0xff] }
  0x19   :  { %952 = vmatpush3.bf16.msra.mxu1 %v1039_v24  ;;  %913 = vmatprep.subr.bf16.mxu0 %v1040_v25 }
  0x1a   :  { %953 = vmatprep.subr.bf16.mxu1 %v1041_v26  ;;  %149 = vperm.xlu1 %1015, %v119_v58  }
  0x1b   :  { %144 = vperm.xlu0 %1014, %v118_v60  }
  0x1c   :  { %914 = vmatpush3.bf16.msra.mxu0 %v1042_v27 }
  0x1d   :  { %954 = vmatpush3.bf16.msra.mxu1 %v1043_v28  ;;  %915 = vmatprep.subr.bf16.mxu0 %v1044_v29 }
  0x1e   :  { %955 = vmatprep.subr.bf16.mxu1 %v1045_v30  ;;  %159 = vperm.xlu1 %1015, %v121_v61  }
  0x1f   :  { %154 = vperm.xlu0 %1014, %v120_v62  }
  0x20   :  { %916 = vmatpush3.bf16.msra.mxu0 %v1046_v31 }
  0x21   :  { %956 = vmatpush3.bf16.msra.mxu1 %v1047_v32  ;;  %989 = vmatprep.subr.bf16.mxu0 %v1054_v37 }
  0x22   :  { %1005 = vmatprep.subr.bf16.mxu1 %v1054_v37  ;;  %709 = vperm.xlu1 %1015, %v695_v1  }
  0x23   :  { %524 = vmatmul.mubr.bf16.vlgmr.msra.gmra.mxu0 %v1048_v33  ;;  %704 = vperm.xlu0 %1014, %v694_v2  }
  0x24   :  { %589 = vmatmul.mubr.bf16.vlgmr.msra.gmra.mxu1 %v1051_v35  ;;  %990 = vmatpush3.bf16.msra.mxu0 %v1054_v37 }
  0x25   :  { %1009 = vmatpush3.bf16.msra.mxu1 %v1054_v37  ;;  %531 = vmatprep.mubr.bf16.mxu0 %v1055_v38 }
  0x26   :  { %596 = vmatprep.mubr.bf16.mxu1 %v1057_v39  ;;  %991 = vmatprep.subr.bf16.mxu0 %v1061_v40 }
  0x27   :  { %1006 = vmatprep.subr.bf16.mxu1 %v1061_v40  ;;  %719 = vperm.xlu1 %1015, %v697_v3  }
  0x28   :  { %992 = vmatpush3.bf16.msra.mxu0 %v1061_v40  ;;  %714 = vperm.xlu0 %1014, %v696_v4  }
  0x29   :  { %1010 = vmatpush3.bf16.msra.mxu1 %v1061_v40  ;;  %993 = vmatprep.subr.bf16.mxu0 %v1068_v45 }
  0x2a   :  { %1007 = vmatprep.subr.bf16.mxu1 %v1068_v45 }
  0x2b   :  { %532 = vmatmul.mubr.bf16.gmra.mxu0 %v1059_v41  ;;  %729 = vperm.xlu1 %1015, %v699_v5  }
  0x2c   :  { %597 = vmatmul.mubr.bf16.gmra.mxu1 %v1060_v42  ;;  %539 = vmatprep.mubr.bf16.mxu0 %v1062_v43 }
  0x2d   :  { %604 = vmatprep.mubr.bf16.mxu1 %v1064_v44  ;;  %994 = vmatpush3.bf16.msra.mxu0 %v1068_v45 }
  0x2e   :  { %1011 = vmatpush3.bf16.msra.mxu1 %v1068_v45  ;;  %995 = vmatprep.subr.bf16.mxu0 %v1075_v46 }
  0x2f   :  { %1008 = vmatprep.subr.bf16.mxu1 %v1075_v46  ;;  %724 = vperm.xlu0 %1014, %v698_v6  }
  0x30   :  { %739 = vperm.xlu1 %1015, %v701_v7  }
  0x31   :  { %996 = vmatpush3.bf16.msra.mxu0 %v1075_v46 }
  0x32   :  { %1012 = vmatpush3.bf16.msra.mxu1 %v1075_v46 }
  0x33   :  { %540 = vmatmul.mubr.bf16.gmra.mxu0 %v1066_v47  ;;  %734 = vperm.xlu0 %1014, %v700_v8  }
  0x34   :  { %605 = vmatmul.mubr.bf16.gmra.mxu1 %v1067_v48  ;;  %547 = vmatprep.mubr.bf16.mxu0 %v1069_v49 }
  0x35   :  { %612 = vmatprep.mubr.bf16.mxu1 %v1071_v50 }
  0x3b   :  { %548 = vmatmul.mubr.bf16.gmra.mxu0 %v1073_v55 }
  0x3c   :  { %613 = vmatmul.mubr.bf16.gmra.mxu1 %v1074_v56  ;;  %997 = vmatprep.mubr.msk.bf16.mxu0 %vm478_vm0, %v1076_v57 }
  0x3d   :  { %1001 = vmatprep.mubr.msk.bf16.mxu1 %vm478_vm0, %v1077_v59 }
  0x43   :  { %998 = vmatmul.mubr.msk.bf16.vlgmr.msra.gmra.mxu0 %vm478_vm0, %v1078_v63 }
  0x44   :  { %1002 = vmatmul.mubr.msk.bf16.vlgmr.msra.gmra.mxu1 %vm478_vm0, %v1079_v0 }
  0x8d   :  { %v135_v10 = vpop.permute.xlu1 %134 }
  0x8e   :  { %v125_v9 = vpop.permute.xlu0 %124 }
  0x91   :  { %v140_v15 = vpop.permute.xlu1 %139 }
  0x92   :  { %v130_v11 = vpop.permute.xlu0 %129 }
  0x95   :  { %v150_v23 = vpop.permute.xlu1 %149 }
  0x96   :  { %v145_v18 = vpop.permute.xlu0 %144 }
  0x99   :  { %v160_v31 = vpop.permute.xlu1 %159 }
  0x9a   :  { %v155_v26 = vpop.permute.xlu0 %154 }
  0x9d   :  { %v1328_v39 = vpop.permute.xlu1 %709 }
  0x9e   :  { %v1326_v34 = vpop.permute.xlu0 %704 }
  0xa2   :  { %v720_v52 = vpop.permute.xlu1 %719 }
  0xa3   :  { %v715_v43 = vpop.permute.xlu0 %714 }
  0xaa   :  { %v725_v59 = vpop.permute.xlu0 %724 }
  0xe3   :  { %v917_v12 = vpop.f32.mrf.mxu0 }
  0xe4   :  { %v957_v13 = vpop.f32.mrf.mxu1 }
  0xe5   :  { %v918_v14 = vpop.f32.mrf.mxu0 }
  0xe6   :  { %v958_v16 = vpop.f32.mrf.mxu1  ;;  %v919_v42 = vadd.f32 %v918_v14, %v917_v12 }
  0xe7   :  { %v920_v17 = vpop.f32.mrf.mxu0  ;;  %v959_v56 = vadd.f32 %v958_v16, %v957_v13  ;;  %v730_v16 = vpop.permute.xlu1 %729 }
  0xe8   :  { %v960_v19 = vpop.f32.mrf.mxu1  ;;  %v526_v51 = vadd.f32 %v919_v42, %v125_v9 }
  0xe9   :  { %v921_v20 = vpop.f32.mrf.mxu0 }
  0xea   :  { %v961_v21 = vpop.f32.mrf.mxu1  ;;  %v922_v57 = vadd.f32 %v921_v20, %v920_v17  ;;  %v591_v8 = vadd.f32 %v959_v56, %v526_v51 }
  0xeb   :  { %v923_v22 = vpop.f32.mrf.mxu0 }
  0xec   :  { %v963_v24 = vpop.f32.mrf.mxu1  ;;  %v529_v9 = vadd.f32 %v922_v57, %v130_v11 }
  0xed   :  { %v924_v25 = vpop.f32.mrf.mxu0 }
  0xee   :  { %v964_v27 = vpop.f32.mrf.mxu1  ;;  %v925_v44 = vadd.f32 %v924_v25, %v923_v22 }
  0xef   :  { %v926_v28 = vpop.f32.mrf.mxu0  ;;  %v965_v60 = vadd.f32 %v964_v27, %v963_v24 }
  0xf0   :  { %v966_v29 = vpop.f32.mrf.mxu1  ;;  %v534_v53 = vadd.f32 %v925_v44, %v135_v10  ;;  %v962_v10 = vadd.f32 %v961_v21, %v960_v19  ;;  %v740_v44 = vpop.permute.xlu1 %739 }
  0xf1   :  { %v927_v30 = vpop.f32.mrf.mxu0 }
  0xf2   :  { %v967_v32 = vpop.f32.mrf.mxu1  ;;  %v928_v48 = vadd.f32 %v927_v30, %v926_v28  ;;  %v599_v6 = vadd.f32 %v965_v60, %v534_v53  ;;  %v735_v30 = vpop.permute.xlu0 %734 }
  0xf3   :  { %v929_v33 = vpop.f32.mrf.mxu0  ;;  %v968_v12 = vadd.f32 %v967_v32, %v966_v29 }
  0xf4   :  { %v969_v35 = vpop.f32.mrf.mxu1  ;;  %v537_v1 = vadd.f32 %v928_v48, %v140_v15 }
  0xf5   :  { %v930_v36 = vpop.f32.mrf.mxu0 }
  0xf6   :  { %v970_v37 = vpop.f32.mrf.mxu1  ;;  %v931_v49 = vadd.f32 %v930_v36, %v929_v33  ;;  %v602_v28 = vadd.f32 %v968_v12, %v537_v1 }
  0xf7   :  { %v932_v38 = vpop.f32.mrf.mxu0  ;;  %v971_v13 = vadd.f32 %v970_v37, %v969_v35  ;;  %v594_v35 = vadd.f32 %v962_v10, %v529_v9 }
  0xf8   :  { %v972_v40 = vpop.f32.mrf.mxu1  ;;  %v542_v2 = vadd.f32 %v931_v49, %v145_v18 }
  0xf9   :  { %v933_v41 = vpop.f32.mrf.mxu0 }
  0xfa   :  { %v973_v45 = vpop.f32.mrf.mxu1  ;;  %v934_v61 = vadd.f32 %v933_v41, %v932_v38  ;;  %v607_v27 = vadd.f32 %v971_v13, %v542_v2 }
  0xfb   :  { %v935_v46 = vpop.f32.mrf.mxu0 }
  0xfc   :  { %v975_v47 = vpop.f32.mrf.mxu1  ;;  %v545_v17 = vadd.f32 %v934_v61, %v150_v23 }
  0xfd   :  { %v936_v50 = vpop.f32.mrf.mxu0 }
  0xfe   :  { %v937_v54 = vadd.f32 %v936_v50, %v935_v46  ;;  %v976_v55 = vpop.f32.mrf.mxu1 }
  0xff   :  { %v938_v58 = vpop.f32.mrf.mxu0  ;;  %v977_v63 = vadd.f32 %v976_v55, %v975_v47 }
 0x100   :  { %v550_v62 = vadd.f32 %v937_v54, %v155_v26  ;;  %v978_v0 = vpop.f32.mrf.mxu1  ;;  %v974_v26 = vadd.f32 %v973_v45, %v972_v40 }
 0x101   :  { %v939_v3 = vpop.f32.mrf.mxu0 }
 0x102   :  { %v940_v4 = vadd.f32 %v939_v3, %v938_v58  ;;  %v979_v5 = vpop.f32.mrf.mxu1  ;;  %v615_v7 = vadd.f32 %v977_v63, %v550_v62  ;;  %v610_v37 = vadd.f32 %v974_v26, %v545_v17 }
 0x103   :  { %v999_v14 = vpop.f32.mrf.mxu0  ;;  %v980_v22 = vadd.f32 %v979_v5, %v978_v0 }
 0x104   :  { %v553_v20 = vadd.f32 %v940_v4, %v160_v31  ;;  %v664_v24 = vadd.f32 %v999_v14, %v599_v6  ;;  %v1003_v25 = vpop.f32.mrf.mxu1 }
 0x105   :  { %v680_v15 = vadd.f32 %v1003_v25, %v615_v7  ;;  %v655_v18 = vpop.f32.mrf.mxu0 }
 0x106   :  { %vm688_vm1 = vcmp.gt.f32.partialorder %v664_v24, 0.0  ;;  %v744_v33 = vmul.f32 %v715_v43, %v664_v24  ;;  %v656_v36 = vadd.f32 %v655_v18, %v591_v8  ;;  %v671_v11 = vpop.f32.mrf.mxu1  ;;  %v618_v19 = vadd.f32 %v980_v22, %v553_v20 }
 0x107   :  { %vm692_vm2 = vcmp.gt.f32.partialorder %v680_v15, 0.0  ;;  %v748_v21 = vmul.f32 %v735_v30, %v680_v15  ;;  %v672_v29 = vadd.f32 %v671_v11, %v607_v27  ;;  %v1000_v32 = vpop.f32.mrf.mxu0 }
 0x108   :  { %v667_v23 = vadd.f32 %v1000_v32, %v602_v28  ;;  %v1004_v31 = vpop.f32.mrf.mxu1  ;;  %v752_v38 = vsel %vm688_vm1, %v664_v24, %v744_v33  ;;  %vm686_vm3 = vcmp.gt.f32.partialorder %v656_v36, 0.0  ;;  %v742_v40 = vmul.f32 %v1326_v34, %v656_v36 }
 0x109   :  { %v683_v41 = vadd.f32 %v1004_v31, %v618_v19  ;;  %v658_v42 = vpop.f32.mrf.mxu0  ;;  %v756_v45 = vsel %vm692_vm2, %v680_v15, %v748_v21  ;;  %v746_v48 = vmul.f32 %v725_v59, %v672_v29  ;;  %vm690_vm6 = vcmp.gt.f32.partialorder %v672_v29, 0.0 }
 0x10a   :  { %vm689_vm4 = vcmp.gt.f32.partialorder %v667_v23, 0.0  ;;  %v745_v43 = vmul.f32 %v720_v52, %v667_v23  ;;  %v659_v46 = vadd.f32 %v658_v42, %v594_v35  ;;  %v674_v47 = vpop.f32.mrf.mxu1  ;;  %v750_v56 = vsel %vm686_vm3, %v656_v36, %v742_v40 }
 0x10b   :  { %vm693_vm5 = vcmp.gt.f32.partialorder %v683_v41, 0.0  ;;  %v749_v49 = vmul.f32 %v740_v44, %v683_v41  ;;  %v675_v50 = vadd.f32 %v674_v47, %v610_v37  ;;  %v754_v52 = vsel %vm690_vm6, %v672_v29, %v746_v48 }
 0x10c   :  { %v753_v51 = vsel %vm689_vm4, %v667_v23, %v745_v43  ;;  %vm687_vm7 = vcmp.gt.f32.partialorder %v659_v46, 0.0  ;;  %v743_v53 = vmul.f32 %v1328_v39, %v659_v46 }
 0x10d   :  { %v886_v54 = vpack.c.bf16 %v753_v51, %v752_v38  ;;  %v757_v55 = vsel %vm693_vm5, %v683_v41, %v749_v49  ;;  %vm691_vm8 = vcmp.gt.f32.partialorder %v675_v50, 0.0  ;;  %v747_v34 = vmul.f32 %v730_v16, %v675_v50 }
 0x10e   :  { %v896_v57 = vpack.c.bf16 %v757_v55, %v756_v45  ;;  %v751_v58 = vsel %vm687_vm7, %v659_v46, %v743_v53 }
 0x10f   :  { %898 = vst [vmem:[%s1349_s4 + $0x8] sm:$0xff] %v886_v54   ;;  %v881_v59 = vpack.c.bf16 %v751_v58, %v750_v56  ;;  %v755_v60 = vsel %vm691_vm8, %v675_v50, %v747_v34 }
 0x110   :  { %900 = vst [vmem:[%s1349_s4 + $0x18] sm:$0xff] %v896_v57   ;;  %v891_v39 = vpack.c.bf16 %v755_v60, %v754_v52 }
 0x111   :  { %882 = vst [vmem:[%s1349_s4] sm:$0xff] %v881_v59  }
 0x112   :  { %899 = vst [vmem:[%s1349_s4 + $0x10] sm:$0xff] %v891_v39  }

// kernel: onet_forward.8
= control target key start
LH: loop header
LB: loop body
LE: loop exit
PB: predicated region body
PF: predicated region fallthrough
CT: control target
= control target key end

     0   :  { %v897_v1 = vmov 0   ;;  %s1187_s1 = inlined_call_operand.vmem [shape: bf16[256,128], index: 1, kind: input, shape index: {}]   ;;  %s1188_s2 = inlined_call_operand.vmem [shape: f32[128,1], index: 2, kind: input, shape index: {}]   ;;  %s1189_s0 = inlined_call_operand.vmem [shape: bf16[128,256], index: 0, kind: input, shape index: {}]   ;;  %s1190_s3 = inlined_call_operand.vmem [shape: f32[128,1], index: 3, kind: input, shape index: {}]   ;;  %s1191_s4 = inlined_call_operand.vmem [shape: bf16[128,128], index: 4, kind: output, shape index: {}]  }
   0x1   :  { %v857_v0 = vld [vmem:[%s1187_s1 + $0x78] sm:$0xff]   ;;  %856 = vset.pattern.permute.xlu1 %v897_v1  ;;  %855 = vset.pattern.permute.xlu0 %v897_v1  ;;  %v859_v3 = vld [vmem:[%s1187_s1 + $0x70] sm:$0xff]   ;;  %v861_v5 = vld [vmem:[%s1187_s1 + $0x68] sm:$0xff]  }
   0x2   :  { %v858_v2 = vld [vmem:[%s1187_s1 + $0x38] sm:$0xff]   ;;  %774 = vmatprep.subr.bf16.mxu0 %v857_v0  ;;  %838 = vmatprep.subr.bf16.mxu1 %v857_v0  ;;  %v860_v4 = vld [vmem:[%s1187_s1 + $0x30] sm:$0xff]   ;;  %v862_v6 = vld [vmem:[%s1187_s1 + $0x28] sm:$0xff]  }
   0x3   :  { %775 = vmatpush3.bf16.msra.mxu0 %v858_v2  ;;  %846 = vmatpush3.bf16.msra.mxu1 %v858_v2  ;;  %v863_v7 = vld [vmem:[%s1187_s1 + $0x60] sm:$0xff]   ;;  %v68_v8 = vld [vmem:[%s1188_s2 + $0x10] sm:$0xff]  ;;  %v69_v11 = vld [vmem:[%s1188_s2 + $0x18] sm:$0xff] }
   0x4   :  { %776 = vmatprep.subr.bf16.mxu0 %v859_v3  ;;  %839 = vmatprep.subr.bf16.mxu1 %v859_v3  ;;  %v66_v9 = vld [vmem:[%s1188_s2] sm:$0xff]  ;;  %v67_v12 = vld [vmem:[%s1188_s2 + $0x8] sm:$0xff]  ;;  %v865_v13 = vld [vmem:[%s1187_s1 + $0x58] sm:$0xff]  }
   0x5   :  { %94 = vperm.xlu1 %856, %v68_v8   ;;  %84 = vperm.xlu0 %855, %v66_v9   ;;  %v864_v10 = vld [vmem:[%s1187_s1 + $0x20] sm:$0xff]   ;;  %v71_v14 = vld [vmem:[%s1188_s2 + $0x28] sm:$0xff]  ;;  %v866_v16 = vld [vmem:[%s1187_s1 + $0x18] sm:$0xff]  }
   0x6   :  { %v70_v15 = vld [vmem:[%s1188_s2 + $0x20] sm:$0xff]  ;;  %v867_v17 = vld [vmem:[%s1187_s1 + $0x50] sm:$0xff]   ;;  %v73_v18 = vld [vmem:[%s1188_s2 + $0x38] sm:$0xff] }
   0x7   :  { %777 = vmatpush3.bf16.msra.mxu0 %v860_v4  ;;  %847 = vmatpush3.bf16.msra.mxu1 %v860_v4  ;;  %v72_v19 = vld [vmem:[%s1188_s2 + $0x30] sm:$0xff]  ;;  %v869_v21 = vld [vmem:[%s1187_s1 + $0x48] sm:$0xff]   ;;  %v74_v24 = vld [vmem:[%s1188_s2 + $0x40] sm:$0xff] }
   0x8   :  { %778 = vmatprep.subr.bf16.mxu0 %v861_v5  ;;  %840 = vmatprep.subr.bf16.mxu1 %v861_v5  ;;  %v868_v20 = vld [vmem:[%s1187_s1 + $0x10] sm:$0xff]   ;;  %v875_v22 = vld [vmem:[%s1189_s0 + $0x4] ss:$8 sps:$4 sm:$0xff]   ;;  %v77_v28 = vld [vmem:[%s1188_s2 + $0x58] sm:$0xff] }
   0x9   :  { %99 = vperm.xlu1 %856, %v69_v11   ;;  %89 = vperm.xlu0 %855, %v67_v12   ;;  %v75_v23 = vld [vmem:[%s1188_s2 + $0x48] sm:$0xff]  ;;  %v871_v27 = vld [vmem:[%s1187_s1 + $0x40] sm:$0xff]   ;;  %v76_v29 = vld [vmem:[%s1188_s2 + $0x50] sm:$0xff] }
   0xa   :  { %370 = vmatprep.mubr.bf16.mxu0 %v875_v22  ;;  %v878_v25 = vld [vmem:[%s1189_s0 + $0x44] ss:$8 sps:$4 sm:$0xff]   ;;  %v873_v31 = vld [vmem:[%s1189_s0] ss:$8 sps:$4 sm:$0xff]   ;;  %v879_v35 = vld [vmem:[%s1189_s0 + $0x14] ss:$8 sps:$4 sm:$0xff]  }
   0xb   :  { %779 = vmatpush3.bf16.msra.mxu0 %v862_v6  ;;  %848 = vmatpush3.bf16.msra.mxu1 %v862_v6  ;;  %v870_v26 = vld [vmem:[%s1187_s1 + $0x8] sm:$0xff]   ;;  %v872_v30 = vld [vmem:[%s1187_s1] sm:$0xff]   ;;  %v881_v36 = vld [vmem:[%s1189_s0 + $0x54] ss:$8 sps:$4 sm:$0xff]  }
   0xc   :  { %780 = vmatprep.subr.bf16.mxu0 %v863_v7  ;;  %841 = vmatprep.subr.bf16.mxu1 %v863_v7  ;;  %v876_v32 = vld [vmem:[%s1189_s0 + $0x40] ss:$8 sps:$4 sm:$0xff]   ;;  %v81_v37 = vld [vmem:[%s1188_s2 + $0x78] sm:$0xff]  ;;  %v80_v38 = vld [vmem:[%s1188_s2 + $0x70] sm:$0xff] }
   0xd   :  { %109 = vperm.xlu1 %856, %v71_v14   ;;  %104 = vperm.xlu0 %855, %v70_v15   ;;  %v79_v33 = vld [vmem:[%s1188_s2 + $0x68] sm:$0xff]  ;;  %v78_v34 = vld [vmem:[%s1188_s2 + $0x60] sm:$0xff]  ;;  %v883_v39 = vld [vmem:[%s1189_s0 + $0x10] ss:$8 sps:$4 sm:$0xff]  }
   0xe   :  { %402 = vmatprep.mubr.bf16.mxu1 %v878_v25  ;;  %v884_v40 = vld [vmem:[%s1189_s0 + $0x50] ss:$8 sps:$4 sm:$0xff]   ;;  %v452_v41 = vld [vmem:[%s1190_s3 + $0x8] sm:$0xff]  ;;  %v451_v42 = vld [vmem:[%s1190_s3] sm:$0xff] }
   0xf   :  { %781 = vmatpush3.bf16.msra.mxu0 %v864_v10  ;;  %849 = vmatpush3.bf16.msra.mxu1 %v864_v10  ;;  %v885_v43 = vld [vmem:[%s1189_s0 + $0x24] ss:$8 sps:$4 sm:$0xff]   ;;  %v454_v45 = vld [vmem:[%s1190_s3 + $0x18] sm:$0xff]  ;;  %v453_v46 = vld [vmem:[%s1190_s3 + $0x10] sm:$0xff] }
  0x10   :  { %782 = vmatprep.subr.bf16.mxu0 %v865_v13  ;;  %842 = vmatprep.subr.bf16.mxu1 %v865_v13  ;;  %v887_v44 = vld [vmem:[%s1189_s0 + $0x64] ss:$8 sps:$4 sm:$0xff]   ;;  %v889_v47 = vld [vmem:[%s1189_s0 + $0x20] ss:$8 sps:$4 sm:$0xff]   ;;  %v891_v51 = vld [vmem:[%s1189_s0 + $0x34] ss:$8 sps:$4 sm:$0xff]  }
  0x11   :  { %119 = vperm.xlu1 %856, %v73_v18   ;;  %114 = vperm.xlu0 %855, %v72_v19   ;;  %v890_v48 = vld [vmem:[%s1189_s0 + $0x60] ss:$8 sps:$4 sm:$0xff]   ;;  %v893_v52 = vld [vmem:[%s1189_s0 + $0x74] ss:$8 sps:$4 sm:$0xff]   ;;  %v895_v55 = vld [vmem:[%s1189_s0 + $0x30] ss:$8 sps:$4 sm:$0xff]  }
  0x12   :  { %v456_v49 = vld [vmem:[%s1190_s3 + $0x28] sm:$0xff]  ;;  %v455_v50 = vld [vmem:[%s1190_s3 + $0x20] sm:$0xff]  ;;  %v458_v53 = vld [vmem:[%s1190_s3 + $0x38] sm:$0xff] }
  0x13   :  { %783 = vmatpush3.bf16.msra.mxu0 %v866_v16  ;;  %850 = vmatpush3.bf16.msra.mxu1 %v866_v16  ;;  %v457_v54 = vld [vmem:[%s1190_s3 + $0x30] sm:$0xff]  ;;  %v460_v57 = vld [vmem:[%s1190_s3 + $0x48] sm:$0xff]  ;;  %v459_v58 = vld [vmem:[%s1190_s3 + $0x40] sm:$0xff] }
  0x14   :  { %784 = vmatprep.subr.bf16.mxu0 %v867_v17  ;;  %843 = vmatprep.subr.bf16.mxu1 %v867_v17  ;;  %v896_v56 = vld [vmem:[%s1189_s0 + $0x70] ss:$8 sps:$4 sm:$0xff]   ;;  %v464_v61 = vld [vmem:[%s1190_s3 + $0x68] sm:$0xff]  ;;  %v463_v62 = vld [vmem:[%s1190_s3 + $0x60] sm:$0xff] }
  0x15   :  { %129 = vperm.xlu1 %856, %v75_v23   ;;  %124 = vperm.xlu0 %855, %v74_v24   ;;  %v462_v59 = vld [vmem:[%s1190_s3 + $0x58] sm:$0xff]  ;;  %v461_v60 = vld [vmem:[%s1190_s3 + $0x50] sm:$0xff] }
  0x16   :  { %v466_v63 = vld [vmem:[%s1190_s3 + $0x78] sm:$0xff]  ;;  %v465_v0 = vld [vmem:[%s1190_s3 + $0x70] sm:$0xff] }
  0x17   :  { %785 = vmatpush3.bf16.msra.mxu0 %v868_v20  ;;  %851 = vmatpush3.bf16.msra.mxu1 %v868_v20 }
  0x18   :  { %786 = vmatprep.subr.bf16.mxu0 %v869_v21  ;;  %844 = vmatprep.subr.bf16.mxu1 %v869_v21 }
  0x19   :  { %139 = vperm.xlu1 %856, %v77_v28   ;;  %134 = vperm.xlu0 %855, %v76_v29  }
  0x1b   :  { %787 = vmatpush3.bf16.msra.mxu0 %v870_v26  ;;  %852 = vmatpush3.bf16.msra.mxu1 %v870_v26 }
  0x1c   :  { %788 = vmatprep.subr.bf16.mxu0 %v871_v27  ;;  %845 = vmatprep.subr.bf16.mxu1 %v871_v27 }
  0x1d   :  { %149 = vperm.xlu1 %856, %v79_v33   ;;  %144 = vperm.xlu0 %855, %v78_v34  }
  0x1f   :  { %789 = vmatpush3.bf16.msra.mxu0 %v872_v30  ;;  %853 = vmatpush3.bf16.msra.mxu1 %v872_v30 }
  0x21   :  { %159 = vperm.xlu1 %856, %v81_v37   ;;  %154 = vperm.xlu0 %855, %v80_v38  }
  0x22   :  { %371 = vmatmul.mubr.bf16.vlgmr.msra.gmra.mxu0 %v873_v31  ;;  %403 = vmatmul.mubr.bf16.vlgmr.msra.gmra.mxu1 %v876_v32 }
  0x23   :  { %378 = vmatprep.mubr.bf16.mxu0 %v879_v35  ;;  %410 = vmatprep.mubr.bf16.mxu1 %v881_v36 }
  0x25   :  { %474 = vperm.xlu1 %856, %v452_v41   ;;  %469 = vperm.xlu0 %855, %v451_v42  }
  0x29   :  { %484 = vperm.xlu1 %856, %v454_v45   ;;  %479 = vperm.xlu0 %855, %v453_v46  }
  0x2a   :  { %379 = vmatmul.mubr.bf16.gmra.mxu0 %v883_v39  ;;  %411 = vmatmul.mubr.bf16.gmra.mxu1 %v884_v40 }
  0x2b   :  { %386 = vmatprep.mubr.bf16.mxu0 %v885_v43  ;;  %418 = vmatprep.mubr.bf16.mxu1 %v887_v44 }
  0x2d   :  { %494 = vperm.xlu1 %856, %v456_v49   ;;  %489 = vperm.xlu0 %855, %v455_v50  }
  0x31   :  { %504 = vperm.xlu1 %856, %v458_v53   ;;  %499 = vperm.xlu0 %855, %v457_v54  }
  0x32   :  { %387 = vmatmul.mubr.bf16.gmra.mxu0 %v889_v47  ;;  %419 = vmatmul.mubr.bf16.gmra.mxu1 %v890_v48 }
  0x33   :  { %394 = vmatprep.mubr.bf16.mxu0 %v891_v51  ;;  %426 = vmatprep.mubr.bf16.mxu1 %v893_v52 }
  0x35   :  { %514 = vperm.xlu1 %856, %v460_v57   ;;  %509 = vperm.xlu0 %855, %v459_v58  }
  0x39   :  { %524 = vperm.xlu1 %856, %v462_v59   ;;  %519 = vperm.xlu0 %855, %v461_v60  }
  0x3a   :  { %395 = vmatmul.mubr.bf16.gmra.mxu0 %v895_v55  ;;  %427 = vmatmul.mubr.bf16.gmra.mxu1 %v896_v56 }
  0x3d   :  { %534 = vperm.xlu1 %856, %v464_v61   ;;  %529 = vperm.xlu0 %855, %v463_v62  }
  0x41   :  { %544 = vperm.xlu1 %856, %v466_v63   ;;  %539 = vperm.xlu0 %855, %v465_v0  }
  0x80   :  { %v85_v1 = vpop.permute.xlu0 %84  ;;  %v1115_v2 = vpop.permute.xlu1 %94 }
  0x84   :  { %v90_v3 = vpop.permute.xlu0 %89  ;;  %v1117_v4 = vpop.permute.xlu1 %99 }
  0x88   :  { %v1119_v5 = vpop.permute.xlu0 %104  ;;  %v1121_v6 = vpop.permute.xlu1 %109 }
  0x8c   :  { %v1123_v7 = vpop.permute.xlu0 %114  ;;  %v1125_v8 = vpop.permute.xlu1 %119 }
  0x90   :  { %v125_v9 = vpop.permute.xlu0 %124  ;;  %v130_v10 = vpop.permute.xlu1 %129 }
  0x94   :  { %v135_v11 = vpop.permute.xlu0 %134  ;;  %v1127_v12 = vpop.permute.xlu1 %139 }
  0x98   :  { %v1129_v13 = vpop.permute.xlu0 %144  ;;  %v1131_v14 = vpop.permute.xlu1 %149 }
  0x9c   :  { %v1133_v15 = vpop.permute.xlu0 %154  ;;  %v1135_v16 = vpop.permute.xlu1 %159 }
  0xa0   :  { %v470_v17 = vpop.permute.xlu0 %469  ;;  %v475_v18 = vpop.permute.xlu1 %474 }
  0xa4   :  { %v480_v19 = vpop.permute.xlu0 %479  ;;  %v1137_v20 = vpop.permute.xlu1 %484 }
  0xa8   :  { %v1139_v21 = vpop.permute.xlu0 %489  ;;  %v1141_v22 = vpop.permute.xlu1 %494 }
  0xac   :  { %v1143_v25 = vpop.permute.xlu0 %499  ;;  %v1145_v32 = vpop.permute.xlu1 %504 }
  0xb0   :  { %v510_v37 = vpop.permute.xlu0 %509  ;;  %v515_v48 = vpop.permute.xlu1 %514 }
  0xe2   :  { %v790_v23 = vpop.f32.mrf.mxu0  ;;  %v814_v24 = vpop.f32.mrf.mxu1 }
  0xe4   :  { %v791_v26 = vpop.f32.mrf.mxu0  ;;  %v815_v27 = vpop.f32.mrf.mxu1 }
  0xe5   :  { %v792_v28 = vadd.f32 %v791_v26, %v790_v23  ;;  %v816_v29 = vadd.f32 %v815_v27, %v814_v24  ;;  %v525_v27 = vpop.permute.xlu1 %524 }
  0xe6   :  { %v793_v30 = vpop.f32.mrf.mxu0  ;;  %v817_v31 = vpop.f32.mrf.mxu1 }
  0xe7   :  { %v373_v33 = vadd.f32 %v792_v28, %v85_v1  ;;  %v405_v34 = vadd.f32 %v816_v29, %v125_v9 }
  0xe8   :  { %v794_v35 = vpop.f32.mrf.mxu0  ;;  %v818_v36 = vpop.f32.mrf.mxu1 }
  0xe9   :  { %v795_v38 = vadd.f32 %v794_v35, %v793_v30  ;;  %v819_v39 = vadd.f32 %v818_v36, %v817_v31  ;;  %v547_v42 = vmul.f32 %v470_v17, %v373_v33  ;;  %v555_v43 = vmul.f32 %v510_v37, %v405_v34  ;;  %v520_v17 = vpop.permute.xlu0 %519 }
  0xea   :  { %v796_v40 = vpop.f32.mrf.mxu0  ;;  %v820_v41 = vpop.f32.mrf.mxu1  ;;  %vm435_vm0 = vcmp.gt.f32.partialorder %v373_v33, 0.0  ;;  %vm443_vm1 = vcmp.gt.f32.partialorder %v405_v34, 0.0 }
  0xeb   :  { %v376_v44 = vadd.f32 %v795_v38, %v90_v3  ;;  %v408_v45 = vadd.f32 %v819_v39, %v130_v10  ;;  %v563_v55 = vsel %vm435_vm0, %v373_v33, %v547_v42  ;;  %v571_v56 = vsel %vm443_vm1, %v405_v34, %v555_v43 }
  0xec   :  { %v797_v46 = vpop.f32.mrf.mxu0  ;;  %v821_v47 = vpop.f32.mrf.mxu1 }
  0xed   :  { %v798_v49 = vadd.f32 %v797_v46, %v796_v40  ;;  %v822_v50 = vadd.f32 %v821_v47, %v820_v41  ;;  %vm436_vm2 = vcmp.gt.f32.partialorder %v376_v44, 0.0  ;;  %v548_v51 = vmul.f32 %v475_v18, %v376_v44  ;;  %v530_v40 = vpop.permute.xlu0 %529 }
  0xee   :  { %vm444_vm3 = vcmp.gt.f32.partialorder %v408_v45, 0.0  ;;  %v556_v52 = vmul.f32 %v515_v48, %v408_v45  ;;  %v799_v53 = vpop.f32.mrf.mxu0  ;;  %v823_v54 = vpop.f32.mrf.mxu1 }
  0xef   :  { %v564_v57 = vsel %vm436_vm2, %v376_v44, %v548_v51  ;;  %v381_v59 = vadd.f32 %v798_v49, %v1115_v2  ;;  %v413_v60 = vadd.f32 %v822_v50, %v135_v11  ;;  %v535_v50 = vpop.permute.xlu1 %534 }
  0xf0   :  { %v572_v58 = vsel %vm444_vm3, %v408_v45, %v556_v52  ;;  %v800_v61 = vpop.f32.mrf.mxu0  ;;  %v824_v62 = vpop.f32.mrf.mxu1  ;;  %v730_v63 = vpack.c.bf16 %v564_v57, %v563_v55 }
  0xf1   :  { %v750_v0 = vpack.c.bf16 %v572_v58, %v571_v56  ;;  %v801_v1 = vadd.f32 %v800_v61, %v799_v53  ;;  %v825_v3 = vadd.f32 %v824_v62, %v823_v54  ;;  %v549_v18 = vmul.f32 %v480_v19, %v381_v59 }
  0xf2   :  { %v802_v9 = vpop.f32.mrf.mxu0  ;;  %v826_v10 = vpop.f32.mrf.mxu1  ;;  %731 = vst [vmem:[%s1191_s4] sm:$0xff] %v730_v63   ;;  %v557_v2 = vmul.f32 %v520_v17, %v413_v60  ;;  %vm437_vm4 = vcmp.gt.f32.partialorder %v381_v59, 0.0  ;;  %vm445_vm5 = vcmp.gt.f32.partialorder %v413_v60, 0.0 }
  0xf3   :  { %770 = vst [vmem:[%s1191_s4 + $0x20] sm:$0xff] %v750_v0   ;;  %v384_v11 = vadd.f32 %v801_v1, %v1117_v4  ;;  %v416_v23 = vadd.f32 %v825_v3, %v1127_v12  ;;  %v565_v35 = vsel %vm437_vm4, %v381_v59, %v549_v18  ;;  %v540_v3 = vpop.permute.xlu0 %539 }
  0xf4   :  { %v803_v24 = vpop.f32.mrf.mxu0  ;;  %v827_v26 = vpop.f32.mrf.mxu1  ;;  %v573_v12 = vsel %vm445_vm5, %v413_v60, %v557_v2 }
  0xf5   :  { %v804_v28 = vadd.f32 %v803_v24, %v802_v9  ;;  %v828_v29 = vadd.f32 %v827_v26, %v826_v10  ;;  %vm438_vm6 = vcmp.gt.f32.partialorder %v384_v11, 0.0  ;;  %v550_v30 = vmul.f32 %v1137_v20, %v384_v11  ;;  %v545_v10 = vpop.permute.xlu1 %544 }
  0xf6   :  { %vm446_vm7 = vcmp.gt.f32.partialorder %v416_v23, 0.0  ;;  %v558_v31 = vmul.f32 %v525_v27, %v416_v23  ;;  %v805_v33 = vpop.f32.mrf.mxu0  ;;  %v829_v34 = vpop.f32.mrf.mxu1 }
  0xf7   :  { %v389_v19 = vadd.f32 %v804_v28, %v1119_v5  ;;  %v421_v4 = vadd.f32 %v828_v29, %v1129_v13  ;;  %v566_v36 = vsel %vm438_vm6, %v384_v11, %v550_v30 }
  0xf8   :  { %v574_v37 = vsel %vm446_vm7, %v416_v23, %v558_v31  ;;  %v806_v38 = vpop.f32.mrf.mxu0  ;;  %v830_v39 = vpop.f32.mrf.mxu1  ;;  %v735_v41 = vpack.c.bf16 %v566_v36, %v565_v35 }
  0xf9   :  { %v755_v42 = vpack.c.bf16 %v574_v37, %v573_v12  ;;  %v807_v43 = vadd.f32 %v806_v38, %v805_v33  ;;  %v831_v44 = vadd.f32 %v830_v39, %v829_v34  ;;  %v551_v5 = vmul.f32 %v1139_v21, %v389_v19 }
  0xfa   :  { %v808_v20 = vpop.f32.mrf.mxu0  ;;  %v832_v45 = vpop.f32.mrf.mxu1  ;;  %767 = vst [vmem:[%s1191_s4 + $0x8] sm:$0xff] %v735_v41   ;;  %v559_v13 = vmul.f32 %v530_v40, %v421_v4  ;;  %vm439_vm8 = vcmp.gt.f32.partialorder %v389_v19, 0.0  ;;  %vm447_vm9 = vcmp.gt.f32.partialorder %v421_v4, 0.0 }
  0xfb   :  { %771 = vst [vmem:[%s1191_s4 + $0x28] sm:$0xff] %v755_v42   ;;  %v392_v46 = vadd.f32 %v807_v43, %v1121_v6  ;;  %v424_v47 = vadd.f32 %v831_v44, %v1131_v14  ;;  %v567_v21 = vsel %vm439_vm8, %v389_v19, %v551_v5 }
  0xfc   :  { %v809_v48 = vpop.f32.mrf.mxu0  ;;  %v833_v49 = vpop.f32.mrf.mxu1  ;;  %v575_v57 = vsel %vm447_vm9, %v421_v4, %v559_v13 }
  0xfd   :  { %v810_v51 = vadd.f32 %v809_v48, %v808_v20  ;;  %v834_v52 = vadd.f32 %v833_v49, %v832_v45  ;;  %vm440_vm10 = vcmp.gt.f32.partialorder %v392_v46, 0.0  ;;  %v552_v53 = vmul.f32 %v1141_v22, %v392_v46 }
  0xfe   :  { %vm448_vm11 = vcmp.gt.f32.partialorder %v424_v47, 0.0  ;;  %v560_v54 = vmul.f32 %v535_v50, %v424_v47  ;;  %v811_v55 = vpop.f32.mrf.mxu0  ;;  %v835_v56 = vpop.f32.mrf.mxu1 }
  0xff   :  { %v568_v58 = vsel %vm440_vm10, %v392_v46, %v552_v53  ;;  %v397_v6 = vadd.f32 %v810_v51, %v1123_v7  ;;  %v429_v14 = vadd.f32 %v834_v52, %v1133_v15 }
 0x100   :  { %v576_v59 = vsel %vm448_vm11, %v424_v47, %v560_v54  ;;  %v812_v60 = vpop.f32.mrf.mxu0  ;;  %v836_v61 = vpop.f32.mrf.mxu1  ;;  %v740_v62 = vpack.c.bf16 %v568_v58, %v567_v21 }
 0x101   :  { %v760_v63 = vpack.c.bf16 %v576_v59, %v575_v57  ;;  %v813_v0 = vadd.f32 %v812_v60, %v811_v55  ;;  %v837_v1 = vadd.f32 %v836_v61, %v835_v56  ;;  %v553_v22 = vmul.f32 %v1143_v25, %v397_v6 }
 0x102   :  { %768 = vst [vmem:[%s1191_s4 + $0x10] sm:$0xff] %v740_v62   ;;  %v561_v7 = vmul.f32 %v540_v3, %v429_v14  ;;  %vm441_vm12 = vcmp.gt.f32.partialorder %v397_v6, 0.0  ;;  %vm449_vm13 = vcmp.gt.f32.partialorder %v429_v14, 0.0 }
 0x103   :  { %772 = vst [vmem:[%s1191_s4 + $0x30] sm:$0xff] %v760_v63   ;;  %v400_v15 = vadd.f32 %v813_v0, %v1125_v8  ;;  %v432_v9 = vadd.f32 %v837_v1, %v1135_v16  ;;  %v569_v2 = vsel %vm441_vm12, %v397_v6, %v553_v22 }
 0x104   :  { %v577_v11 = vsel %vm449_vm13, %v429_v14, %v561_v7 }
 0x105   :  { %vm442_vm14 = vcmp.gt.f32.partialorder %v400_v15, 0.0  ;;  %v554_v17 = vmul.f32 %v1145_v32, %v400_v15  ;;  %vm450_vm15 = vcmp.gt.f32.partialorder %v432_v9, 0.0  ;;  %v562_v18 = vmul.f32 %v545_v10, %v432_v9 }
 0x107   :  { %v570_v23 = vsel %vm442_vm14, %v400_v15, %v554_v17  ;;  %v578_v24 = vsel %vm450_vm15, %v432_v9, %v562_v18 }
 0x108   :  { %v745_v26 = vpack.c.bf16 %v570_v23, %v569_v2  ;;  %v765_v27 = vpack.c.bf16 %v578_v24, %v577_v11 }
 0x10a   :  { %769 = vst [vmem:[%s1191_s4 + $0x18] sm:$0xff] %v745_v26   ;;  %773 = vst [vmem:[%s1191_s4 + $0x38] sm:$0xff] %v765_v27  }

// kernel: onet_forward.9
= control target key start
LH: loop header
LB: loop body
LE: loop exit
PB: predicated region body
PF: predicated region fallthrough
CT: control target
= control target key end

     0   :  { %vm1378_vm5 = vcmask 130048   ;;  %s2425_s1 = inlined_call_operand.vmem [shape: bf16[1152,256], index: 1, kind: input, shape index: {}]   ;;  %s2426_s0 = inlined_call_operand.vmem [shape: bf16[16,1152], index: 0, kind: input, shape index: {}]   ;;  %s2427_s4 = inlined_call_operand.vmem [shape: bf16[256,16], index: 4, kind: input, shape index: {}]   ;;  %s2428_s2 = inlined_call_operand.vmem [shape: f32[1,256], index: 2, kind: input, shape index: {}]   ;;  %s2429_s3 = inlined_call_operand.vmem [shape: f32[1,256], index: 3, kind: input, shape index: {}]   ;;  %s2430_s5 = inlined_call_operand.vmem [shape: f32[1,16], index: 5, kind: input, shape index: {}]   ;;  %s2431_s6 = inlined_call_operand.vmem [shape: f32[16,16], index: 6, kind: output, shape index: {}]  }
   0x1   :  { %v1602_v0 = vld [vmem:[%s2425_s1 + $0x74] ss:$8 sps:$4 sm:$0xff]   ;;  %v1604_v1 = vld [vmem:[%s2425_s1 + $0x70] ss:$8 sps:$4 sm:$0xff]   ;;  %v1608_v4 = vld [vmem:[%s2425_s1 + $0x64] ss:$8 sps:$4 sm:$0xff]  }
   0x2   :  { %956 = vmatprep.subr.bf16.mxu0 %v1602_v0  ;;  %v1605_v2 = vld [vmem:[%s2425_s1 + $0x174] ss:$8 sps:$4 sm:$0xff]   ;;  %v1607_v3 = vld [vmem:[%s2425_s1 + $0x170] ss:$8 sps:$4 sm:$0xff]   ;;  %v1610_v5 = vld [vmem:[%s2425_s1 + $0x60] ss:$8 sps:$4 sm:$0xff]  }
   0x3   :  { %957 = vmatpush1.bf16.msra.mxu0 %v1604_v1  ;;  %999 = vmatprep.subr.bf16.mxu1 %v1605_v2  ;;  %v1611_v6 = vld [vmem:[%s2425_s1 + $0x164] ss:$8 sps:$4 sm:$0xff]   ;;  %v1613_v7 = vld [vmem:[%s2425_s1 + $0x160] ss:$8 sps:$4 sm:$0xff]   ;;  %v1614_v8 = vld [vmem:[%s2425_s1 + $0x54] ss:$8 sps:$4 sm:$0xff]  }
   0x4   :  { %1000 = vmatpush1.bf16.msra.mxu1 %v1607_v3  ;;  %958 = vmatprep.subr.bf16.mxu0 %v1608_v4  ;;  %v1616_v9 = vld [vmem:[%s2425_s1 + $0x50] ss:$8 sps:$4 sm:$0xff]   ;;  %v1617_v10 = vld [vmem:[%s2425_s1 + $0x154] ss:$8 sps:$4 sm:$0xff]   ;;  %v1620_v11 = vld [vmem:[%s2425_s1 + $0x44] ss:$8 sps:$4 sm:$0xff]  }
   0x5   :  { %1001 = vmatprep.subr.bf16.mxu1 %v1611_v6  ;;  %v1619_v12 = vld [vmem:[%s2425_s1 + $0x150] ss:$8 sps:$4 sm:$0xff]   ;;  %v1623_v13 = vld [vmem:[%s2425_s1 + $0x144] ss:$8 sps:$4 sm:$0xff]   ;;  %v1622_v14 = vld [vmem:[%s2425_s1 + $0x40] ss:$8 sps:$4 sm:$0xff]  }
   0x6   :  { %v1626_v15 = vld [vmem:[%s2425_s1 + $0x34] ss:$8 sps:$4 sm:$0xff]   ;;  %v1625_v16 = vld [vmem:[%s2425_s1 + $0x140] ss:$8 sps:$4 sm:$0xff]   ;;  %v1628_v18 = vld [vmem:[%s2425_s1 + $0x30] ss:$8 sps:$4 sm:$0xff]  }
   0x7   :  { %959 = vmatpush1.bf16.msra.mxu0 %v1610_v5  ;;  %v1629_v17 = vld [vmem:[%s2425_s1 + $0x134] ss:$8 sps:$4 sm:$0xff]   ;;  %v1632_v19 = vld [vmem:[%s2425_s1 + $0x24] ss:$8 sps:$4 sm:$0xff]   ;;  %v1631_v20 = vld [vmem:[%s2425_s1 + $0x130] ss:$8 sps:$4 sm:$0xff]  }
   0x8   :  { %960 = vmatprep.subr.bf16.mxu0 %v1614_v8  ;;  %1002 = vmatpush1.bf16.msra.mxu1 %v1613_v7  ;;  %v1635_v21 = vld [vmem:[%s2425_s1 + $0x124] ss:$8 sps:$4 sm:$0xff]   ;;  %v1634_v22 = vld [vmem:[%s2425_s1 + $0x20] ss:$8 sps:$4 sm:$0xff]   ;;  %v1638_v23 = vld [vmem:[%s2425_s1 + $0x14] ss:$8 sps:$4 sm:$0xff]  }
   0x9   :  { %1003 = vmatprep.subr.bf16.mxu1 %v1617_v10  ;;  %v1637_v24 = vld [vmem:[%s2425_s1 + $0x120] ss:$8 sps:$4 sm:$0xff]   ;;  %v1641_v25 = vld [vmem:[%s2425_s1 + $0x114] ss:$8 sps:$4 sm:$0xff]   ;;  %v1640_v26 = vld [vmem:[%s2425_s1 + $0x10] ss:$8 sps:$4 sm:$0xff]  }
   0xa   :  { %v1644_v27 = vld [vmem:[%s2425_s1 + $0x4] ss:$8 sps:$4 sm:$0xff]   ;;  %v1643_v28 = vld [vmem:[%s2425_s1 + $0x110] ss:$8 sps:$4 sm:$0xff]   ;;  %v1646_v30 = vld [vmem:[%s2425_s1] ss:$8 sps:$4 sm:$0xff]  }
   0xb   :  { %961 = vmatpush1.bf16.msra.mxu0 %v1616_v9  ;;  %v1647_v29 = vld [vmem:[%s2425_s1 + $0x104] ss:$8 sps:$4 sm:$0xff]   ;;  %v1650_v31 = vld [vmem:[%s2425_s1 + $0xf4] ss:$8 sps:$4 sm:$0xff]   ;;  %v1649_v32 = vld [vmem:[%s2425_s1 + $0x100] ss:$8 sps:$4 sm:$0xff]  }
   0xc   :  { %962 = vmatprep.subr.bf16.mxu0 %v1620_v11  ;;  %1004 = vmatpush1.bf16.msra.mxu1 %v1619_v12  ;;  %v1653_v33 = vld [vmem:[%s2425_s1 + $0x1f4] ss:$8 sps:$4 sm:$0xff]   ;;  %v1652_v34 = vld [vmem:[%s2425_s1 + $0xf0] ss:$8 sps:$4 sm:$0xff]   ;;  %v1656_v35 = vld [vmem:[%s2425_s1 + $0xe4] ss:$8 sps:$4 sm:$0xff]  }
   0xd   :  { %1005 = vmatprep.subr.bf16.mxu1 %v1623_v13  ;;  %v1655_v36 = vld [vmem:[%s2425_s1 + $0x1f0] ss:$8 sps:$4 sm:$0xff]   ;;  %v1659_v37 = vld [vmem:[%s2425_s1 + $0x1e4] ss:$8 sps:$4 sm:$0xff]   ;;  %v1658_v38 = vld [vmem:[%s2425_s1 + $0xe0] ss:$8 sps:$4 sm:$0xff]  }
   0xe   :  { %v1662_v39 = vld [vmem:[%s2425_s1 + $0xd4] ss:$8 sps:$4 sm:$0xff]   ;;  %v1661_v40 = vld [vmem:[%s2425_s1 + $0x1e0] ss:$8 sps:$4 sm:$0xff]   ;;  %v1664_v42 = vld [vmem:[%s2425_s1 + $0xd0] ss:$8 sps:$4 sm:$0xff]  }
   0xf   :  { %963 = vmatpush1.bf16.msra.mxu0 %v1622_v14  ;;  %v1665_v41 = vld [vmem:[%s2425_s1 + $0x1d4] ss:$8 sps:$4 sm:$0xff]   ;;  %v1668_v43 = vld [vmem:[%s2425_s1 + $0xc4] ss:$8 sps:$4 sm:$0xff]   ;;  %v1667_v44 = vld [vmem:[%s2425_s1 + $0x1d0] ss:$8 sps:$4 sm:$0xff]  }
  0x10   :  { %964 = vmatprep.subr.bf16.mxu0 %v1626_v15  ;;  %1006 = vmatpush1.bf16.msra.mxu1 %v1625_v16  ;;  %v1671_v45 = vld [vmem:[%s2425_s1 + $0x1c4] ss:$8 sps:$4 sm:$0xff]   ;;  %v1670_v46 = vld [vmem:[%s2425_s1 + $0xc0] ss:$8 sps:$4 sm:$0xff]   ;;  %v1674_v48 = vld [vmem:[%s2425_s1 + $0xb4] ss:$8 sps:$4 sm:$0xff]  }
  0x11   :  { %1007 = vmatprep.subr.bf16.mxu1 %v1629_v17  ;;  %v1699_v47 = vld [vmem:[%s2426_s0 + $0x4] ss:$36 sps:$4 sm:$0xff]   ;;  %v1677_v50 = vld [vmem:[%s2425_s1 + $0x1b4] ss:$8 sps:$4 sm:$0xff]   ;;  %v1706_v51 = vld [vmem:[%s2426_s0 + $0xc] ss:$36 sps:$4 sm:$0xff]  }
  0x12   :  { %v1673_v49 = vld [vmem:[%s2425_s1 + $0x1c0] ss:$8 sps:$4 sm:$0xff]   ;;  %988 = vmatprep.mubr.bf16.mxu0 %v1699_v47  ;;  %v1676_v52 = vld [vmem:[%s2425_s1 + $0xb0] ss:$8 sps:$4 sm:$0xff]   ;;  %v1680_v53 = vld [vmem:[%s2425_s1 + $0xa4] ss:$8 sps:$4 sm:$0xff]   ;;  %1031 = vmatprep.mubr.bf16.mxu1 %v1706_v51 }
  0x13   :  { %965 = vmatpush1.bf16.msra.mxu0 %v1628_v18  ;;  %v1679_v54 = vld [vmem:[%s2425_s1 + $0x1b0] ss:$8 sps:$4 sm:$0xff]   ;;  %v1683_v55 = vld [vmem:[%s2425_s1 + $0x1a4] ss:$8 sps:$4 sm:$0xff]   ;;  %v1682_v56 = vld [vmem:[%s2425_s1 + $0xa0] ss:$8 sps:$4 sm:$0xff]  }
  0x14   :  { %966 = vmatprep.subr.bf16.mxu0 %v1632_v19  ;;  %1008 = vmatpush1.bf16.msra.mxu1 %v1631_v20  ;;  %v1686_v57 = vld [vmem:[%s2425_s1 + $0x94] ss:$8 sps:$4 sm:$0xff]   ;;  %v1685_v58 = vld [vmem:[%s2425_s1 + $0x1a0] ss:$8 sps:$4 sm:$0xff]   ;;  %v1688_v60 = vld [vmem:[%s2425_s1 + $0x90] ss:$8 sps:$4 sm:$0xff]  }
  0x15   :  { %1009 = vmatprep.subr.bf16.mxu1 %v1635_v21  ;;  %v1689_v59 = vld [vmem:[%s2425_s1 + $0x194] ss:$8 sps:$4 sm:$0xff]   ;;  %v1692_v61 = vld [vmem:[%s2425_s1 + $0x84] ss:$8 sps:$4 sm:$0xff]   ;;  %v1691_v62 = vld [vmem:[%s2425_s1 + $0x190] ss:$8 sps:$4 sm:$0xff]  }
  0x16   :  { %v1695_v63 = vld [vmem:[%s2425_s1 + $0x184] ss:$8 sps:$4 sm:$0xff]   ;;  %v1694_v0 = vld [vmem:[%s2425_s1 + $0x80] ss:$8 sps:$4 sm:$0xff]   ;;  %v1703_v1 = vld [vmem:[%s2425_s1 + $0x274] ss:$8 sps:$4 sm:$0xff]  }
  0x17   :  { %967 = vmatpush1.bf16.msra.mxu0 %v1634_v22  ;;  %v1700_v2 = vld [vmem:[%s2425_s1 + $0x180] ss:$8 sps:$4 sm:$0xff]   ;;  %v1709_v4 = vld [vmem:[%s2425_s1 + $0x374] ss:$8 sps:$4 sm:$0xff]   ;;  %v1701_v5 = vld [vmem:[%s2425_s1 + $0x270] ss:$8 sps:$4 sm:$0xff]  }
  0x18   :  { %968 = vmatprep.subr.bf16.mxu0 %v1638_v23  ;;  %1010 = vmatpush1.bf16.msra.mxu1 %v1637_v24  ;;  %v1697_v3 = vld [vmem:[%s2426_s0] ss:$36 sps:$4 sm:$0xff]   ;;  %v1704_v6 = vld [vmem:[%s2426_s0 + $0x8] ss:$36 sps:$4 sm:$0xff]   ;;  %v1707_v8 = vld [vmem:[%s2425_s1 + $0x370] ss:$8 sps:$4 sm:$0xff]  }
  0x19   :  { %1011 = vmatprep.subr.bf16.mxu1 %v1641_v25  ;;  %v1712_v7 = vld [vmem:[%s2425_s1 + $0x264] ss:$8 sps:$4 sm:$0xff]   ;;  %v1710_v10 = vld [vmem:[%s2425_s1 + $0x260] ss:$8 sps:$4 sm:$0xff]   ;;  %v1718_v11 = vld [vmem:[%s2425_s1 + $0x254] ss:$8 sps:$4 sm:$0xff]  }
  0x1a   :  { %v1715_v9 = vld [vmem:[%s2425_s1 + $0x364] ss:$8 sps:$4 sm:$0xff]   ;;  %v1713_v12 = vld [vmem:[%s2425_s1 + $0x360] ss:$8 sps:$4 sm:$0xff]   ;;  %v1721_v13 = vld [vmem:[%s2425_s1 + $0x354] ss:$8 sps:$4 sm:$0xff]  }
  0x1b   :  { %969 = vmatpush1.bf16.msra.mxu0 %v1640_v26  ;;  %v1716_v14 = vld [vmem:[%s2425_s1 + $0x250] ss:$8 sps:$4 sm:$0xff]   ;;  %v1724_v15 = vld [vmem:[%s2425_s1 + $0x244] ss:$8 sps:$4 sm:$0xff]   ;;  %v1722_v18 = vld [vmem:[%s2425_s1 + $0x240] ss:$8 sps:$4 sm:$0xff]  }
  0x1c   :  { %970 = vmatprep.subr.bf16.mxu0 %v1644_v27  ;;  %1012 = vmatpush1.bf16.msra.mxu1 %v1643_v28  ;;  %v1719_v16 = vld [vmem:[%s2425_s1 + $0x350] ss:$8 sps:$4 sm:$0xff]   ;;  %v1727_v17 = vld [vmem:[%s2425_s1 + $0x344] ss:$8 sps:$4 sm:$0xff]   ;;  %v1730_v19 = vld [vmem:[%s2425_s1 + $0x234] ss:$8 sps:$4 sm:$0xff]  }
  0x1d   :  { %1013 = vmatprep.subr.bf16.mxu1 %v1647_v29  ;;  %v1725_v20 = vld [vmem:[%s2425_s1 + $0x340] ss:$8 sps:$4 sm:$0xff]   ;;  %v1733_v21 = vld [vmem:[%s2425_s1 + $0x334] ss:$8 sps:$4 sm:$0xff]   ;;  %v1728_v22 = vld [vmem:[%s2425_s1 + $0x230] ss:$8 sps:$4 sm:$0xff]  }
  0x1e   :  { %v1736_v23 = vld [vmem:[%s2425_s1 + $0x224] ss:$8 sps:$4 sm:$0xff]   ;;  %v1731_v24 = vld [vmem:[%s2425_s1 + $0x330] ss:$8 sps:$4 sm:$0xff]   ;;  %v1734_v26 = vld [vmem:[%s2425_s1 + $0x220] ss:$8 sps:$4 sm:$0xff]  }
  0x1f   :  { %971 = vmatpush1.bf16.msra.mxu0 %v1646_v30  ;;  %v1739_v25 = vld [vmem:[%s2425_s1 + $0x324] ss:$8 sps:$4 sm:$0xff]   ;;  %v1742_v27 = vld [vmem:[%s2425_s1 + $0x214] ss:$8 sps:$4 sm:$0xff]   ;;  %v1737_v28 = vld [vmem:[%s2425_s1 + $0x320] ss:$8 sps:$4 sm:$0xff]  }
  0x20   :  { %972 = vmatprep.subr.bf16.mxu0 %v1650_v31  ;;  %1014 = vmatpush1.bf16.msra.mxu1 %v1649_v32  ;;  %v1745_v29 = vld [vmem:[%s2425_s1 + $0x314] ss:$8 sps:$4 sm:$0xff]   ;;  %v1740_v30 = vld [vmem:[%s2425_s1 + $0x210] ss:$8 sps:$4 sm:$0xff]   ;;  %v1748_v32 = vld [vmem:[%s2425_s1 + $0x204] ss:$8 sps:$4 sm:$0xff]  }
  0x21   :  { %1015 = vmatprep.subr.bf16.mxu1 %v1653_v33  ;;  %v1743_v31 = vld [vmem:[%s2425_s1 + $0x310] ss:$8 sps:$4 sm:$0xff]   ;;  %v1769_v47 = vld [vmem:[%s2425_s1 + $0x3d4] ss:$8 sps:$4 sm:$0xff]   ;;  %v1775_v51 = vld [vmem:[%s2425_s1 + $0x3c4] ss:$8 sps:$4 sm:$0xff]  }
  0x22   :  { %v1802_v33 = vld [vmem:[%s2426_s0 + $0x14] ss:$36 sps:$4 sm:$0xff]  }
  0x23   :  { %973 = vmatpush2.bf16.msra.mxu0 %v1652_v34  ;;  %v1751_v34 = vld [vmem:[%s2425_s1 + $0x304] ss:$8 sps:$4 sm:$0xff]  }
  0x24   :  { %974 = vmatprep.subr.bf16.mxu0 %v1656_v35  ;;  %1016 = vmatpush2.bf16.msra.mxu1 %v1655_v36  ;;  %v1746_v35 = vld [vmem:[%s2425_s1 + $0x200] ss:$8 sps:$4 sm:$0xff]  }
  0x25   :  { %1017 = vmatprep.subr.bf16.mxu1 %v1659_v37  ;;  %v1808_v36 = vld [vmem:[%s2426_s0 + $0x1c] ss:$36 sps:$4 sm:$0xff]  }
  0x26   :  { %v1754_v37 = vld [vmem:[%s2425_s1 + $0x2f4] ss:$8 sps:$4 sm:$0xff]  }
  0x27   :  { %975 = vmatpush2.bf16.msra.mxu0 %v1658_v38  ;;  %v1749_v38 = vld [vmem:[%s2425_s1 + $0x300] ss:$8 sps:$4 sm:$0xff]  }
  0x28   :  { %976 = vmatprep.subr.bf16.mxu0 %v1662_v39  ;;  %1018 = vmatpush2.bf16.msra.mxu1 %v1661_v40  ;;  %v1757_v39 = vld [vmem:[%s2425_s1 + $0x3f4] ss:$8 sps:$4 sm:$0xff]   ;;  %v1752_v40 = vld [vmem:[%s2425_s1 + $0x2f0] ss:$8 sps:$4 sm:$0xff]  }
  0x29   :  { %1019 = vmatprep.subr.bf16.mxu1 %v1665_v41  ;;  %v1760_v41 = vld [vmem:[%s2425_s1 + $0x2e4] ss:$8 sps:$4 sm:$0xff]  }
  0x2b   :  { %977 = vmatpush2.bf16.msra.mxu0 %v1664_v42  ;;  %v1755_v42 = vld [vmem:[%s2425_s1 + $0x3f0] ss:$8 sps:$4 sm:$0xff]  }
  0x2c   :  { %978 = vmatprep.subr.bf16.mxu0 %v1668_v43  ;;  %1020 = vmatpush2.bf16.msra.mxu1 %v1667_v44  ;;  %v1763_v43 = vld [vmem:[%s2425_s1 + $0x3e4] ss:$8 sps:$4 sm:$0xff]   ;;  %v1758_v44 = vld [vmem:[%s2425_s1 + $0x2e0] ss:$8 sps:$4 sm:$0xff]  }
  0x2d   :  { %1021 = vmatprep.subr.bf16.mxu1 %v1671_v45  ;;  %v1766_v45 = vld [vmem:[%s2425_s1 + $0x2d4] ss:$8 sps:$4 sm:$0xff]  }
  0x2f   :  { %979 = vmatpush2.bf16.msra.mxu0 %v1670_v46  ;;  %v1761_v46 = vld [vmem:[%s2425_s1 + $0x3e0] ss:$8 sps:$4 sm:$0xff]  }
  0x30   :  { %980 = vmatprep.subr.bf16.mxu0 %v1674_v48  ;;  %1022 = vmatpush2.bf16.msra.mxu1 %v1673_v49  ;;  %v1764_v48 = vld [vmem:[%s2425_s1 + $0x2d0] ss:$8 sps:$4 sm:$0xff]   ;;  %v1772_v49 = vld [vmem:[%s2425_s1 + $0x2c4] ss:$8 sps:$4 sm:$0xff]  }
  0x31   :  { %1023 = vmatprep.subr.bf16.mxu1 %v1677_v50  ;;  %v1767_v50 = vld [vmem:[%s2425_s1 + $0x3d0] ss:$8 sps:$4 sm:$0xff]  }
  0x33   :  { %981 = vmatpush2.bf16.msra.mxu0 %v1676_v52  ;;  %v1770_v52 = vld [vmem:[%s2425_s1 + $0x2c0] ss:$8 sps:$4 sm:$0xff]  }
  0x34   :  { %982 = vmatprep.subr.bf16.mxu0 %v1680_v53  ;;  %1024 = vmatpush2.bf16.msra.mxu1 %v1679_v54  ;;  %v1778_v53 = vld [vmem:[%s2425_s1 + $0x2b4] ss:$8 sps:$4 sm:$0xff]   ;;  %v1773_v54 = vld [vmem:[%s2425_s1 + $0x3c0] ss:$8 sps:$4 sm:$0xff]  }
  0x35   :  { %1025 = vmatprep.subr.bf16.mxu1 %v1683_v55  ;;  %v1781_v55 = vld [vmem:[%s2425_s1 + $0x3b4] ss:$8 sps:$4 sm:$0xff]  }
  0x37   :  { %983 = vmatpush2.bf16.msra.mxu0 %v1682_v56  ;;  %v1776_v56 = vld [vmem:[%s2425_s1 + $0x2b0] ss:$8 sps:$4 sm:$0xff]  }
  0x38   :  { %984 = vmatprep.subr.bf16.mxu0 %v1686_v57  ;;  %1026 = vmatpush2.bf16.msra.mxu1 %v1685_v58  ;;  %v1784_v57 = vld [vmem:[%s2425_s1 + $0x2a4] ss:$8 sps:$4 sm:$0xff]   ;;  %v1779_v58 = vld [vmem:[%s2425_s1 + $0x3b0] ss:$8 sps:$4 sm:$0xff]  }
  0x39   :  { %1027 = vmatprep.subr.bf16.mxu1 %v1689_v59  ;;  %v1787_v59 = vld [vmem:[%s2425_s1 + $0x3a4] ss:$8 sps:$4 sm:$0xff]  }
  0x3b   :  { %985 = vmatpush2.bf16.msra.mxu0 %v1688_v60  ;;  %v1782_v60 = vld [vmem:[%s2425_s1 + $0x2a0] ss:$8 sps:$4 sm:$0xff]  }
  0x3c   :  { %986 = vmatprep.subr.bf16.mxu0 %v1692_v61  ;;  %1028 = vmatpush2.bf16.msra.mxu1 %v1691_v62  ;;  %v1790_v61 = vld [vmem:[%s2425_s1 + $0x294] ss:$8 sps:$4 sm:$0xff]   ;;  %v1785_v62 = vld [vmem:[%s2425_s1 + $0x3a0] ss:$8 sps:$4 sm:$0xff]  }
  0x3d   :  { %1029 = vmatprep.subr.bf16.mxu1 %v1695_v63  ;;  %v1793_v63 = vld [vmem:[%s2425_s1 + $0x394] ss:$8 sps:$4 sm:$0xff]  }
  0x3f   :  { %987 = vmatpush2.bf16.msra.mxu0 %v1694_v0  ;;  %v1788_v0 = vld [vmem:[%s2425_s1 + $0x290] ss:$8 sps:$4 sm:$0xff]  }
  0x40   :  { %1042 = vmatprep.subr.bf16.mxu0 %v1703_v1  ;;  %1030 = vmatpush2.bf16.msra.mxu1 %v1700_v2  ;;  %v1796_v1 = vld [vmem:[%s2425_s1 + $0x284] ss:$8 sps:$4 sm:$0xff]   ;;  %v1791_v2 = vld [vmem:[%s2425_s1 + $0x390] ss:$8 sps:$4 sm:$0xff]  }
  0x41   :  { %1085 = vmatprep.subr.bf16.mxu1 %v1709_v4  ;;  %v1794_v4 = vld [vmem:[%s2425_s1 + $0x280] ss:$8 sps:$4 sm:$0xff]  }
  0x42   :  { %989 = vmatmul.mubr.bf16.vlgmr.msra.gmra.mxu0 %v1697_v3  ;;  %v1799_v3 = vld [vmem:[%s2425_s1 + $0x384] ss:$8 sps:$4 sm:$0xff]  }
  0x43   :  { %1043 = vmatpush1.bf16.msra.mxu0 %v1701_v5  ;;  %1032 = vmatmul.mubr.bf16.vlgmr.msra.gmra.mxu1 %v1704_v6  ;;  %v1805_v5 = vld [vmem:[%s2425_s1 + $0x474] ss:$8 sps:$4 sm:$0xff]   ;;  %v1797_v6 = vld [vmem:[%s2425_s1 + $0x380] ss:$8 sps:$4 sm:$0xff]  }
  0x44   :  { %1044 = vmatprep.subr.bf16.mxu0 %v1712_v7  ;;  %1086 = vmatpush1.bf16.msra.mxu1 %v1707_v8  ;;  %v1800_v7 = vld [vmem:[%s2426_s0 + $0x10] ss:$36 sps:$4 sm:$0xff]  }
  0x45   :  { %1087 = vmatprep.subr.bf16.mxu1 %v1715_v9  ;;  %1074 = vmatprep.mubr.bf16.mxu0 %v1802_v33  ;;  %v1803_v8 = vld [vmem:[%s2425_s1 + $0x470] ss:$8 sps:$4 sm:$0xff]   ;;  %v1838_v33 = vld [vmem:[%s2427_s4 + $0x20] sm:$0xff]  }
  0x46   :  { %1117 = vmatprep.mubr.bf16.mxu1 %v1808_v36  ;;  %v1806_v9 = vld [vmem:[%s2426_s0 + $0x18] ss:$36 sps:$4 sm:$0xff]   ;;  %v1841_v36 = vld [vmem:[%s2427_s4 + $0x50] sm:$0xff]  }
  0x47   :  { %1045 = vmatpush1.bf16.msra.mxu0 %v1710_v10  ;;  %v1811_v10 = vld [vmem:[%s2425_s1 + $0x464] ss:$8 sps:$4 sm:$0xff]  }
  0x48   :  { %1046 = vmatprep.subr.bf16.mxu0 %v1718_v11  ;;  %1088 = vmatpush1.bf16.msra.mxu1 %v1713_v12  ;;  %v1809_v11 = vld [vmem:[%s2425_s1 + $0x460] ss:$8 sps:$4 sm:$0xff]   ;;  %v1855_v12 = vmov 0  }
  0x49   :  { %1089 = vmatprep.subr.bf16.mxu1 %v1721_v13  ;;  %v1814_v13 = vld [vmem:[%s2425_s1 + $0x454] ss:$8 sps:$4 sm:$0xff]  }
  0x4b   :  { %1047 = vmatpush1.bf16.msra.mxu0 %v1716_v14  ;;  %v1812_v14 = vld [vmem:[%s2425_s1 + $0x450] ss:$8 sps:$4 sm:$0xff]  }
  0x4c   :  { %1048 = vmatprep.subr.bf16.mxu0 %v1724_v15  ;;  %1090 = vmatpush1.bf16.msra.mxu1 %v1719_v16  ;;  %v1817_v15 = vld [vmem:[%s2425_s1 + $0x444] ss:$8 sps:$4 sm:$0xff]   ;;  %v1815_v16 = vld [vmem:[%s2425_s1 + $0x440] ss:$8 sps:$4 sm:$0xff]  }
  0x4d   :  { %1091 = vmatprep.subr.bf16.mxu1 %v1727_v17  ;;  %v1820_v17 = vld [vmem:[%s2425_s1 + $0x434] ss:$8 sps:$4 sm:$0xff]  }
  0x4f   :  { %1049 = vmatpush1.bf16.msra.mxu0 %v1722_v18  ;;  %v1818_v18 = vld [vmem:[%s2425_s1 + $0x430] ss:$8 sps:$4 sm:$0xff]  }
  0x50   :  { %1050 = vmatprep.subr.bf16.mxu0 %v1730_v19  ;;  %1092 = vmatpush1.bf16.msra.mxu1 %v1725_v20  ;;  %v1823_v19 = vld [vmem:[%s2425_s1 + $0x424] ss:$8 sps:$4 sm:$0xff]   ;;  %v1821_v20 = vld [vmem:[%s2425_s1 + $0x420] ss:$8 sps:$4 sm:$0xff]  }
  0x51   :  { %1093 = vmatprep.subr.bf16.mxu1 %v1733_v21  ;;  %v1826_v21 = vld [vmem:[%s2425_s1 + $0x414] ss:$8 sps:$4 sm:$0xff]  }
  0x53   :  { %1051 = vmatpush1.bf16.msra.mxu0 %v1728_v22  ;;  %v1824_v22 = vld [vmem:[%s2425_s1 + $0x410] ss:$8 sps:$4 sm:$0xff]  }
  0x54   :  { %1052 = vmatprep.subr.bf16.mxu0 %v1736_v23  ;;  %1094 = vmatpush1.bf16.msra.mxu1 %v1731_v24  ;;  %v1829_v23 = vld [vmem:[%s2425_s1 + $0x404] ss:$8 sps:$4 sm:$0xff]   ;;  %v1827_v24 = vld [vmem:[%s2425_s1 + $0x400] ss:$8 sps:$4 sm:$0xff]  }
  0x55   :  { %1095 = vmatprep.subr.bf16.mxu1 %v1739_v25  ;;  %v1830_v25 = vld [vmem:[%s2426_s0 + $0x20] ss:$36 sps:$4 sm:$0xff]  }
  0x57   :  { %1053 = vmatpush1.bf16.msra.mxu0 %v1734_v26  ;;  %v1831_v26 = vld [vmem:[%s2427_s4 + $0x78] sm:$0xff]  }
  0x58   :  { %1054 = vmatprep.subr.bf16.mxu0 %v1742_v27  ;;  %1096 = vmatpush1.bf16.msra.mxu1 %v1737_v28  ;;  %v1832_v27 = vld [vmem:[%s2427_s4 + $0x38] sm:$0xff]   ;;  %v1833_v28 = vld [vmem:[%s2427_s4 + $0x70] sm:$0xff]  }
  0x59   :  { %1097 = vmatprep.subr.bf16.mxu1 %v1745_v29  ;;  %v1834_v29 = vld [vmem:[%s2427_s4 + $0x30] sm:$0xff]  }
  0x5b   :  { %1055 = vmatpush1.bf16.msra.mxu0 %v1740_v30  ;;  %v1835_v30 = vld [vmem:[%s2427_s4 + $0x68] sm:$0xff]  }
  0x5c   :  { %1056 = vmatprep.subr.bf16.mxu0 %v1748_v32  ;;  %1098 = vmatpush1.bf16.msra.mxu1 %v1743_v31  ;;  %v1836_v31 = vld [vmem:[%s2427_s4 + $0x28] sm:$0xff]   ;;  %v1837_v32 = vld [vmem:[%s2427_s4 + $0x60] sm:$0xff]  }
  0x5d   :  { %1099 = vmatprep.subr.bf16.mxu1 %v1751_v34  ;;  %v1839_v34 = vld [vmem:[%s2427_s4 + $0x58] sm:$0xff]  }
  0x5f   :  { %1057 = vmatpush1.bf16.msra.mxu0 %v1746_v35  ;;  %v1840_v35 = vld [vmem:[%s2427_s4 + $0x18] sm:$0xff]  }
  0x60   :  { %1058 = vmatprep.subr.bf16.mxu0 %v1754_v37  ;;  %1100 = vmatpush1.bf16.msra.mxu1 %v1749_v38  ;;  %v1842_v37 = vld [vmem:[%s2427_s4 + $0x10] sm:$0xff]   ;;  %v1843_v38 = vld [vmem:[%s2427_s4 + $0x48] sm:$0xff]  }
  0x61   :  { %1101 = vmatprep.subr.bf16.mxu1 %v1757_v39  ;;  %v1844_v39 = vld [vmem:[%s2427_s4 + $0x8] sm:$0xff]  }
  0x63   :  { %1059 = vmatpush2.bf16.msra.mxu0 %v1752_v40  ;;  %v1845_v40 = vld [vmem:[%s2427_s4 + $0x40] sm:$0xff]  }
  0x64   :  { %1060 = vmatprep.subr.bf16.mxu0 %v1760_v41  ;;  %1102 = vmatpush2.bf16.msra.mxu1 %v1755_v42  ;;  %v1846_v41 = vld [vmem:[%s2427_s4] sm:$0xff]  }
  0x65   :  { %1103 = vmatprep.subr.bf16.mxu1 %v1763_v43  ;;  %v180_v43 = vlaneseq }
  0x67   :  { %1061 = vmatpush2.bf16.msra.mxu0 %v1758_v44 }
  0x68   :  { %1062 = vmatprep.subr.bf16.mxu0 %v1766_v45  ;;  %1104 = vmatpush2.bf16.msra.mxu1 %v1761_v46  ;;  %v181_v46 = vshrl.u32 %v180_v43, 7 }
  0x69   :  { %1105 = vmatprep.subr.bf16.mxu1 %v1769_v47 }
  0x6b   :  { %1063 = vmatpush2.bf16.msra.mxu0 %v1764_v48 }
  0x6c   :  { %1064 = vmatprep.subr.bf16.mxu0 %v1772_v49  ;;  %1106 = vmatpush2.bf16.msra.mxu1 %v1767_v50  ;;  %v186_v49 = vsub.s32 1, %v181_v46  ;;  %v178_v50 = vld [vmem:[%s2428_s2] sm:$0x3] }
  0x6d   :  { %1107 = vmatprep.subr.bf16.mxu1 %v1775_v51  ;;  %v182_v51 = vsub.s32 0, %v181_v46 }
  0x6f   :  { %1065 = vmatpush2.bf16.msra.mxu0 %v1770_v52 }
  0x70   :  { %1066 = vmatprep.subr.bf16.mxu0 %v1778_v53  ;;  %1108 = vmatpush2.bf16.msra.mxu1 %v1773_v54 }
  0x71   :  { %1109 = vmatprep.subr.bf16.mxu1 %v1781_v55  ;;  %v187_v55 = vrot.slane %v178_v50, %v186_v49 }
  0x73   :  { %1067 = vmatpush2.bf16.msra.mxu0 %v1776_v56  ;;  %v183_v56 = vrot.slane %v178_v50, %v182_v51 }
  0x74   :  { %1068 = vmatprep.subr.bf16.mxu0 %v1784_v57  ;;  %1110 = vmatpush2.bf16.msra.mxu1 %v1779_v58 }
  0x75   :  { %1111 = vmatprep.subr.bf16.mxu1 %v1787_v59 }
  0x77   :  { %1069 = vmatpush2.bf16.msra.mxu0 %v1782_v60 }
  0x78   :  { %1070 = vmatprep.subr.bf16.mxu0 %v1790_v61  ;;  %1112 = vmatpush2.bf16.msra.mxu1 %v1785_v62 }
  0x79   :  { %1113 = vmatprep.subr.bf16.mxu1 %v1793_v63 }
  0x7b   :  { %1071 = vmatpush2.bf16.msra.mxu0 %v1788_v0 }
  0x7c   :  { %1072 = vmatprep.subr.bf16.mxu0 %v1796_v1  ;;  %1114 = vmatpush2.bf16.msra.mxu1 %v1791_v2 }
  0x7d   :  { %1115 = vmatprep.subr.bf16.mxu1 %v1799_v3 }
  0x7f   :  { %1073 = vmatpush2.bf16.msra.mxu0 %v1794_v4 }
  0x80   :  { %1128 = vmatprep.subr.bf16.mxu0 %v1805_v5  ;;  %1116 = vmatpush2.bf16.msra.mxu1 %v1797_v6 }
  0x81   :  { %1579 = vmatprep.subr.bf16.mxu1 %v1831_v26 }
  0x82   :  { %1075 = vmatmul.mubr.bf16.vlgmr.msra.gmra.mxu0 %v1800_v7 }
  0x83   :  { %1129 = vmatpush1.bf16.msra.mxu0 %v1803_v8  ;;  %1160 = vmatprep.mubr.bf16.mxu0 %v1855_v12  ;;  %v1175_v12 = vld [vmem:[%s2429_s3] sm:$0x3] }
  0x84   :  { %1118 = vmatmul.mubr.bf16.vlgmr.msra.gmra.mxu1 %v1806_v9  ;;  %1130 = vmatprep.subr.bf16.mxu0 %v1811_v10 }
  0x85   :  { %1580 = vmatpush3.bf16.msra.mxu1 %v1832_v27 }
  0x86   :  { %1581 = vmatprep.subr.bf16.mxu1 %v1833_v28 }
  0x87   :  { %1131 = vmatpush1.bf16.msra.mxu0 %v1809_v11 }
  0x88   :  { %1132 = vmatprep.subr.bf16.mxu0 %v1814_v13 }
  0x89   :  { %1582 = vmatpush3.bf16.msra.mxu1 %v1834_v29 }
  0x8a   :  { %1583 = vmatprep.subr.bf16.mxu1 %v1835_v30 }
  0x8b   :  { %1133 = vmatpush1.bf16.msra.mxu0 %v1812_v14 }
  0x8c   :  { %1134 = vmatprep.subr.bf16.mxu0 %v1817_v15 }
  0x8d   :  { %1584 = vmatpush3.bf16.msra.mxu1 %v1836_v31 }
  0x8e   :  { %1585 = vmatprep.subr.bf16.mxu1 %v1837_v32 }
  0x8f   :  { %1135 = vmatpush1.bf16.msra.mxu0 %v1815_v16 }
  0x90   :  { %1136 = vmatprep.subr.bf16.mxu0 %v1820_v17 }
  0x91   :  { %1586 = vmatpush3.bf16.msra.mxu1 %v1838_v33 }
  0x92   :  { %1587 = vmatprep.subr.bf16.mxu1 %v1839_v34 }
  0x93   :  { %1137 = vmatpush1.bf16.msra.mxu0 %v1818_v18  ;;  %v1184_v18 = vrot.slane %v1175_v12, %v186_v49 }
  0x94   :  { %1138 = vmatprep.subr.bf16.mxu0 %v1823_v19 }
  0x95   :  { %1588 = vmatpush3.bf16.msra.mxu1 %v1840_v35 }
  0x96   :  { %1589 = vmatprep.subr.bf16.mxu1 %v1841_v36 }
  0x97   :  { %1139 = vmatpush1.bf16.msra.mxu0 %v1821_v20 }
  0x98   :  { %1140 = vmatprep.subr.bf16.mxu0 %v1826_v21  ;;  %v1180_v21 = vrot.slane %v1175_v12, %v182_v51 }
  0x99   :  { %1590 = vmatpush3.bf16.msra.mxu1 %v1842_v37 }
  0x9a   :  { %1591 = vmatprep.subr.bf16.mxu1 %v1843_v38 }
  0x9b   :  { %1141 = vmatpush1.bf16.msra.mxu0 %v1824_v22 }
  0x9c   :  { %1142 = vmatprep.subr.bf16.mxu0 %v1829_v23 }
  0x9d   :  { %1592 = vmatpush3.bf16.msra.mxu1 %v1844_v39  ;;  %v1374_v39 = vand.u32 127, %v180_v43 }
  0x9e   :  { %1593 = vmatprep.subr.bf16.mxu1 %v1845_v40  ;;  %v1562_v40 = vld [vmem:[%s2430_s5] ss:$0 sm:$0xff] }
  0x9f   :  { %1143 = vmatpush1.bf16.msra.mxu0 %v1827_v24  ;;  %vm1375_vm4 = vcmp.lt.s32.totalorder %v1374_v39, 2 }
  0xa1   :  { %1594 = vmatpush3.bf16.msra.mxu1 %v1846_v41 }
  0xa2   :  { %1161 = vmatmul.mubr.bf16.vlgmr.msra.gmra.mxu0 %v1830_v25 }
 0x102   :  { %v990_v42 = vpop.f32.mrf.mxu0 }
 0x103   :  { %v1033_v45 = vpop.f32.mrf.mxu1  ;;  %v991_v61 = vadd.f32 %v990_v42, %v183_v56 }
 0x104   :  { %v992_v44 = vpop.f32.mrf.mxu0 }
 0x105   :  { %v1035_v48 = vpop.f32.mrf.mxu1  ;;  %v993_v60 = vadd.f32 %v992_v44, %v187_v55  ;;  %v1034_v3 = vadd.f32 %v1033_v45, %v991_v61 }
 0x106   :  { %v994_v47 = vpop.f32.mrf.mxu0 }
 0x107   :  { %v1037_v53 = vpop.f32.mrf.mxu1  ;;  %v995_v62 = vadd.f32 %v994_v47, %v183_v56  ;;  %v1036_v1 = vadd.f32 %v1035_v48, %v993_v60 }
 0x108   :  { %v996_v52 = vpop.f32.mrf.mxu0 }
 0x109   :  { %v1039_v57 = vpop.f32.mrf.mxu1  ;;  %v997_v2 = vadd.f32 %v996_v52, %v187_v55  ;;  %v1038_v4 = vadd.f32 %v1037_v53, %v995_v62 }
 0x10b   :  { %v1040_v9 = vadd.f32 %v1039_v57, %v997_v2 }
 0x142   :  { %v1076_v54 = vpop.f32.mrf.mxu0 }
 0x143   :  { %v1077_v6 = vadd.f32 %v1076_v54, %v1034_v3 }
 0x144   :  { %v1078_v58 = vpop.f32.mrf.mxu0  ;;  %v1119_v59 = vpop.f32.mrf.mxu1 }
 0x145   :  { %v1079_v5 = vadd.f32 %v1078_v58, %v1036_v1  ;;  %v1120_v15 = vadd.f32 %v1119_v59, %v1077_v6 }
 0x146   :  { %v1080_v63 = vpop.f32.mrf.mxu0  ;;  %v1121_v0 = vpop.f32.mrf.mxu1 }
 0x147   :  { %v1081_v10 = vadd.f32 %v1080_v63, %v1038_v4  ;;  %v1122_v13 = vadd.f32 %v1121_v0, %v1079_v5 }
 0x148   :  { %v1082_v7 = vpop.f32.mrf.mxu0  ;;  %v1123_v8 = vpop.f32.mrf.mxu1 }
 0x149   :  { %v1083_v14 = vadd.f32 %v1082_v7, %v1040_v9  ;;  %v1124_v19 = vadd.f32 %v1123_v8, %v1081_v10 }
 0x14a   :  { %v1125_v16 = vpop.f32.mrf.mxu1 }
 0x14b   :  { %v1126_v24 = vadd.f32 %v1125_v16, %v1083_v14 }
 0x162   :  { %v1162_v11 = vpop.f32.mrf.mxu0 }
 0x163   :  { %v1163_v22 = vadd.f32 %v1162_v11, %v1120_v15 }
 0x164   :  { %v1164_v17 = vpop.f32.mrf.mxu0 }
 0x165   :  { %v1165_v20 = vadd.f32 %v1164_v17, %v1122_v13  ;;  %v1187_v30 = vmul.f32 %v1180_v21, %v1163_v22  ;;  %vm1171_vm2 = vcmp.gt.f32.partialorder %v1163_v22, 0.0 }
 0x166   :  { %v1166_v23 = vpop.f32.mrf.mxu0 }
 0x167   :  { %v1167_v25 = vadd.f32 %v1166_v23, %v1124_v19  ;;  %v1188_v27 = vmul.f32 %v1184_v18, %v1165_v20  ;;  %vm1172_vm1 = vcmp.gt.f32.partialorder %v1165_v20, 0.0  ;;  %v1191_v35 = vsel %vm1171_vm2, %v1163_v22, %v1187_v30 }
 0x168   :  { %v1168_v26 = vpop.f32.mrf.mxu0 }
 0x169   :  { %vm1173_vm0 = vcmp.gt.f32.partialorder %v1167_v25, 0.0  ;;  %v1189_v28 = vmul.f32 %v1180_v21, %v1167_v25  ;;  %v1169_v29 = vadd.f32 %v1168_v26, %v1126_v24  ;;  %v1192_v33 = vsel %vm1172_vm1, %v1165_v20, %v1188_v27 }
 0x16b   :  { %vm1174_vm3 = vcmp.gt.f32.partialorder %v1169_v29, 0.0  ;;  %v1190_v31 = vmul.f32 %v1184_v18, %v1169_v29  ;;  %v1193_v32 = vsel %vm1173_vm0, %v1167_v25, %v1189_v28 }
 0x16c   :  { %v1195_v37 = vpack.c.bf16 %v1193_v32, %v1191_v35 }
 0x16d   :  { %v1194_v34 = vsel %vm1174_vm3, %v1169_v29, %v1190_v31 }
 0x16e   :  { %v1196_v36 = vpack.c.bf16 %v1194_v34, %v1192_v33 }
 0x170   :  { %1364 = vmatprep.mubr.bf16.mxu1 %v1196_v36 }
 0x171   :  { %1365 = vmatmul.mubr.bf16.vlgmr.msra.gmra.mxu1 %v1195_v37 }
 0x231   :  { %v1595_v38 = vpop.f32.mrf.mxu1 }
 0x233   :  { %v1596_v41 = vpop.f32.mrf.mxu1 }
 0x234   :  { %v1597_v42 = vadd.f32 %v1596_v41, %v1595_v38 }
 0x235   :  { %v1598_v44 = vpop.f32.mrf.mxu1 }
 0x236   :  { %v1367_v45 = vadd.f32 %v1597_v42, %v1562_v40 }
 0x237   :  { %v1599_v46 = vpop.f32.mrf.mxu1 }
 0x238   :  { %v1600_v47 = vadd.f32 %v1599_v46, %v1598_v44  ;;  %v1376_v48 = vsel %vm1375_vm4, %v1367_v45, -inf }
 0x239   :  { %v1379_v49 = vsel %vm1378_vm5, %v1376_v48, -inf }
 0x23a   :  { %v1370_v50 = vadd.f32 %v1600_v47, %v1562_v40  ;;  %1380 = vmax.xlane.f32.xlu0 %v1379_v49 }
 0x23c   :  { %v1377_v43 = vsel %vm1375_vm4, %v1370_v50, -inf }
 0x23d   :  { %v1382_v51 = vsel %vm1378_vm5, %v1377_v43, -inf }
 0x23e   :  { %1383 = vmax.xlane.f32.xlu0 %v1382_v51 }
 0x2c3   :  { %v1381_v52 = vpop.xlane.xlu0 %1380 }
 0x2c4   :  { %v1385_v53 = vsub.f32 %v1376_v48, %v1381_v52 }
 0x2c6   :  { %v1387_v54 = vmul.f32 1.442695, %v1385_v53 }
 0x2c7   :  { %v1384_v55 = vpop.xlane.xlu0 %1383 }
 0x2c8   :  { %1847 = vpow2.f32 %v1387_v54  ;;  %v1386_v56 = vsub.f32 %v1377_v43, %v1384_v55 }
 0x2ca   :  { %v1389_v57 = vmul.f32 1.442695, %v1386_v56 }
 0x2cc   :  { %1849 = vpow2.f32 %v1389_v57 }
 0x2d5   :  { %v1848_v58 = vpop.eup %1847 }
 0x2d6   :  { %v1391_v59 = vsel %vm1378_vm5, %v1848_v58, 0.0 }
 0x2d7   :  { %1392 = vadd.xlane.f32.xlu1 %v1391_v59 }
 0x2d9   :  { %v1850_v60 = vpop.eup %1849 }
 0x2da   :  { %v1394_v61 = vsel %vm1378_vm5, %v1850_v60, 0.0 }
 0x2db   :  { %1395 = vadd.xlane.f32.xlu1 %v1394_v61 }
 0x360   :  { %v1393_v62 = vpop.xlane.xlu1 %1392 }
 0x361   :  { %1851 = vrcp.f32 %v1393_v62 }
 0x364   :  { %v1396_v63 = vpop.xlane.xlu1 %1395 }
 0x365   :  { %1853 = vrcp.f32 %v1396_v63 }
 0x36e   :  { %v1852_v0 = vpop.eup %1851 }
 0x36f   :  { %v1398_v1 = vmul.f32 %v1852_v0, %v1848_v58 }
 0x371   :  { %v1401_v2 = vsel %vm1375_vm4, %v1398_v1, %v1367_v45 }
 0x372   :  { %v1854_v3 = vpop.eup %1853  ;;  %1403 = vst.msk [vmem:[%s2431_s6] sm:$0xff] %vm1378_vm5, %v1401_v2 }
 0x373   :  { %v1400_v4 = vmul.f32 %v1854_v3, %v1850_v60 }
 0x375   :  { %v1402_v5 = vsel %vm1375_vm4, %v1400_v4, %v1370_v50 }
 0x376   :  { %1404 = vst.msk [vmem:[%s2431_s6 + $0x8] sm:$0xff] %vm1378_vm5, %v1402_v5 }

</bundles_post_ra>
